<compile_context>
chip_gen: v5e
topology: v5e:2x2
jax: 0.10.0
libtpu: 0.0.40
codegen_flags: <defaults>
</compile_context>

<pallas_src>
import functools
import math

import jax
import jax.numpy as jnp
from jax.experimental import pallas as pl
from jax.experimental.pallas import tpu as pltpu  # noqa: F401 (TPU backend)

# ----------------------------- configuration --------------------------------
VOCAB = 50           # input_dim
HID = 32             # hid_dim
L1 = 16              # layer1_hid_dim
N_LAYERS = 2
N_HEADS = 4
HEAD_DIM = HID // N_HEADS
PF = 64              # pf_dim
MAX_LEN = 100
EPS = 1e-5           # nn.LayerNorm default eps
NEG_INF = -1e10
EMB_SCALE = math.sqrt(float(HID))
# attention energies scaled by 1/sqrt(head_dim) (bentrevett-style MHA)
ATTN_SCALE = 1.0 / math.sqrt(float(HEAD_DIM))


def _layer_norm(x, gamma, beta):
    mu = jnp.mean(x, axis=-1, keepdims=True)
    var = jnp.mean((x - mu) ** 2, axis=-1, keepdims=True)
    return (x - mu) * jax.lax.rsqrt(var + EPS) * gamma + beta


# ------------------------------- fused kernel --------------------------------
def _encoder_kernel(B, S,
                    ids_ref, bias_ref, emb_ref, pos_ref,
                    wqkv_ref, bqkv_ref, wo_ref, w1_ref, w2_ref, vec_ref,
                    out_ref):
    H, D, NH = HID, HEAD_DIM, N_HEADS
    BS = B * S

    # ---- token embedding as a one-hot matmul (gather stays on the MXU) ----
    ids = ids_ref[...]                                            # (BS, 1) i32
    vocab_iota = jax.lax.broadcasted_iota(jnp.int32, (BS, VOCAB), 1)
    onehot = (vocab_iota == ids).astype(jnp.float32)              # (BS, VOCAB)
    # emb_ref already contains (emb_table @ emb_w) * sqrt(H);
    # pos_ref already contains tiled positional table + emb_b * sqrt(H)
    x = jnp.dot(onehot, emb_ref[...],
                preferred_element_type=jnp.float32) + pos_ref[...]

    bias = bias_ref[...]                                          # (F, F) precomputed

    for li in range(N_LAYERS):                                    # unrolled
        # per-layer vectors: leading-dim indexing, lane slices start at lane 0
        g1 = vec_ref[li, 0][:, :H]
        be1 = vec_ref[li, 1][:, :H]
        g2 = vec_ref[li, 2][:, :H]
        be2 = vec_ref[li, 3][:, :H]
        bo = vec_ref[li, 4][:, :H]
        b2 = vec_ref[li, 5][:, :H]
        b1 = vec_ref[li, 6][:, :PF]

        # per-head Q/K/V projections; folded rows f = h*BS + (b*S + s)
        # (outputs stacked along sublanes only — no lane extraction of acts)
        def folded(c, _li=li):
            return jnp.concatenate(
                [jnp.dot(x, wqkv_ref[_li, c, h],
                         preferred_element_type=jnp.float32) + bqkv_ref[_li, c, h]
                 for h in range(NH)], axis=0)                     # (F, D)

        qf = folded(0)          # Q weights/bias pre-scaled by 1/sqrt(D) offline
        kf = folded(1)
        vf = folded(2)

        # all heads & all batch elements: ONE energy matmul + ONE softmax
        e = jax.lax.dot_general(qf, kf, (((1,), (1,)), ((), ())),
                                preferred_element_type=jnp.float32) + bias
        e = e - jnp.max(e, axis=-1, keepdims=True)
        p = jnp.exp(e)
        p = p * pl.reciprocal(jnp.sum(p, axis=-1, keepdims=True), approx=True)
        attn_f = jnp.dot(p, vf, preferred_element_type=jnp.float32)   # (F, D)

        # per-head output projections as independent dots, pairwise-reduced
        projs = [jnp.dot(attn_f[h * BS:(h + 1) * BS, :], wo_ref[li, h],
                         preferred_element_type=jnp.float32)
                 for h in range(NH)]
        while len(projs) > 1:
            nxt = [projs[i] + projs[i + 1] for i in range(0, len(projs) - 1, 2)]
            if len(projs) % 2:
                nxt.append(projs[-1])
            projs = nxt
        o = projs[0] + bo

        x1 = _layer_norm(x + o, g1, be1)                          # res + LN1

        # position-wise feed-forward
        hdn = jnp.maximum(
            jnp.dot(x1, w1_ref[li], preferred_element_type=jnp.float32) + b1,
            0.0)
        ff = jnp.dot(hdn, w2_ref[li], preferred_element_type=jnp.float32) + b2
        x = _layer_norm(x1 + ff, g2, be2)                         # res + LN2

    out_ref[...] = x                                              # (BS, H) slab write


# --------------------------- parameter preparation ---------------------------
def prepare_params(params):
    """Pack/fold weights into the kernel's operand layout (done once)."""
    L, H, D, NH = N_LAYERS, HID, HEAD_DIM, N_HEADS

    emb_proj = (params["emb_table"] @ params["emb_w"]) * EMB_SCALE      # (V, H)
    emb_b_scaled = params["emb_b"] * EMB_SCALE                          # (1, H)

    # per-head Q/K/V weights & biases, attention scale folded into Q
    wqkv = params["wqkv"].reshape(L, H, 3, NH, D).transpose(0, 2, 3, 1, 4)  # (L,3,NH,H,D)
    bqkv = params["bqkv"].reshape(L, 3, NH, 1, D)                           # (L,3,NH,1,D)
    wqkv = wqkv.at[:, 0].multiply(ATTN_SCALE)
    bqkv = bqkv.at[:, 0].multiply(ATTN_SCALE)

    wo = params["wo"].reshape(L, NH, D, H)                                  # (L,NH,D,H)

    def pad128(v):                                        # (L, W) -> (L, 128)
        return jnp.pad(v, ((0, 0), (0, 128 - v.shape[-1])))

    rows = [params["ln"][:, 0], params["ln"][:, 1],       # g1, be1
            params["ln"][:, 2], params["ln"][:, 3],       # g2, be2
            params["bo"][:, 0], params["b2"][:, 0],       # bo, b2
            params["b1"][:, 0]]                           # b1 (width PF)
    vecs = jnp.stack([pad128(r) for r in rows], axis=1)[:, :, None, :]      # (L,7,1,128)

    return {
        "emb_proj": emb_proj,
        "emb_b_scaled": emb_b_scaled,
        "pos_table": params["pos_table"],
        "wqkv": wqkv,
        "bqkv": bqkv,
        "wo": wo,
        "w1": params["w1"],
        "w2": params["w2"],
        "vecs": vecs,
    }


# -------------------------------- wrapper ------------------------------------
@jax.jit
def encoder_forward(prep, src, src_mask):
    """src: int32 (B, S) token ids; src_mask: float32 (B, S), 1 = keep."""
    B, S = src.shape
    BS = B * S
    F = BS * N_HEADS

    ids = src.reshape(BS, 1).astype(jnp.int32)
    pos_fused = jnp.tile(prep["pos_table"][:S], (B, 1)) + prep["emb_b_scaled"]

    # block-structured additive bias over folded rows f = h*BS + (b*S + s)
    fi = jnp.arange(F, dtype=jnp.int32)[:, None]
    fj = jnp.arange(F, dtype=jnp.int32)[None, :]
    same_head = (fi // BS) == (fj // BS)
    same_batch = ((fi % BS) // S) == ((fj % BS) // S)
    key_ok = jnp.tile(src_mask.reshape(-1) != 0.0, N_HEADS)[None, :]
    attn_bias = jnp.where(same_head & same_batch & key_ok,
                          0.0, NEG_INF).astype(jnp.float32)

    out = pl.pallas_call(
        functools.partial(_encoder_kernel, B, S),
        out_shape=jax.ShapeDtypeStruct((BS, HID), jnp.float32),
    )(ids, attn_bias, prep["emb_proj"], pos_fused,
      prep["wqkv"], prep["bqkv"], prep["wo"],
      prep["w1"], prep["w2"], prep["vecs"])
    return out.reshape(B, S, HID)              # free metadata reshape in wrapper


# --------------------------- parameter init ----------------------------------
def init_params(key):
    std = 0.02

    def rnd(k, shape, scale=std):
        return scale * jax.random.normal(k, shape, dtype=jnp.float32)

    ks = jax.random.split(key, 4 + N_LAYERS)
    params = {
        "emb_table": rnd(ks[0], (VOCAB, L1)),
        "emb_w": rnd(ks[1], (L1, HID)),
        "emb_b": rnd(ks[2], (1, HID)),
        "pos_table": rnd(ks[3], (MAX_LEN, HID)),
    }
    names = ["wqkv", "bqkv", "wo", "bo", "w1", "b1", "w2", "b2", "ln"]
    stacks = {n: [] for n in names}
    for li in range(N_LAYERS):
        lk = jax.random.split(ks[4 + li], 12)
        stacks["wqkv"].append(rnd(lk[0], (HID, 3 * HID)))
        stacks["bqkv"].append(rnd(lk[1], (1, 3 * HID)))
        stacks["wo"].append(rnd(lk[2], (HID, HID)))
        stacks["bo"].append(rnd(lk[3], (1, HID)))
        stacks["w1"].append(rnd(lk[4], (HID, PF)))
        stacks["b1"].append(rnd(lk[5], (1, PF)))
        stacks["w2"].append(rnd(lk[6], (PF, HID)))
        stacks["b2"].append(rnd(lk[7], (1, HID)))
        g1 = 1.0 + rnd(lk[8], (HID,), 0.05)
        be1 = rnd(lk[9], (HID,), 0.05)
        g2 = 1.0 + rnd(lk[10], (HID,), 0.05)
        be2 = rnd(lk[11], (HID,), 0.05)
        stacks["ln"].append(jnp.stack([g1, be1, g2, be2], axis=0))
    for n in names:
        params[n] = jnp.stack(stacks[n], axis=0)
    return params


# ---------------------------- pure-JAX reference ------------------------------
def encoder_reference(params, src, src_mask):
    B, S = src.shape
    emb = jnp.take(params["emb_table"], src, axis=0)                  # (B,S,L1)
    x = (emb @ params["emb_w"] + params["emb_b"]) * EMB_SCALE + params["pos_table"][:S]
    for li in range(N_LAYERS):
        g1, be1, g2, be2 = params["ln"][li]
        qkv = x @ params["wqkv"][li] + params["bqkv"][li]
        q, k, v = qkv[..., :HID], qkv[..., HID:2 * HID], qkv[..., 2 * HID:]
        heads = []
        for h in range(N_HEADS):
            sl = slice(h * HEAD_DIM, (h + 1) * HEAD_DIM)
            e = jnp.einsum("bqd,bkd->bqk", q[..., sl], k[..., sl]) * ATTN_SCALE
            e = jnp.where(src_mask[:, None, :] != 0.0, e, NEG_INF)
            a = jax.nn.softmax(e, axis=-1)
            heads.append(jnp.einsum("bqk,bkd->bqd", a, v[..., sl]))
        o = jnp.concatenate(heads, axis=-1) @ params["wo"][li] + params["bo"][li]
        x = _layer_norm(x + o, g1, be1)
        ff = jax.nn.relu(x @ params["w1"][li] + params["b1"][li]) @ params["w2"][li] + params["b2"][li]
        x = _layer_norm(x + ff, g2, be2)
    return x


# --------------------------------- main ---------------------------------------
if __name__ == "__main__":
    key = jax.random.PRNGKey(0)
    k_ids, k_params = jax.random.split(key)

    B, S = 2, 8
    src = jax.random.randint(k_ids, (B, S), 0, VOCAB, dtype=jnp.int32)
    # batch element 1 has two padding positions masked out
    src_mask = jnp.ones((B, S), jnp.float32).at[1, 6:].set(0.0)

    params = init_params(k_params)
    prep = jax.tree_util.tree_map(jax.device_put, prepare_params(params))

    out = jax.block_until_ready(encoder_forward(prep, src, src_mask))

    ref = encoder_reference(params, src, src_mask)
    max_err = float(jnp.max(jnp.abs(out - ref)))
    if not jnp.allclose(out, ref, atol=5e-3, rtol=5e-3):
        raise AssertionError(
            f"Pallas encoder output does not match JAX reference (max abs err {max_err:.3e})")

    print("KERNEL_OK")
</pallas_src>

<mosaic_0001>
module attributes {stable_mosaic.version = 11 : i64} {
  func.func @_encoder_kernel(%arg0: memref<16x1xi32, #tpu.memory_space<vmem>>, %arg1: memref<64x64xf32, #tpu.memory_space<vmem>>, %arg2: memref<50x32xf32, #tpu.memory_space<vmem>>, %arg3: memref<16x32xf32, #tpu.memory_space<vmem>>, %arg4: memref<2x3x4x32x8xf32, #tpu.memory_space<vmem>>, %arg5: memref<2x3x4x1x8xf32, #tpu.memory_space<vmem>>, %arg6: memref<2x4x8x32xf32, #tpu.memory_space<vmem>>, %arg7: memref<2x32x64xf32, #tpu.memory_space<vmem>>, %arg8: memref<2x64x32xf32, #tpu.memory_space<vmem>>, %arg9: memref<2x7x1x128xf32, #tpu.memory_space<vmem>>, %arg10: memref<16x32xf32, #tpu.memory_space<vmem>>) attributes {dimension_semantics = [], scalar_prefetch = 0 : i64, scratch_operands = 0 : i64, tpu.core_type = #tpu.core_type<tc>} {
    %c0 = arith.constant 0 : index
    %c0_0 = arith.constant 0 : index
    %0 = vector.load %arg0[%c0, %c0_0] : memref<16x1xi32, #tpu.memory_space<vmem>>, vector<16x1xi32>
    %1 = tpu.iota {dimensions = array<i32: 1>} : vector<16x50xi32>
    %2 = vector.broadcast %0 : vector<16x1xi32> to vector<16x50xi32>
    %3 = arith.cmpi eq, %1, %2 : vector<16x50xi32>
    %4 = arith.extui %3 : vector<16x50xi1> to vector<16x50xi32>
    %5 = arith.sitofp %4 : vector<16x50xi32> to vector<16x50xf32>
    %c0_1 = arith.constant 0 : index
    %c0_2 = arith.constant 0 : index
    %6 = vector.load %arg2[%c0_1, %c0_2] : memref<50x32xf32, #tpu.memory_space<vmem>>, vector<50x32xf32>
    %cst = arith.constant dense<0.000000e+00> : vector<16x32xf32>
    %7 = tpu.matmul %5, %6, %cst {dimension_numbers = #tpu.dot_dimension_numbers<[1], [0], [0], [1], [0, 0, 1, 1], [], []>} : vector<16x50xf32>, vector<50x32xf32>, vector<16x32xf32> -> vector<16x32xf32>
    %c0_3 = arith.constant 0 : index
    %c0_4 = arith.constant 0 : index
    %8 = vector.load %arg3[%c0_3, %c0_4] : memref<16x32xf32, #tpu.memory_space<vmem>>, vector<16x32xf32>
    %9 = arith.addf %7, %8 : vector<16x32xf32>
    %c0_5 = arith.constant 0 : index
    %c0_6 = arith.constant 0 : index
    %10 = vector.load %arg1[%c0_5, %c0_6] : memref<64x64xf32, #tpu.memory_space<vmem>>, vector<64x64xf32>
    %c0_7 = arith.constant 0 : index
    %c0_8 = arith.constant 0 : index
    %c0_9 = arith.constant 0 : index
    %c0_10 = arith.constant 0 : index
    %11 = vector.load %arg9[%c0_7, %c0_8, %c0_9, %c0_10] : memref<2x7x1x128xf32, #tpu.memory_space<vmem>>, vector<1x1x1x128xf32>
    %12 = vector.shape_cast %11 : vector<1x1x1x128xf32> to vector<1x128xf32>
    %13 = vector.extract_strided_slice %12 {offsets = [0, 0], sizes = [1, 32], strides = [1, 1]} : vector<1x128xf32> to vector<1x32xf32>
    %c0_11 = arith.constant 0 : index
    %c1 = arith.constant 1 : index
    %c0_12 = arith.constant 0 : index
    %c0_13 = arith.constant 0 : index
    %14 = vector.load %arg9[%c0_11, %c1, %c0_12, %c0_13] : memref<2x7x1x128xf32, #tpu.memory_space<vmem>>, vector<1x1x1x128xf32>
    %15 = vector.shape_cast %14 : vector<1x1x1x128xf32> to vector<1x128xf32>
    %16 = vector.extract_strided_slice %15 {offsets = [0, 0], sizes = [1, 32], strides = [1, 1]} : vector<1x128xf32> to vector<1x32xf32>
    %c0_14 = arith.constant 0 : index
    %c2 = arith.constant 2 : index
    %c0_15 = arith.constant 0 : index
    %c0_16 = arith.constant 0 : index
    %17 = vector.load %arg9[%c0_14, %c2, %c0_15, %c0_16] : memref<2x7x1x128xf32, #tpu.memory_space<vmem>>, vector<1x1x1x128xf32>
    %18 = vector.shape_cast %17 : vector<1x1x1x128xf32> to vector<1x128xf32>
    %19 = vector.extract_strided_slice %18 {offsets = [0, 0], sizes = [1, 32], strides = [1, 1]} : vector<1x128xf32> to vector<1x32xf32>
    %c0_17 = arith.constant 0 : index
    %c3 = arith.constant 3 : index
    %c0_18 = arith.constant 0 : index
    %c0_19 = arith.constant 0 : index
    %20 = vector.load %arg9[%c0_17, %c3, %c0_18, %c0_19] : memref<2x7x1x128xf32, #tpu.memory_space<vmem>>, vector<1x1x1x128xf32>
    %21 = vector.shape_cast %20 : vector<1x1x1x128xf32> to vector<1x128xf32>
    %22 = vector.extract_strided_slice %21 {offsets = [0, 0], sizes = [1, 32], strides = [1, 1]} : vector<1x128xf32> to vector<1x32xf32>
    %c0_20 = arith.constant 0 : index
    %c4 = arith.constant 4 : index
    %c0_21 = arith.constant 0 : index
    %c0_22 = arith.constant 0 : index
    %23 = vector.load %arg9[%c0_20, %c4, %c0_21, %c0_22] : memref<2x7x1x128xf32, #tpu.memory_space<vmem>>, vector<1x1x1x128xf32>
    %24 = vector.shape_cast %23 : vector<1x1x1x128xf32> to vector<1x128xf32>
    %25 = vector.extract_strided_slice %24 {offsets = [0, 0], sizes = [1, 32], strides = [1, 1]} : vector<1x128xf32> to vector<1x32xf32>
    %c0_23 = arith.constant 0 : index
    %c5 = arith.constant 5 : index
    %c0_24 = arith.constant 0 : index
    %c0_25 = arith.constant 0 : index
    %26 = vector.load %arg9[%c0_23, %c5, %c0_24, %c0_25] : memref<2x7x1x128xf32, #tpu.memory_space<vmem>>, vector<1x1x1x128xf32>
    %27 = vector.shape_cast %26 : vector<1x1x1x128xf32> to vector<1x128xf32>
    %28 = vector.extract_strided_slice %27 {offsets = [0, 0], sizes = [1, 32], strides = [1, 1]} : vector<1x128xf32> to vector<1x32xf32>
    %c0_26 = arith.constant 0 : index
    %c6 = arith.constant 6 : index
    %c0_27 = arith.constant 0 : index
    %c0_28 = arith.constant 0 : index
    %29 = vector.load %arg9[%c0_26, %c6, %c0_27, %c0_28] : memref<2x7x1x128xf32, #tpu.memory_space<vmem>>, vector<1x1x1x128xf32>
    %30 = vector.shape_cast %29 : vector<1x1x1x128xf32> to vector<1x128xf32>
    %31 = vector.extract_strided_slice %30 {offsets = [0, 0], sizes = [1, 64], strides = [1, 1]} : vector<1x128xf32> to vector<1x64xf32>
    %c0_29 = arith.constant 0 : index
    %c0_30 = arith.constant 0 : index
    %c0_31 = arith.constant 0 : index
    %c0_32 = arith.constant 0 : index
    %c0_33 = arith.constant 0 : index
    %32 = vector.load %arg4[%c0_29, %c0_30, %c0_31, %c0_32, %c0_33] : memref<2x3x4x32x8xf32, #tpu.memory_space<vmem>>, vector<1x1x1x32x8xf32>
    %33 = vector.shape_cast %32 : vector<1x1x1x32x8xf32> to vector<32x8xf32>
    %cst_34 = arith.constant dense<0.000000e+00> : vector<16x8xf32>
    %34 = tpu.matmul %9, %33, %cst_34 {dimension_numbers = #tpu.dot_dimension_numbers<[1], [0], [0], [1], [0, 0, 1, 1], [], []>} : vector<16x32xf32>, vector<32x8xf32>, vector<16x8xf32> -> vector<16x8xf32>
    %c0_35 = arith.constant 0 : index
    %c0_36 = arith.constant 0 : index
    %c0_37 = arith.constant 0 : index
    %c0_38 = arith.constant 0 : index
    %c0_39 = arith.constant 0 : index
    %35 = vector.load %arg5[%c0_35, %c0_36, %c0_37, %c0_38, %c0_39] : memref<2x3x4x1x8xf32, #tpu.memory_space<vmem>>, vector<1x1x1x1x8xf32>
    %36 = vector.shape_cast %35 : vector<1x1x1x1x8xf32> to vector<1x8xf32>
    %37 = vector.broadcast %36 : vector<1x8xf32> to vector<16x8xf32>
    %38 = arith.addf %34, %37 : vector<16x8xf32>
    %c0_40 = arith.constant 0 : index
    %c0_41 = arith.constant 0 : index
    %c1_42 = arith.constant 1 : index
    %c0_43 = arith.constant 0 : index
    %c0_44 = arith.constant 0 : index
    %39 = vector.load %arg4[%c0_40, %c0_41, %c1_42, %c0_43, %c0_44] : memref<2x3x4x32x8xf32, #tpu.memory_space<vmem>>, vector<1x1x1x32x8xf32>
    %40 = vector.shape_cast %39 : vector<1x1x1x32x8xf32> to vector<32x8xf32>
    %cst_45 = arith.constant dense<0.000000e+00> : vector<16x8xf32>
    %41 = tpu.matmul %9, %40, %cst_45 {dimension_numbers = #tpu.dot_dimension_numbers<[1], [0], [0], [1], [0, 0, 1, 1], [], []>} : vector<16x32xf32>, vector<32x8xf32>, vector<16x8xf32> -> vector<16x8xf32>
    %c0_46 = arith.constant 0 : index
    %c0_47 = arith.constant 0 : index
    %c1_48 = arith.constant 1 : index
    %c0_49 = arith.constant 0 : index
    %c0_50 = arith.constant 0 : index
    %42 = vector.load %arg5[%c0_46, %c0_47, %c1_48, %c0_49, %c0_50] : memref<2x3x4x1x8xf32, #tpu.memory_space<vmem>>, vector<1x1x1x1x8xf32>
    %43 = vector.shape_cast %42 : vector<1x1x1x1x8xf32> to vector<1x8xf32>
    %44 = vector.broadcast %43 : vector<1x8xf32> to vector<16x8xf32>
    %45 = arith.addf %41, %44 : vector<16x8xf32>
    %c0_51 = arith.constant 0 : index
    %c0_52 = arith.constant 0 : index
    %c2_53 = arith.constant 2 : index
    %c0_54 = arith.constant 0 : index
    %c0_55 = arith.constant 0 : index
    %46 = vector.load %arg4[%c0_51, %c0_52, %c2_53, %c0_54, %c0_55] : memref<2x3x4x32x8xf32, #tpu.memory_space<vmem>>, vector<1x1x1x32x8xf32>
    %47 = vector.shape_cast %46 : vector<1x1x1x32x8xf32> to vector<32x8xf32>
    %cst_56 = arith.constant dense<0.000000e+00> : vector<16x8xf32>
    %48 = tpu.matmul %9, %47, %cst_56 {dimension_numbers = #tpu.dot_dimension_numbers<[1], [0], [0], [1], [0, 0, 1, 1], [], []>} : vector<16x32xf32>, vector<32x8xf32>, vector<16x8xf32> -> vector<16x8xf32>
    %c0_57 = arith.constant 0 : index
    %c0_58 = arith.constant 0 : index
    %c2_59 = arith.constant 2 : index
    %c0_60 = arith.constant 0 : index
    %c0_61 = arith.constant 0 : index
    %49 = vector.load %arg5[%c0_57, %c0_58, %c2_59, %c0_60, %c0_61] : memref<2x3x4x1x8xf32, #tpu.memory_space<vmem>>, vector<1x1x1x1x8xf32>
    %50 = vector.shape_cast %49 : vector<1x1x1x1x8xf32> to vector<1x8xf32>
    %51 = vector.broadcast %50 : vector<1x8xf32> to vector<16x8xf32>
    %52 = arith.addf %48, %51 : vector<16x8xf32>
    %c0_62 = arith.constant 0 : index
    %c0_63 = arith.constant 0 : index
    %c3_64 = arith.constant 3 : index
    %c0_65 = arith.constant 0 : index
    %c0_66 = arith.constant 0 : index
    %53 = vector.load %arg4[%c0_62, %c0_63, %c3_64, %c0_65, %c0_66] : memref<2x3x4x32x8xf32, #tpu.memory_space<vmem>>, vector<1x1x1x32x8xf32>
    %54 = vector.shape_cast %53 : vector<1x1x1x32x8xf32> to vector<32x8xf32>
    %cst_67 = arith.constant dense<0.000000e+00> : vector<16x8xf32>
    %55 = tpu.matmul %9, %54, %cst_67 {dimension_numbers = #tpu.dot_dimension_numbers<[1], [0], [0], [1], [0, 0, 1, 1], [], []>} : vector<16x32xf32>, vector<32x8xf32>, vector<16x8xf32> -> vector<16x8xf32>
    %c0_68 = arith.constant 0 : index
    %c0_69 = arith.constant 0 : index
    %c3_70 = arith.constant 3 : index
    %c0_71 = arith.constant 0 : index
    %c0_72 = arith.constant 0 : index
    %56 = vector.load %arg5[%c0_68, %c0_69, %c3_70, %c0_71, %c0_72] : memref<2x3x4x1x8xf32, #tpu.memory_space<vmem>>, vector<1x1x1x1x8xf32>
    %57 = vector.shape_cast %56 : vector<1x1x1x1x8xf32> to vector<1x8xf32>
    %58 = vector.broadcast %57 : vector<1x8xf32> to vector<16x8xf32>
    %59 = arith.addf %55, %58 : vector<16x8xf32>
    %60 = tpu.concatenate %38, %45, %52, %59 in 0 : vector<16x8xf32>, vector<16x8xf32>, vector<16x8xf32>, vector<16x8xf32> -> vector<64x8xf32>
    %c0_73 = arith.constant 0 : index
    %c1_74 = arith.constant 1 : index
    %c0_75 = arith.constant 0 : index
    %c0_76 = arith.constant 0 : index
    %c0_77 = arith.constant 0 : index
    %61 = vector.load %arg4[%c0_73, %c1_74, %c0_75, %c0_76, %c0_77] : memref<2x3x4x32x8xf32, #tpu.memory_space<vmem>>, vector<1x1x1x32x8xf32>
    %62 = vector.shape_cast %61 : vector<1x1x1x32x8xf32> to vector<32x8xf32>
    %cst_78 = arith.constant dense<0.000000e+00> : vector<16x8xf32>
    %63 = tpu.matmul %9, %62, %cst_78 {dimension_numbers = #tpu.dot_dimension_numbers<[1], [0], [0], [1], [0, 0, 1, 1], [], []>} : vector<16x32xf32>, vector<32x8xf32>, vector<16x8xf32> -> vector<16x8xf32>
    %c0_79 = arith.constant 0 : index
    %c1_80 = arith.constant 1 : index
    %c0_81 = arith.constant 0 : index
    %c0_82 = arith.constant 0 : index
    %c0_83 = arith.constant 0 : index
    %64 = vector.load %arg5[%c0_79, %c1_80, %c0_81, %c0_82, %c0_83] : memref<2x3x4x1x8xf32, #tpu.memory_space<vmem>>, vector<1x1x1x1x8xf32>
    %65 = vector.shape_cast %64 : vector<1x1x1x1x8xf32> to vector<1x8xf32>
    %66 = vector.broadcast %65 : vector<1x8xf32> to vector<16x8xf32>
    %67 = arith.addf %63, %66 : vector<16x8xf32>
    %c0_84 = arith.constant 0 : index
    %c1_85 = arith.constant 1 : index
    %c1_86 = arith.constant 1 : index
    %c0_87 = arith.constant 0 : index
    %c0_88 = arith.constant 0 : index
    %68 = vector.load %arg4[%c0_84, %c1_85, %c1_86, %c0_87, %c0_88] : memref<2x3x4x32x8xf32, #tpu.memory_space<vmem>>, vector<1x1x1x32x8xf32>
    %69 = vector.shape_cast %68 : vector<1x1x1x32x8xf32> to vector<32x8xf32>
    %cst_89 = arith.constant dense<0.000000e+00> : vector<16x8xf32>
    %70 = tpu.matmul %9, %69, %cst_89 {dimension_numbers = #tpu.dot_dimension_numbers<[1], [0], [0], [1], [0, 0, 1, 1], [], []>} : vector<16x32xf32>, vector<32x8xf32>, vector<16x8xf32> -> vector<16x8xf32>
    %c0_90 = arith.constant 0 : index
    %c1_91 = arith.constant 1 : index
    %c1_92 = arith.constant 1 : index
    %c0_93 = arith.constant 0 : index
    %c0_94 = arith.constant 0 : index
    %71 = vector.load %arg5[%c0_90, %c1_91, %c1_92, %c0_93, %c0_94] : memref<2x3x4x1x8xf32, #tpu.memory_space<vmem>>, vector<1x1x1x1x8xf32>
    %72 = vector.shape_cast %71 : vector<1x1x1x1x8xf32> to vector<1x8xf32>
    %73 = vector.broadcast %72 : vector<1x8xf32> to vector<16x8xf32>
    %74 = arith.addf %70, %73 : vector<16x8xf32>
    %c0_95 = arith.constant 0 : index
    %c1_96 = arith.constant 1 : index
    %c2_97 = arith.constant 2 : index
    %c0_98 = arith.constant 0 : index
    %c0_99 = arith.constant 0 : index
    %75 = vector.load %arg4[%c0_95, %c1_96, %c2_97, %c0_98, %c0_99] : memref<2x3x4x32x8xf32, #tpu.memory_space<vmem>>, vector<1x1x1x32x8xf32>
    %76 = vector.shape_cast %75 : vector<1x1x1x32x8xf32> to vector<32x8xf32>
    %cst_100 = arith.constant dense<0.000000e+00> : vector<16x8xf32>
    %77 = tpu.matmul %9, %76, %cst_100 {dimension_numbers = #tpu.dot_dimension_numbers<[1], [0], [0], [1], [0, 0, 1, 1], [], []>} : vector<16x32xf32>, vector<32x8xf32>, vector<16x8xf32> -> vector<16x8xf32>
    %c0_101 = arith.constant 0 : index
    %c1_102 = arith.constant 1 : index
    %c2_103 = arith.constant 2 : index
    %c0_104 = arith.constant 0 : index
    %c0_105 = arith.constant 0 : index
    %78 = vector.load %arg5[%c0_101, %c1_102, %c2_103, %c0_104, %c0_105] : memref<2x3x4x1x8xf32, #tpu.memory_space<vmem>>, vector<1x1x1x1x8xf32>
    %79 = vector.shape_cast %78 : vector<1x1x1x1x8xf32> to vector<1x8xf32>
    %80 = vector.broadcast %79 : vector<1x8xf32> to vector<16x8xf32>
    %81 = arith.addf %77, %80 : vector<16x8xf32>
    %c0_106 = arith.constant 0 : index
    %c1_107 = arith.constant 1 : index
    %c3_108 = arith.constant 3 : index
    %c0_109 = arith.constant 0 : index
    %c0_110 = arith.constant 0 : index
    %82 = vector.load %arg4[%c0_106, %c1_107, %c3_108, %c0_109, %c0_110] : memref<2x3x4x32x8xf32, #tpu.memory_space<vmem>>, vector<1x1x1x32x8xf32>
    %83 = vector.shape_cast %82 : vector<1x1x1x32x8xf32> to vector<32x8xf32>
    %cst_111 = arith.constant dense<0.000000e+00> : vector<16x8xf32>
    %84 = tpu.matmul %9, %83, %cst_111 {dimension_numbers = #tpu.dot_dimension_numbers<[1], [0], [0], [1], [0, 0, 1, 1], [], []>} : vector<16x32xf32>, vector<32x8xf32>, vector<16x8xf32> -> vector<16x8xf32>
    %c0_112 = arith.constant 0 : index
    %c1_113 = arith.constant 1 : index
    %c3_114 = arith.constant 3 : index
    %c0_115 = arith.constant 0 : index
    %c0_116 = arith.constant 0 : index
    %85 = vector.load %arg5[%c0_112, %c1_113, %c3_114, %c0_115, %c0_116] : memref<2x3x4x1x8xf32, #tpu.memory_space<vmem>>, vector<1x1x1x1x8xf32>
    %86 = vector.shape_cast %85 : vector<1x1x1x1x8xf32> to vector<1x8xf32>
    %87 = vector.broadcast %86 : vector<1x8xf32> to vector<16x8xf32>
    %88 = arith.addf %84, %87 : vector<16x8xf32>
    %89 = tpu.concatenate %67, %74, %81, %88 in 0 : vector<16x8xf32>, vector<16x8xf32>, vector<16x8xf32>, vector<16x8xf32> -> vector<64x8xf32>
    %c0_117 = arith.constant 0 : index
    %c2_118 = arith.constant 2 : index
    %c0_119 = arith.constant 0 : index
    %c0_120 = arith.constant 0 : index
    %c0_121 = arith.constant 0 : index
    %90 = vector.load %arg4[%c0_117, %c2_118, %c0_119, %c0_120, %c0_121] : memref<2x3x4x32x8xf32, #tpu.memory_space<vmem>>, vector<1x1x1x32x8xf32>
    %91 = vector.shape_cast %90 : vector<1x1x1x32x8xf32> to vector<32x8xf32>
    %cst_122 = arith.constant dense<0.000000e+00> : vector<16x8xf32>
    %92 = tpu.matmul %9, %91, %cst_122 {dimension_numbers = #tpu.dot_dimension_numbers<[1], [0], [0], [1], [0, 0, 1, 1], [], []>} : vector<16x32xf32>, vector<32x8xf32>, vector<16x8xf32> -> vector<16x8xf32>
    %c0_123 = arith.constant 0 : index
    %c2_124 = arith.constant 2 : index
    %c0_125 = arith.constant 0 : index
    %c0_126 = arith.constant 0 : index
    %c0_127 = arith.constant 0 : index
    %93 = vector.load %arg5[%c0_123, %c2_124, %c0_125, %c0_126, %c0_127] : memref<2x3x4x1x8xf32, #tpu.memory_space<vmem>>, vector<1x1x1x1x8xf32>
    %94 = vector.shape_cast %93 : vector<1x1x1x1x8xf32> to vector<1x8xf32>
    %95 = vector.broadcast %94 : vector<1x8xf32> to vector<16x8xf32>
    %96 = arith.addf %92, %95 : vector<16x8xf32>
    %c0_128 = arith.constant 0 : index
    %c2_129 = arith.constant 2 : index
    %c1_130 = arith.constant 1 : index
    %c0_131 = arith.constant 0 : index
    %c0_132 = arith.constant 0 : index
    %97 = vector.load %arg4[%c0_128, %c2_129, %c1_130, %c0_131, %c0_132] : memref<2x3x4x32x8xf32, #tpu.memory_space<vmem>>, vector<1x1x1x32x8xf32>
    %98 = vector.shape_cast %97 : vector<1x1x1x32x8xf32> to vector<32x8xf32>
    %cst_133 = arith.constant dense<0.000000e+00> : vector<16x8xf32>
    %99 = tpu.matmul %9, %98, %cst_133 {dimension_numbers = #tpu.dot_dimension_numbers<[1], [0], [0], [1], [0, 0, 1, 1], [], []>} : vector<16x32xf32>, vector<32x8xf32>, vector<16x8xf32> -> vector<16x8xf32>
    %c0_134 = arith.constant 0 : index
    %c2_135 = arith.constant 2 : index
    %c1_136 = arith.constant 1 : index
    %c0_137 = arith.constant 0 : index
    %c0_138 = arith.constant 0 : index
    %100 = vector.load %arg5[%c0_134, %c2_135, %c1_136, %c0_137, %c0_138] : memref<2x3x4x1x8xf32, #tpu.memory_space<vmem>>, vector<1x1x1x1x8xf32>
    %101 = vector.shape_cast %100 : vector<1x1x1x1x8xf32> to vector<1x8xf32>
    %102 = vector.broadcast %101 : vector<1x8xf32> to vector<16x8xf32>
    %103 = arith.addf %99, %102 : vector<16x8xf32>
    %c0_139 = arith.constant 0 : index
    %c2_140 = arith.constant 2 : index
    %c2_141 = arith.constant 2 : index
    %c0_142 = arith.constant 0 : index
    %c0_143 = arith.constant 0 : index
    %104 = vector.load %arg4[%c0_139, %c2_140, %c2_141, %c0_142, %c0_143] : memref<2x3x4x32x8xf32, #tpu.memory_space<vmem>>, vector<1x1x1x32x8xf32>
    %105 = vector.shape_cast %104 : vector<1x1x1x32x8xf32> to vector<32x8xf32>
    %cst_144 = arith.constant dense<0.000000e+00> : vector<16x8xf32>
    %106 = tpu.matmul %9, %105, %cst_144 {dimension_numbers = #tpu.dot_dimension_numbers<[1], [0], [0], [1], [0, 0, 1, 1], [], []>} : vector<16x32xf32>, vector<32x8xf32>, vector<16x8xf32> -> vector<16x8xf32>
    %c0_145 = arith.constant 0 : index
    %c2_146 = arith.constant 2 : index
    %c2_147 = arith.constant 2 : index
    %c0_148 = arith.constant 0 : index
    %c0_149 = arith.constant 0 : index
    %107 = vector.load %arg5[%c0_145, %c2_146, %c2_147, %c0_148, %c0_149] : memref<2x3x4x1x8xf32, #tpu.memory_space<vmem>>, vector<1x1x1x1x8xf32>
    %108 = vector.shape_cast %107 : vector<1x1x1x1x8xf32> to vector<1x8xf32>
    %109 = vector.broadcast %108 : vector<1x8xf32> to vector<16x8xf32>
    %110 = arith.addf %106, %109 : vector<16x8xf32>
    %c0_150 = arith.constant 0 : index
    %c2_151 = arith.constant 2 : index
    %c3_152 = arith.constant 3 : index
    %c0_153 = arith.constant 0 : index
    %c0_154 = arith.constant 0 : index
    %111 = vector.load %arg4[%c0_150, %c2_151, %c3_152, %c0_153, %c0_154] : memref<2x3x4x32x8xf32, #tpu.memory_space<vmem>>, vector<1x1x1x32x8xf32>
    %112 = vector.shape_cast %111 : vector<1x1x1x32x8xf32> to vector<32x8xf32>
    %cst_155 = arith.constant dense<0.000000e+00> : vector<16x8xf32>
    %113 = tpu.matmul %9, %112, %cst_155 {dimension_numbers = #tpu.dot_dimension_numbers<[1], [0], [0], [1], [0, 0, 1, 1], [], []>} : vector<16x32xf32>, vector<32x8xf32>, vector<16x8xf32> -> vector<16x8xf32>
    %c0_156 = arith.constant 0 : index
    %c2_157 = arith.constant 2 : index
    %c3_158 = arith.constant 3 : index
    %c0_159 = arith.constant 0 : index
    %c0_160 = arith.constant 0 : index
    %114 = vector.load %arg5[%c0_156, %c2_157, %c3_158, %c0_159, %c0_160] : memref<2x3x4x1x8xf32, #tpu.memory_space<vmem>>, vector<1x1x1x1x8xf32>
    %115 = vector.shape_cast %114 : vector<1x1x1x1x8xf32> to vector<1x8xf32>
    %116 = vector.broadcast %115 : vector<1x8xf32> to vector<16x8xf32>
    %117 = arith.addf %113, %116 : vector<16x8xf32>
    %118 = tpu.concatenate %96, %103, %110, %117 in 0 : vector<16x8xf32>, vector<16x8xf32>, vector<16x8xf32>, vector<16x8xf32> -> vector<64x8xf32>
    %cst_161 = arith.constant dense<0.000000e+00> : vector<64x64xf32>
    %119 = tpu.matmul %60, %89, %cst_161 {dimension_numbers = #tpu.dot_dimension_numbers<[1], [1], [0], [0], [0, 0, 1, 0], [], []>} : vector<64x8xf32>, vector<64x8xf32>, vector<64x64xf32> -> vector<64x64xf32>
    %120 = arith.addf %119, %10 : vector<64x64xf32>
    %cst_162 = arith.constant dense<0xFF800000> : vector<64xf32>
    %121 = vector.multi_reduction <maximumf>, %120, %cst_162 [1] : vector<64x64xf32> to vector<64xf32>
    %122 = vector.shape_cast %121 : vector<64xf32> to vector<64x1xf32>
    %123 = vector.broadcast %122 : vector<64x1xf32> to vector<64x64xf32>
    %124 = arith.subf %120, %123 : vector<64x64xf32>
    %125 = math.exp %124 : vector<64x64xf32>
    %cst_163 = arith.constant dense<0.000000e+00> : vector<64xf32>
    %126 = vector.multi_reduction <add>, %125, %cst_163 [1] : vector<64x64xf32> to vector<64xf32>
    %127 = vector.shape_cast %126 : vector<64xf32> to vector<64x1xf32>
    %128 = tpu.reciprocal %127 {approx = true} : vector<64x1xf32> -> vector<64x1xf32>
    %129 = vector.broadcast %128 : vector<64x1xf32> to vector<64x64xf32>
    %130 = arith.mulf %125, %129 : vector<64x64xf32>
    %cst_164 = arith.constant dense<0.000000e+00> : vector<64x8xf32>
    %131 = tpu.matmul %130, %118, %cst_164 {dimension_numbers = #tpu.dot_dimension_numbers<[1], [0], [0], [1], [0, 0, 1, 1], [], []>} : vector<64x64xf32>, vector<64x8xf32>, vector<64x8xf32> -> vector<64x8xf32>
    %132 = vector.extract_strided_slice %131 {offsets = [0, 0], sizes = [16, 8], strides = [1, 1]} : vector<64x8xf32> to vector<16x8xf32>
    %c0_165 = arith.constant 0 : index
    %c0_166 = arith.constant 0 : index
    %c0_167 = arith.constant 0 : index
    %c0_168 = arith.constant 0 : index
    %133 = vector.load %arg6[%c0_165, %c0_166, %c0_167, %c0_168] : memref<2x4x8x32xf32, #tpu.memory_space<vmem>>, vector<1x1x8x32xf32>
    %134 = vector.shape_cast %133 : vector<1x1x8x32xf32> to vector<8x32xf32>
    %cst_169 = arith.constant dense<0.000000e+00> : vector<16x32xf32>
    %135 = tpu.matmul %132, %134, %cst_169 {dimension_numbers = #tpu.dot_dimension_numbers<[1], [0], [0], [1], [0, 0, 1, 1], [], []>} : vector<16x8xf32>, vector<8x32xf32>, vector<16x32xf32> -> vector<16x32xf32>
    %136 = vector.extract_strided_slice %131 {offsets = [16, 0], sizes = [16, 8], strides = [1, 1]} : vector<64x8xf32> to vector<16x8xf32>
    %c0_170 = arith.constant 0 : index
    %c1_171 = arith.constant 1 : index
    %c0_172 = arith.constant 0 : index
    %c0_173 = arith.constant 0 : index
    %137 = vector.load %arg6[%c0_170, %c1_171, %c0_172, %c0_173] : memref<2x4x8x32xf32, #tpu.memory_space<vmem>>, vector<1x1x8x32xf32>
    %138 = vector.shape_cast %137 : vector<1x1x8x32xf32> to vector<8x32xf32>
    %cst_174 = arith.constant dense<0.000000e+00> : vector<16x32xf32>
    %139 = tpu.matmul %136, %138, %cst_174 {dimension_numbers = #tpu.dot_dimension_numbers<[1], [0], [0], [1], [0, 0, 1, 1], [], []>} : vector<16x8xf32>, vector<8x32xf32>, vector<16x32xf32> -> vector<16x32xf32>
    %140 = vector.extract_strided_slice %131 {offsets = [32, 0], sizes = [16, 8], strides = [1, 1]} : vector<64x8xf32> to vector<16x8xf32>
    %c0_175 = arith.constant 0 : index
    %c2_176 = arith.constant 2 : index
    %c0_177 = arith.constant 0 : index
    %c0_178 = arith.constant 0 : index
    %141 = vector.load %arg6[%c0_175, %c2_176, %c0_177, %c0_178] : memref<2x4x8x32xf32, #tpu.memory_space<vmem>>, vector<1x1x8x32xf32>
    %142 = vector.shape_cast %141 : vector<1x1x8x32xf32> to vector<8x32xf32>
    %cst_179 = arith.constant dense<0.000000e+00> : vector<16x32xf32>
    %143 = tpu.matmul %140, %142, %cst_179 {dimension_numbers = #tpu.dot_dimension_numbers<[1], [0], [0], [1], [0, 0, 1, 1], [], []>} : vector<16x8xf32>, vector<8x32xf32>, vector<16x32xf32> -> vector<16x32xf32>
    %144 = vector.extract_strided_slice %131 {offsets = [48, 0], sizes = [16, 8], strides = [1, 1]} : vector<64x8xf32> to vector<16x8xf32>
    %c0_180 = arith.constant 0 : index
    %c3_181 = arith.constant 3 : index
    %c0_182 = arith.constant 0 : index
    %c0_183 = arith.constant 0 : index
    %145 = vector.load %arg6[%c0_180, %c3_181, %c0_182, %c0_183] : memref<2x4x8x32xf32, #tpu.memory_space<vmem>>, vector<1x1x8x32xf32>
    %146 = vector.shape_cast %145 : vector<1x1x8x32xf32> to vector<8x32xf32>
    %cst_184 = arith.constant dense<0.000000e+00> : vector<16x32xf32>
    %147 = tpu.matmul %144, %146, %cst_184 {dimension_numbers = #tpu.dot_dimension_numbers<[1], [0], [0], [1], [0, 0, 1, 1], [], []>} : vector<16x8xf32>, vector<8x32xf32>, vector<16x32xf32> -> vector<16x32xf32>
    %148 = arith.addf %135, %139 : vector<16x32xf32>
    %149 = arith.addf %143, %147 : vector<16x32xf32>
    %150 = arith.addf %148, %149 : vector<16x32xf32>
    %151 = vector.broadcast %25 : vector<1x32xf32> to vector<16x32xf32>
    %152 = arith.addf %150, %151 : vector<16x32xf32>
    %153 = arith.addf %9, %152 : vector<16x32xf32>
    %cst_185 = arith.constant dense<0.000000e+00> : vector<16xf32>
    %154 = vector.multi_reduction <add>, %153, %cst_185 [1] : vector<16x32xf32> to vector<16xf32>
    %155 = vector.shape_cast %154 : vector<16xf32> to vector<16x1xf32>
    %cst_186 = arith.constant 3.200000e+01 : f32
    %156 = vector.broadcast %cst_186 : f32 to vector<16x1xf32>
    %157 = arith.divf %155, %156 : vector<16x1xf32>
    %158 = vector.broadcast %157 : vector<16x1xf32> to vector<16x32xf32>
    %159 = arith.subf %153, %158 : vector<16x32xf32>
    %160 = arith.mulf %159, %159 : vector<16x32xf32>
    %cst_187 = arith.constant dense<0.000000e+00> : vector<16xf32>
    %161 = vector.multi_reduction <add>, %160, %cst_187 [1] : vector<16x32xf32> to vector<16xf32>
    %162 = vector.shape_cast %161 : vector<16xf32> to vector<16x1xf32>
    %cst_188 = arith.constant 3.200000e+01 : f32
    %163 = vector.broadcast %cst_188 : f32 to vector<16x1xf32>
    %164 = arith.divf %162, %163 : vector<16x1xf32>
    %165 = vector.broadcast %157 : vector<16x1xf32> to vector<16x32xf32>
    %166 = arith.subf %153, %165 : vector<16x32xf32>
    %cst_189 = arith.constant 9.99999974E-6 : f32
    %167 = vector.broadcast %cst_189 : f32 to vector<16x1xf32>
    %168 = arith.addf %164, %167 : vector<16x1xf32>
    %169 = math.rsqrt %168 : vector<16x1xf32>
    %170 = vector.broadcast %169 : vector<16x1xf32> to vector<16x32xf32>
    %171 = arith.mulf %166, %170 : vector<16x32xf32>
    %172 = vector.broadcast %13 : vector<1x32xf32> to vector<16x32xf32>
    %173 = arith.mulf %171, %172 : vector<16x32xf32>
    %174 = vector.broadcast %16 : vector<1x32xf32> to vector<16x32xf32>
    %175 = arith.addf %173, %174 : vector<16x32xf32>
    %c0_190 = arith.constant 0 : index
    %c0_191 = arith.constant 0 : index
    %c0_192 = arith.constant 0 : index
    %176 = vector.load %arg7[%c0_190, %c0_191, %c0_192] : memref<2x32x64xf32, #tpu.memory_space<vmem>>, vector<1x32x64xf32>
    %177 = vector.shape_cast %176 : vector<1x32x64xf32> to vector<32x64xf32>
    %cst_193 = arith.constant dense<0.000000e+00> : vector<16x64xf32>
    %178 = tpu.matmul %175, %177, %cst_193 {dimension_numbers = #tpu.dot_dimension_numbers<[1], [0], [0], [1], [0, 0, 1, 1], [], []>} : vector<16x32xf32>, vector<32x64xf32>, vector<16x64xf32> -> vector<16x64xf32>
    %179 = vector.broadcast %31 : vector<1x64xf32> to vector<16x64xf32>
    %180 = arith.addf %178, %179 : vector<16x64xf32>
    %cst_194 = arith.constant 0.000000e+00 : f32
    %181 = vector.broadcast %cst_194 : f32 to vector<16x64xf32>
    %182 = arith.maximumf %180, %181 : vector<16x64xf32>
    %c0_195 = arith.constant 0 : index
    %c0_196 = arith.constant 0 : index
    %c0_197 = arith.constant 0 : index
    %183 = vector.load %arg8[%c0_195, %c0_196, %c0_197] : memref<2x64x32xf32, #tpu.memory_space<vmem>>, vector<1x64x32xf32>
    %184 = vector.shape_cast %183 : vector<1x64x32xf32> to vector<64x32xf32>
    %cst_198 = arith.constant dense<0.000000e+00> : vector<16x32xf32>
    %185 = tpu.matmul %182, %184, %cst_198 {dimension_numbers = #tpu.dot_dimension_numbers<[1], [0], [0], [1], [0, 0, 1, 1], [], []>} : vector<16x64xf32>, vector<64x32xf32>, vector<16x32xf32> -> vector<16x32xf32>
    %186 = vector.broadcast %28 : vector<1x32xf32> to vector<16x32xf32>
    %187 = arith.addf %185, %186 : vector<16x32xf32>
    %188 = arith.addf %175, %187 : vector<16x32xf32>
    %cst_199 = arith.constant dense<0.000000e+00> : vector<16xf32>
    %189 = vector.multi_reduction <add>, %188, %cst_199 [1] : vector<16x32xf32> to vector<16xf32>
    %190 = vector.shape_cast %189 : vector<16xf32> to vector<16x1xf32>
    %cst_200 = arith.constant 3.200000e+01 : f32
    %191 = vector.broadcast %cst_200 : f32 to vector<16x1xf32>
    %192 = arith.divf %190, %191 : vector<16x1xf32>
    %193 = vector.broadcast %192 : vector<16x1xf32> to vector<16x32xf32>
    %194 = arith.subf %188, %193 : vector<16x32xf32>
    %195 = arith.mulf %194, %194 : vector<16x32xf32>
    %cst_201 = arith.constant dense<0.000000e+00> : vector<16xf32>
    %196 = vector.multi_reduction <add>, %195, %cst_201 [1] : vector<16x32xf32> to vector<16xf32>
    %197 = vector.shape_cast %196 : vector<16xf32> to vector<16x1xf32>
    %cst_202 = arith.constant 3.200000e+01 : f32
    %198 = vector.broadcast %cst_202 : f32 to vector<16x1xf32>
    %199 = arith.divf %197, %198 : vector<16x1xf32>
    %200 = vector.broadcast %192 : vector<16x1xf32> to vector<16x32xf32>
    %201 = arith.subf %188, %200 : vector<16x32xf32>
    %cst_203 = arith.constant 9.99999974E-6 : f32
    %202 = vector.broadcast %cst_203 : f32 to vector<16x1xf32>
    %203 = arith.addf %199, %202 : vector<16x1xf32>
    %204 = math.rsqrt %203 : vector<16x1xf32>
    %205 = vector.broadcast %204 : vector<16x1xf32> to vector<16x32xf32>
    %206 = arith.mulf %201, %205 : vector<16x32xf32>
    %207 = vector.broadcast %19 : vector<1x32xf32> to vector<16x32xf32>
    %208 = arith.mulf %206, %207 : vector<16x32xf32>
    %209 = vector.broadcast %22 : vector<1x32xf32> to vector<16x32xf32>
    %210 = arith.addf %208, %209 : vector<16x32xf32>
    %c1_204 = arith.constant 1 : index
    %c0_205 = arith.constant 0 : index
    %c0_206 = arith.constant 0 : index
    %c0_207 = arith.constant 0 : index
    %211 = vector.load %arg9[%c1_204, %c0_205, %c0_206, %c0_207] : memref<2x7x1x128xf32, #tpu.memory_space<vmem>>, vector<1x1x1x128xf32>
    %212 = vector.shape_cast %211 : vector<1x1x1x128xf32> to vector<1x128xf32>
    %213 = vector.extract_strided_slice %212 {offsets = [0, 0], sizes = [1, 32], strides = [1, 1]} : vector<1x128xf32> to vector<1x32xf32>
    %c1_208 = arith.constant 1 : index
    %c1_209 = arith.constant 1 : index
    %c0_210 = arith.constant 0 : index
    %c0_211 = arith.constant 0 : index
    %214 = vector.load %arg9[%c1_208, %c1_209, %c0_210, %c0_211] : memref<2x7x1x128xf32, #tpu.memory_space<vmem>>, vector<1x1x1x128xf32>
    %215 = vector.shape_cast %214 : vector<1x1x1x128xf32> to vector<1x128xf32>
    %216 = vector.extract_strided_slice %215 {offsets = [0, 0], sizes = [1, 32], strides = [1, 1]} : vector<1x128xf32> to vector<1x32xf32>
    %c1_212 = arith.constant 1 : index
    %c2_213 = arith.constant 2 : index
    %c0_214 = arith.constant 0 : index
    %c0_215 = arith.constant 0 : index
    %217 = vector.load %arg9[%c1_212, %c2_213, %c0_214, %c0_215] : memref<2x7x1x128xf32, #tpu.memory_space<vmem>>, vector<1x1x1x128xf32>
    %218 = vector.shape_cast %217 : vector<1x1x1x128xf32> to vector<1x128xf32>
    %219 = vector.extract_strided_slice %218 {offsets = [0, 0], sizes = [1, 32], strides = [1, 1]} : vector<1x128xf32> to vector<1x32xf32>
    %c1_216 = arith.constant 1 : index
    %c3_217 = arith.constant 3 : index
    %c0_218 = arith.constant 0 : index
    %c0_219 = arith.constant 0 : index
    %220 = vector.load %arg9[%c1_216, %c3_217, %c0_218, %c0_219] : memref<2x7x1x128xf32, #tpu.memory_space<vmem>>, vector<1x1x1x128xf32>
    %221 = vector.shape_cast %220 : vector<1x1x1x128xf32> to vector<1x128xf32>
    %222 = vector.extract_strided_slice %221 {offsets = [0, 0], sizes = [1, 32], strides = [1, 1]} : vector<1x128xf32> to vector<1x32xf32>
    %c1_220 = arith.constant 1 : index
    %c4_221 = arith.constant 4 : index
    %c0_222 = arith.constant 0 : index
    %c0_223 = arith.constant 0 : index
    %223 = vector.load %arg9[%c1_220, %c4_221, %c0_222, %c0_223] : memref<2x7x1x128xf32, #tpu.memory_space<vmem>>, vector<1x1x1x128xf32>
    %224 = vector.shape_cast %223 : vector<1x1x1x128xf32> to vector<1x128xf32>
    %225 = vector.extract_strided_slice %224 {offsets = [0, 0], sizes = [1, 32], strides = [1, 1]} : vector<1x128xf32> to vector<1x32xf32>
    %c1_224 = arith.constant 1 : index
    %c5_225 = arith.constant 5 : index
    %c0_226 = arith.constant 0 : index
    %c0_227 = arith.constant 0 : index
    %226 = vector.load %arg9[%c1_224, %c5_225, %c0_226, %c0_227] : memref<2x7x1x128xf32, #tpu.memory_space<vmem>>, vector<1x1x1x128xf32>
    %227 = vector.shape_cast %226 : vector<1x1x1x128xf32> to vector<1x128xf32>
    %228 = vector.extract_strided_slice %227 {offsets = [0, 0], sizes = [1, 32], strides = [1, 1]} : vector<1x128xf32> to vector<1x32xf32>
    %c1_228 = arith.constant 1 : index
    %c6_229 = arith.constant 6 : index
    %c0_230 = arith.constant 0 : index
    %c0_231 = arith.constant 0 : index
    %229 = vector.load %arg9[%c1_228, %c6_229, %c0_230, %c0_231] : memref<2x7x1x128xf32, #tpu.memory_space<vmem>>, vector<1x1x1x128xf32>
    %230 = vector.shape_cast %229 : vector<1x1x1x128xf32> to vector<1x128xf32>
    %231 = vector.extract_strided_slice %230 {offsets = [0, 0], sizes = [1, 64], strides = [1, 1]} : vector<1x128xf32> to vector<1x64xf32>
    %c1_232 = arith.constant 1 : index
    %c0_233 = arith.constant 0 : index
    %c0_234 = arith.constant 0 : index
    %c0_235 = arith.constant 0 : index
    %c0_236 = arith.constant 0 : index
    %232 = vector.load %arg4[%c1_232, %c0_233, %c0_234, %c0_235, %c0_236] : memref<2x3x4x32x8xf32, #tpu.memory_space<vmem>>, vector<1x1x1x32x8xf32>
    %233 = vector.shape_cast %232 : vector<1x1x1x32x8xf32> to vector<32x8xf32>
    %cst_237 = arith.constant dense<0.000000e+00> : vector<16x8xf32>
    %234 = tpu.matmul %210, %233, %cst_237 {dimension_numbers = #tpu.dot_dimension_numbers<[1], [0], [0], [1], [0, 0, 1, 1], [], []>} : vector<16x32xf32>, vector<32x8xf32>, vector<16x8xf32> -> vector<16x8xf32>
    %c1_238 = arith.constant 1 : index
    %c0_239 = arith.constant 0 : index
    %c0_240 = arith.constant 0 : index
    %c0_241 = arith.constant 0 : index
    %c0_242 = arith.constant 0 : index
    %235 = vector.load %arg5[%c1_238, %c0_239, %c0_240, %c0_241, %c0_242] : memref<2x3x4x1x8xf32, #tpu.memory_space<vmem>>, vector<1x1x1x1x8xf32>
    %236 = vector.shape_cast %235 : vector<1x1x1x1x8xf32> to vector<1x8xf32>
    %237 = vector.broadcast %236 : vector<1x8xf32> to vector<16x8xf32>
    %238 = arith.addf %234, %237 : vector<16x8xf32>
    %c1_243 = arith.constant 1 : index
    %c0_244 = arith.constant 0 : index
    %c1_245 = arith.constant 1 : index
    %c0_246 = arith.constant 0 : index
    %c0_247 = arith.constant 0 : index
    %239 = vector.load %arg4[%c1_243, %c0_244, %c1_245, %c0_246, %c0_247] : memref<2x3x4x32x8xf32, #tpu.memory_space<vmem>>, vector<1x1x1x32x8xf32>
    %240 = vector.shape_cast %239 : vector<1x1x1x32x8xf32> to vector<32x8xf32>
    %cst_248 = arith.constant dense<0.000000e+00> : vector<16x8xf32>
    %241 = tpu.matmul %210, %240, %cst_248 {dimension_numbers = #tpu.dot_dimension_numbers<[1], [0], [0], [1], [0, 0, 1, 1], [], []>} : vector<16x32xf32>, vector<32x8xf32>, vector<16x8xf32> -> vector<16x8xf32>
    %c1_249 = arith.constant 1 : index
    %c0_250 = arith.constant 0 : index
    %c1_251 = arith.constant 1 : index
    %c0_252 = arith.constant 0 : index
    %c0_253 = arith.constant 0 : index
    %242 = vector.load %arg5[%c1_249, %c0_250, %c1_251, %c0_252, %c0_253] : memref<2x3x4x1x8xf32, #tpu.memory_space<vmem>>, vector<1x1x1x1x8xf32>
    %243 = vector.shape_cast %242 : vector<1x1x1x1x8xf32> to vector<1x8xf32>
    %244 = vector.broadcast %243 : vector<1x8xf32> to vector<16x8xf32>
    %245 = arith.addf %241, %244 : vector<16x8xf32>
    %c1_254 = arith.constant 1 : index
    %c0_255 = arith.constant 0 : index
    %c2_256 = arith.constant 2 : index
    %c0_257 = arith.constant 0 : index
    %c0_258 = arith.constant 0 : index
    %246 = vector.load %arg4[%c1_254, %c0_255, %c2_256, %c0_257, %c0_258] : memref<2x3x4x32x8xf32, #tpu.memory_space<vmem>>, vector<1x1x1x32x8xf32>
    %247 = vector.shape_cast %246 : vector<1x1x1x32x8xf32> to vector<32x8xf32>
    %cst_259 = arith.constant dense<0.000000e+00> : vector<16x8xf32>
    %248 = tpu.matmul %210, %247, %cst_259 {dimension_numbers = #tpu.dot_dimension_numbers<[1], [0], [0], [1], [0, 0, 1, 1], [], []>} : vector<16x32xf32>, vector<32x8xf32>, vector<16x8xf32> -> vector<16x8xf32>
    %c1_260 = arith.constant 1 : index
    %c0_261 = arith.constant 0 : index
    %c2_262 = arith.constant 2 : index
    %c0_263 = arith.constant 0 : index
    %c0_264 = arith.constant 0 : index
    %249 = vector.load %arg5[%c1_260, %c0_261, %c2_262, %c0_263, %c0_264] : memref<2x3x4x1x8xf32, #tpu.memory_space<vmem>>, vector<1x1x1x1x8xf32>
    %250 = vector.shape_cast %249 : vector<1x1x1x1x8xf32> to vector<1x8xf32>
    %251 = vector.broadcast %250 : vector<1x8xf32> to vector<16x8xf32>
    %252 = arith.addf %248, %251 : vector<16x8xf32>
    %c1_265 = arith.constant 1 : index
    %c0_266 = arith.constant 0 : index
    %c3_267 = arith.constant 3 : index
    %c0_268 = arith.constant 0 : index
    %c0_269 = arith.constant 0 : index
    %253 = vector.load %arg4[%c1_265, %c0_266, %c3_267, %c0_268, %c0_269] : memref<2x3x4x32x8xf32, #tpu.memory_space<vmem>>, vector<1x1x1x32x8xf32>
    %254 = vector.shape_cast %253 : vector<1x1x1x32x8xf32> to vector<32x8xf32>
    %cst_270 = arith.constant dense<0.000000e+00> : vector<16x8xf32>
    %255 = tpu.matmul %210, %254, %cst_270 {dimension_numbers = #tpu.dot_dimension_numbers<[1], [0], [0], [1], [0, 0, 1, 1], [], []>} : vector<16x32xf32>, vector<32x8xf32>, vector<16x8xf32> -> vector<16x8xf32>
    %c1_271 = arith.constant 1 : index
    %c0_272 = arith.constant 0 : index
    %c3_273 = arith.constant 3 : index
    %c0_274 = arith.constant 0 : index
    %c0_275 = arith.constant 0 : index
    %256 = vector.load %arg5[%c1_271, %c0_272, %c3_273, %c0_274, %c0_275] : memref<2x3x4x1x8xf32, #tpu.memory_space<vmem>>, vector<1x1x1x1x8xf32>
    %257 = vector.shape_cast %256 : vector<1x1x1x1x8xf32> to vector<1x8xf32>
    %258 = vector.broadcast %257 : vector<1x8xf32> to vector<16x8xf32>
    %259 = arith.addf %255, %258 : vector<16x8xf32>
    %260 = tpu.concatenate %238, %245, %252, %259 in 0 : vector<16x8xf32>, vector<16x8xf32>, vector<16x8xf32>, vector<16x8xf32> -> vector<64x8xf32>
    %c1_276 = arith.constant 1 : index
    %c1_277 = arith.constant 1 : index
    %c0_278 = arith.constant 0 : index
    %c0_279 = arith.constant 0 : index
    %c0_280 = arith.constant 0 : index
    %261 = vector.load %arg4[%c1_276, %c1_277, %c0_278, %c0_279, %c0_280] : memref<2x3x4x32x8xf32, #tpu.memory_space<vmem>>, vector<1x1x1x32x8xf32>
    %262 = vector.shape_cast %261 : vector<1x1x1x32x8xf32> to vector<32x8xf32>
    %cst_281 = arith.constant dense<0.000000e+00> : vector<16x8xf32>
    %263 = tpu.matmul %210, %262, %cst_281 {dimension_numbers = #tpu.dot_dimension_numbers<[1], [0], [0], [1], [0, 0, 1, 1], [], []>} : vector<16x32xf32>, vector<32x8xf32>, vector<16x8xf32> -> vector<16x8xf32>
    %c1_282 = arith.constant 1 : index
    %c1_283 = arith.constant 1 : index
    %c0_284 = arith.constant 0 : index
    %c0_285 = arith.constant 0 : index
    %c0_286 = arith.constant 0 : index
    %264 = vector.load %arg5[%c1_282, %c1_283, %c0_284, %c0_285, %c0_286] : memref<2x3x4x1x8xf32, #tpu.memory_space<vmem>>, vector<1x1x1x1x8xf32>
    %265 = vector.shape_cast %264 : vector<1x1x1x1x8xf32> to vector<1x8xf32>
    %266 = vector.broadcast %265 : vector<1x8xf32> to vector<16x8xf32>
    %267 = arith.addf %263, %266 : vector<16x8xf32>
    %c1_287 = arith.constant 1 : index
    %c1_288 = arith.constant 1 : index
    %c1_289 = arith.constant 1 : index
    %c0_290 = arith.constant 0 : index
    %c0_291 = arith.constant 0 : index
    %268 = vector.load %arg4[%c1_287, %c1_288, %c1_289, %c0_290, %c0_291] : memref<2x3x4x32x8xf32, #tpu.memory_space<vmem>>, vector<1x1x1x32x8xf32>
    %269 = vector.shape_cast %268 : vector<1x1x1x32x8xf32> to vector<32x8xf32>
    %cst_292 = arith.constant dense<0.000000e+00> : vector<16x8xf32>
    %270 = tpu.matmul %210, %269, %cst_292 {dimension_numbers = #tpu.dot_dimension_numbers<[1], [0], [0], [1], [0, 0, 1, 1], [], []>} : vector<16x32xf32>, vector<32x8xf32>, vector<16x8xf32> -> vector<16x8xf32>
    %c1_293 = arith.constant 1 : index
    %c1_294 = arith.constant 1 : index
    %c1_295 = arith.constant 1 : index
    %c0_296 = arith.constant 0 : index
    %c0_297 = arith.constant 0 : index
    %271 = vector.load %arg5[%c1_293, %c1_294, %c1_295, %c0_296, %c0_297] : memref<2x3x4x1x8xf32, #tpu.memory_space<vmem>>, vector<1x1x1x1x8xf32>
    %272 = vector.shape_cast %271 : vector<1x1x1x1x8xf32> to vector<1x8xf32>
    %273 = vector.broadcast %272 : vector<1x8xf32> to vector<16x8xf32>
    %274 = arith.addf %270, %273 : vector<16x8xf32>
    %c1_298 = arith.constant 1 : index
    %c1_299 = arith.constant 1 : index
    %c2_300 = arith.constant 2 : index
    %c0_301 = arith.constant 0 : index
    %c0_302 = arith.constant 0 : index
    %275 = vector.load %arg4[%c1_298, %c1_299, %c2_300, %c0_301, %c0_302] : memref<2x3x4x32x8xf32, #tpu.memory_space<vmem>>, vector<1x1x1x32x8xf32>
    %276 = vector.shape_cast %275 : vector<1x1x1x32x8xf32> to vector<32x8xf32>
    %cst_303 = arith.constant dense<0.000000e+00> : vector<16x8xf32>
    %277 = tpu.matmul %210, %276, %cst_303 {dimension_numbers = #tpu.dot_dimension_numbers<[1], [0], [0], [1], [0, 0, 1, 1], [], []>} : vector<16x32xf32>, vector<32x8xf32>, vector<16x8xf32> -> vector<16x8xf32>
    %c1_304 = arith.constant 1 : index
    %c1_305 = arith.constant 1 : index
    %c2_306 = arith.constant 2 : index
    %c0_307 = arith.constant 0 : index
    %c0_308 = arith.constant 0 : index
    %278 = vector.load %arg5[%c1_304, %c1_305, %c2_306, %c0_307, %c0_308] : memref<2x3x4x1x8xf32, #tpu.memory_space<vmem>>, vector<1x1x1x1x8xf32>
    %279 = vector.shape_cast %278 : vector<1x1x1x1x8xf32> to vector<1x8xf32>
    %280 = vector.broadcast %279 : vector<1x8xf32> to vector<16x8xf32>
    %281 = arith.addf %277, %280 : vector<16x8xf32>
    %c1_309 = arith.constant 1 : index
    %c1_310 = arith.constant 1 : index
    %c3_311 = arith.constant 3 : index
    %c0_312 = arith.constant 0 : index
    %c0_313 = arith.constant 0 : index
    %282 = vector.load %arg4[%c1_309, %c1_310, %c3_311, %c0_312, %c0_313] : memref<2x3x4x32x8xf32, #tpu.memory_space<vmem>>, vector<1x1x1x32x8xf32>
    %283 = vector.shape_cast %282 : vector<1x1x1x32x8xf32> to vector<32x8xf32>
    %cst_314 = arith.constant dense<0.000000e+00> : vector<16x8xf32>
    %284 = tpu.matmul %210, %283, %cst_314 {dimension_numbers = #tpu.dot_dimension_numbers<[1], [0], [0], [1], [0, 0, 1, 1], [], []>} : vector<16x32xf32>, vector<32x8xf32>, vector<16x8xf32> -> vector<16x8xf32>
    %c1_315 = arith.constant 1 : index
    %c1_316 = arith.constant 1 : index
    %c3_317 = arith.constant 3 : index
    %c0_318 = arith.constant 0 : index
    %c0_319 = arith.constant 0 : index
    %285 = vector.load %arg5[%c1_315, %c1_316, %c3_317, %c0_318, %c0_319] : memref<2x3x4x1x8xf32, #tpu.memory_space<vmem>>, vector<1x1x1x1x8xf32>
    %286 = vector.shape_cast %285 : vector<1x1x1x1x8xf32> to vector<1x8xf32>
    %287 = vector.broadcast %286 : vector<1x8xf32> to vector<16x8xf32>
    %288 = arith.addf %284, %287 : vector<16x8xf32>
    %289 = tpu.concatenate %267, %274, %281, %288 in 0 : vector<16x8xf32>, vector<16x8xf32>, vector<16x8xf32>, vector<16x8xf32> -> vector<64x8xf32>
    %c1_320 = arith.constant 1 : index
    %c2_321 = arith.constant 2 : index
    %c0_322 = arith.constant 0 : index
    %c0_323 = arith.constant 0 : index
    %c0_324 = arith.constant 0 : index
    %290 = vector.load %arg4[%c1_320, %c2_321, %c0_322, %c0_323, %c0_324] : memref<2x3x4x32x8xf32, #tpu.memory_space<vmem>>, vector<1x1x1x32x8xf32>
    %291 = vector.shape_cast %290 : vector<1x1x1x32x8xf32> to vector<32x8xf32>
    %cst_325 = arith.constant dense<0.000000e+00> : vector<16x8xf32>
    %292 = tpu.matmul %210, %291, %cst_325 {dimension_numbers = #tpu.dot_dimension_numbers<[1], [0], [0], [1], [0, 0, 1, 1], [], []>} : vector<16x32xf32>, vector<32x8xf32>, vector<16x8xf32> -> vector<16x8xf32>
    %c1_326 = arith.constant 1 : index
    %c2_327 = arith.constant 2 : index
    %c0_328 = arith.constant 0 : index
    %c0_329 = arith.constant 0 : index
    %c0_330 = arith.constant 0 : index
    %293 = vector.load %arg5[%c1_326, %c2_327, %c0_328, %c0_329, %c0_330] : memref<2x3x4x1x8xf32, #tpu.memory_space<vmem>>, vector<1x1x1x1x8xf32>
    %294 = vector.shape_cast %293 : vector<1x1x1x1x8xf32> to vector<1x8xf32>
    %295 = vector.broadcast %294 : vector<1x8xf32> to vector<16x8xf32>
    %296 = arith.addf %292, %295 : vector<16x8xf32>
    %c1_331 = arith.constant 1 : index
    %c2_332 = arith.constant 2 : index
    %c1_333 = arith.constant 1 : index
    %c0_334 = arith.constant 0 : index
    %c0_335 = arith.constant 0 : index
    %297 = vector.load %arg4[%c1_331, %c2_332, %c1_333, %c0_334, %c0_335] : memref<2x3x4x32x8xf32, #tpu.memory_space<vmem>>, vector<1x1x1x32x8xf32>
    %298 = vector.shape_cast %297 : vector<1x1x1x32x8xf32> to vector<32x8xf32>
    %cst_336 = arith.constant dense<0.000000e+00> : vector<16x8xf32>
    %299 = tpu.matmul %210, %298, %cst_336 {dimension_numbers = #tpu.dot_dimension_numbers<[1], [0], [0], [1], [0, 0, 1, 1], [], []>} : vector<16x32xf32>, vector<32x8xf32>, vector<16x8xf32> -> vector<16x8xf32>
    %c1_337 = arith.constant 1 : index
    %c2_338 = arith.constant 2 : index
    %c1_339 = arith.constant 1 : index
    %c0_340 = arith.constant 0 : index
    %c0_341 = arith.constant 0 : index
    %300 = vector.load %arg5[%c1_337, %c2_338, %c1_339, %c0_340, %c0_341] : memref<2x3x4x1x8xf32, #tpu.memory_space<vmem>>, vector<1x1x1x1x8xf32>
    %301 = vector.shape_cast %300 : vector<1x1x1x1x8xf32> to vector<1x8xf32>
    %302 = vector.broadcast %301 : vector<1x8xf32> to vector<16x8xf32>
    %303 = arith.addf %299, %302 : vector<16x8xf32>
    %c1_342 = arith.constant 1 : index
    %c2_343 = arith.constant 2 : index
    %c2_344 = arith.constant 2 : index
    %c0_345 = arith.constant 0 : index
    %c0_346 = arith.constant 0 : index
    %304 = vector.load %arg4[%c1_342, %c2_343, %c2_344, %c0_345, %c0_346] : memref<2x3x4x32x8xf32, #tpu.memory_space<vmem>>, vector<1x1x1x32x8xf32>
    %305 = vector.shape_cast %304 : vector<1x1x1x32x8xf32> to vector<32x8xf32>
    %cst_347 = arith.constant dense<0.000000e+00> : vector<16x8xf32>
    %306 = tpu.matmul %210, %305, %cst_347 {dimension_numbers = #tpu.dot_dimension_numbers<[1], [0], [0], [1], [0, 0, 1, 1], [], []>} : vector<16x32xf32>, vector<32x8xf32>, vector<16x8xf32> -> vector<16x8xf32>
    %c1_348 = arith.constant 1 : index
    %c2_349 = arith.constant 2 : index
    %c2_350 = arith.constant 2 : index
    %c0_351 = arith.constant 0 : index
    %c0_352 = arith.constant 0 : index
    %307 = vector.load %arg5[%c1_348, %c2_349, %c2_350, %c0_351, %c0_352] : memref<2x3x4x1x8xf32, #tpu.memory_space<vmem>>, vector<1x1x1x1x8xf32>
    %308 = vector.shape_cast %307 : vector<1x1x1x1x8xf32> to vector<1x8xf32>
    %309 = vector.broadcast %308 : vector<1x8xf32> to vector<16x8xf32>
    %310 = arith.addf %306, %309 : vector<16x8xf32>
    %c1_353 = arith.constant 1 : index
    %c2_354 = arith.constant 2 : index
    %c3_355 = arith.constant 3 : index
    %c0_356 = arith.constant 0 : index
    %c0_357 = arith.constant 0 : index
    %311 = vector.load %arg4[%c1_353, %c2_354, %c3_355, %c0_356, %c0_357] : memref<2x3x4x32x8xf32, #tpu.memory_space<vmem>>, vector<1x1x1x32x8xf32>
    %312 = vector.shape_cast %311 : vector<1x1x1x32x8xf32> to vector<32x8xf32>
    %cst_358 = arith.constant dense<0.000000e+00> : vector<16x8xf32>
    %313 = tpu.matmul %210, %312, %cst_358 {dimension_numbers = #tpu.dot_dimension_numbers<[1], [0], [0], [1], [0, 0, 1, 1], [], []>} : vector<16x32xf32>, vector<32x8xf32>, vector<16x8xf32> -> vector<16x8xf32>
    %c1_359 = arith.constant 1 : index
    %c2_360 = arith.constant 2 : index
    %c3_361 = arith.constant 3 : index
    %c0_362 = arith.constant 0 : index
    %c0_363 = arith.constant 0 : index
    %314 = vector.load %arg5[%c1_359, %c2_360, %c3_361, %c0_362, %c0_363] : memref<2x3x4x1x8xf32, #tpu.memory_space<vmem>>, vector<1x1x1x1x8xf32>
    %315 = vector.shape_cast %314 : vector<1x1x1x1x8xf32> to vector<1x8xf32>
    %316 = vector.broadcast %315 : vector<1x8xf32> to vector<16x8xf32>
    %317 = arith.addf %313, %316 : vector<16x8xf32>
    %318 = tpu.concatenate %296, %303, %310, %317 in 0 : vector<16x8xf32>, vector<16x8xf32>, vector<16x8xf32>, vector<16x8xf32> -> vector<64x8xf32>
    %cst_364 = arith.constant dense<0.000000e+00> : vector<64x64xf32>
    %319 = tpu.matmul %260, %289, %cst_364 {dimension_numbers = #tpu.dot_dimension_numbers<[1], [1], [0], [0], [0, 0, 1, 0], [], []>} : vector<64x8xf32>, vector<64x8xf32>, vector<64x64xf32> -> vector<64x64xf32>
    %320 = arith.addf %319, %10 : vector<64x64xf32>
    %cst_365 = arith.constant dense<0xFF800000> : vector<64xf32>
    %321 = vector.multi_reduction <maximumf>, %320, %cst_365 [1] : vector<64x64xf32> to vector<64xf32>
    %322 = vector.shape_cast %321 : vector<64xf32> to vector<64x1xf32>
    %323 = vector.broadcast %322 : vector<64x1xf32> to vector<64x64xf32>
    %324 = arith.subf %320, %323 : vector<64x64xf32>
    %325 = math.exp %324 : vector<64x64xf32>
    %cst_366 = arith.constant dense<0.000000e+00> : vector<64xf32>
    %326 = vector.multi_reduction <add>, %325, %cst_366 [1] : vector<64x64xf32> to vector<64xf32>
    %327 = vector.shape_cast %326 : vector<64xf32> to vector<64x1xf32>
    %328 = tpu.reciprocal %327 {approx = true} : vector<64x1xf32> -> vector<64x1xf32>
    %329 = vector.broadcast %328 : vector<64x1xf32> to vector<64x64xf32>
    %330 = arith.mulf %325, %329 : vector<64x64xf32>
    %cst_367 = arith.constant dense<0.000000e+00> : vector<64x8xf32>
    %331 = tpu.matmul %330, %318, %cst_367 {dimension_numbers = #tpu.dot_dimension_numbers<[1], [0], [0], [1], [0, 0, 1, 1], [], []>} : vector<64x64xf32>, vector<64x8xf32>, vector<64x8xf32> -> vector<64x8xf32>
    %332 = vector.extract_strided_slice %331 {offsets = [0, 0], sizes = [16, 8], strides = [1, 1]} : vector<64x8xf32> to vector<16x8xf32>
    %c1_368 = arith.constant 1 : index
    %c0_369 = arith.constant 0 : index
    %c0_370 = arith.constant 0 : index
    %c0_371 = arith.constant 0 : index
    %333 = vector.load %arg6[%c1_368, %c0_369, %c0_370, %c0_371] : memref<2x4x8x32xf32, #tpu.memory_space<vmem>>, vector<1x1x8x32xf32>
    %334 = vector.shape_cast %333 : vector<1x1x8x32xf32> to vector<8x32xf32>
    %cst_372 = arith.constant dense<0.000000e+00> : vector<16x32xf32>
    %335 = tpu.matmul %332, %334, %cst_372 {dimension_numbers = #tpu.dot_dimension_numbers<[1], [0], [0], [1], [0, 0, 1, 1], [], []>} : vector<16x8xf32>, vector<8x32xf32>, vector<16x32xf32> -> vector<16x32xf32>
    %336 = vector.extract_strided_slice %331 {offsets = [16, 0], sizes = [16, 8], strides = [1, 1]} : vector<64x8xf32> to vector<16x8xf32>
    %c1_373 = arith.constant 1 : index
    %c1_374 = arith.constant 1 : index
    %c0_375 = arith.constant 0 : index
    %c0_376 = arith.constant 0 : index
    %337 = vector.load %arg6[%c1_373, %c1_374, %c0_375, %c0_376] : memref<2x4x8x32xf32, #tpu.memory_space<vmem>>, vector<1x1x8x32xf32>
    %338 = vector.shape_cast %337 : vector<1x1x8x32xf32> to vector<8x32xf32>
    %cst_377 = arith.constant dense<0.000000e+00> : vector<16x32xf32>
    %339 = tpu.matmul %336, %338, %cst_377 {dimension_numbers = #tpu.dot_dimension_numbers<[1], [0], [0], [1], [0, 0, 1, 1], [], []>} : vector<16x8xf32>, vector<8x32xf32>, vector<16x32xf32> -> vector<16x32xf32>
    %340 = vector.extract_strided_slice %331 {offsets = [32, 0], sizes = [16, 8], strides = [1, 1]} : vector<64x8xf32> to vector<16x8xf32>
    %c1_378 = arith.constant 1 : index
    %c2_379 = arith.constant 2 : index
    %c0_380 = arith.constant 0 : index
    %c0_381 = arith.constant 0 : index
    %341 = vector.load %arg6[%c1_378, %c2_379, %c0_380, %c0_381] : memref<2x4x8x32xf32, #tpu.memory_space<vmem>>, vector<1x1x8x32xf32>
    %342 = vector.shape_cast %341 : vector<1x1x8x32xf32> to vector<8x32xf32>
    %cst_382 = arith.constant dense<0.000000e+00> : vector<16x32xf32>
    %343 = tpu.matmul %340, %342, %cst_382 {dimension_numbers = #tpu.dot_dimension_numbers<[1], [0], [0], [1], [0, 0, 1, 1], [], []>} : vector<16x8xf32>, vector<8x32xf32>, vector<16x32xf32> -> vector<16x32xf32>
    %344 = vector.extract_strided_slice %331 {offsets = [48, 0], sizes = [16, 8], strides = [1, 1]} : vector<64x8xf32> to vector<16x8xf32>
    %c1_383 = arith.constant 1 : index
    %c3_384 = arith.constant 3 : index
    %c0_385 = arith.constant 0 : index
    %c0_386 = arith.constant 0 : index
    %345 = vector.load %arg6[%c1_383, %c3_384, %c0_385, %c0_386] : memref<2x4x8x32xf32, #tpu.memory_space<vmem>>, vector<1x1x8x32xf32>
    %346 = vector.shape_cast %345 : vector<1x1x8x32xf32> to vector<8x32xf32>
    %cst_387 = arith.constant dense<0.000000e+00> : vector<16x32xf32>
    %347 = tpu.matmul %344, %346, %cst_387 {dimension_numbers = #tpu.dot_dimension_numbers<[1], [0], [0], [1], [0, 0, 1, 1], [], []>} : vector<16x8xf32>, vector<8x32xf32>, vector<16x32xf32> -> vector<16x32xf32>
    %348 = arith.addf %335, %339 : vector<16x32xf32>
    %349 = arith.addf %343, %347 : vector<16x32xf32>
    %350 = arith.addf %348, %349 : vector<16x32xf32>
    %351 = vector.broadcast %225 : vector<1x32xf32> to vector<16x32xf32>
    %352 = arith.addf %350, %351 : vector<16x32xf32>
    %353 = arith.addf %210, %352 : vector<16x32xf32>
    %cst_388 = arith.constant dense<0.000000e+00> : vector<16xf32>
    %354 = vector.multi_reduction <add>, %353, %cst_388 [1] : vector<16x32xf32> to vector<16xf32>
    %355 = vector.shape_cast %354 : vector<16xf32> to vector<16x1xf32>
    %cst_389 = arith.constant 3.200000e+01 : f32
    %356 = vector.broadcast %cst_389 : f32 to vector<16x1xf32>
    %357 = arith.divf %355, %356 : vector<16x1xf32>
    %358 = vector.broadcast %357 : vector<16x1xf32> to vector<16x32xf32>
    %359 = arith.subf %353, %358 : vector<16x32xf32>
    %360 = arith.mulf %359, %359 : vector<16x32xf32>
    %cst_390 = arith.constant dense<0.000000e+00> : vector<16xf32>
    %361 = vector.multi_reduction <add>, %360, %cst_390 [1] : vector<16x32xf32> to vector<16xf32>
    %362 = vector.shape_cast %361 : vector<16xf32> to vector<16x1xf32>
    %cst_391 = arith.constant 3.200000e+01 : f32
    %363 = vector.broadcast %cst_391 : f32 to vector<16x1xf32>
    %364 = arith.divf %362, %363 : vector<16x1xf32>
    %365 = vector.broadcast %357 : vector<16x1xf32> to vector<16x32xf32>
    %366 = arith.subf %353, %365 : vector<16x32xf32>
    %cst_392 = arith.constant 9.99999974E-6 : f32
    %367 = vector.broadcast %cst_392 : f32 to vector<16x1xf32>
    %368 = arith.addf %364, %367 : vector<16x1xf32>
    %369 = math.rsqrt %368 : vector<16x1xf32>
    %370 = vector.broadcast %369 : vector<16x1xf32> to vector<16x32xf32>
    %371 = arith.mulf %366, %370 : vector<16x32xf32>
    %372 = vector.broadcast %213 : vector<1x32xf32> to vector<16x32xf32>
    %373 = arith.mulf %371, %372 : vector<16x32xf32>
    %374 = vector.broadcast %216 : vector<1x32xf32> to vector<16x32xf32>
    %375 = arith.addf %373, %374 : vector<16x32xf32>
    %c1_393 = arith.constant 1 : index
    %c0_394 = arith.constant 0 : index
    %c0_395 = arith.constant 0 : index
    %376 = vector.load %arg7[%c1_393, %c0_394, %c0_395] : memref<2x32x64xf32, #tpu.memory_space<vmem>>, vector<1x32x64xf32>
    %377 = vector.shape_cast %376 : vector<1x32x64xf32> to vector<32x64xf32>
    %cst_396 = arith.constant dense<0.000000e+00> : vector<16x64xf32>
    %378 = tpu.matmul %375, %377, %cst_396 {dimension_numbers = #tpu.dot_dimension_numbers<[1], [0], [0], [1], [0, 0, 1, 1], [], []>} : vector<16x32xf32>, vector<32x64xf32>, vector<16x64xf32> -> vector<16x64xf32>
    %379 = vector.broadcast %231 : vector<1x64xf32> to vector<16x64xf32>
    %380 = arith.addf %378, %379 : vector<16x64xf32>
    %cst_397 = arith.constant 0.000000e+00 : f32
    %381 = vector.broadcast %cst_397 : f32 to vector<16x64xf32>
    %382 = arith.maximumf %380, %381 : vector<16x64xf32>
    %c1_398 = arith.constant 1 : index
    %c0_399 = arith.constant 0 : index
    %c0_400 = arith.constant 0 : index
    %383 = vector.load %arg8[%c1_398, %c0_399, %c0_400] : memref<2x64x32xf32, #tpu.memory_space<vmem>>, vector<1x64x32xf32>
    %384 = vector.shape_cast %383 : vector<1x64x32xf32> to vector<64x32xf32>
    %cst_401 = arith.constant dense<0.000000e+00> : vector<16x32xf32>
    %385 = tpu.matmul %382, %384, %cst_401 {dimension_numbers = #tpu.dot_dimension_numbers<[1], [0], [0], [1], [0, 0, 1, 1], [], []>} : vector<16x64xf32>, vector<64x32xf32>, vector<16x32xf32> -> vector<16x32xf32>
    %386 = vector.broadcast %228 : vector<1x32xf32> to vector<16x32xf32>
    %387 = arith.addf %385, %386 : vector<16x32xf32>
    %388 = arith.addf %375, %387 : vector<16x32xf32>
    %cst_402 = arith.constant dense<0.000000e+00> : vector<16xf32>
    %389 = vector.multi_reduction <add>, %388, %cst_402 [1] : vector<16x32xf32> to vector<16xf32>
    %390 = vector.shape_cast %389 : vector<16xf32> to vector<16x1xf32>
    %cst_403 = arith.constant 3.200000e+01 : f32
    %391 = vector.broadcast %cst_403 : f32 to vector<16x1xf32>
    %392 = arith.divf %390, %391 : vector<16x1xf32>
    %393 = vector.broadcast %392 : vector<16x1xf32> to vector<16x32xf32>
    %394 = arith.subf %388, %393 : vector<16x32xf32>
    %395 = arith.mulf %394, %394 : vector<16x32xf32>
    %cst_404 = arith.constant dense<0.000000e+00> : vector<16xf32>
    %396 = vector.multi_reduction <add>, %395, %cst_404 [1] : vector<16x32xf32> to vector<16xf32>
    %397 = vector.shape_cast %396 : vector<16xf32> to vector<16x1xf32>
    %cst_405 = arith.constant 3.200000e+01 : f32
    %398 = vector.broadcast %cst_405 : f32 to vector<16x1xf32>
    %399 = arith.divf %397, %398 : vector<16x1xf32>
    %400 = vector.broadcast %392 : vector<16x1xf32> to vector<16x32xf32>
    %401 = arith.subf %388, %400 : vector<16x32xf32>
    %cst_406 = arith.constant 9.99999974E-6 : f32
    %402 = vector.broadcast %cst_406 : f32 to vector<16x1xf32>
    %403 = arith.addf %399, %402 : vector<16x1xf32>
    %404 = math.rsqrt %403 : vector<16x1xf32>
    %405 = vector.broadcast %404 : vector<16x1xf32> to vector<16x32xf32>
    %406 = arith.mulf %401, %405 : vector<16x32xf32>
    %407 = vector.broadcast %219 : vector<1x32xf32> to vector<16x32xf32>
    %408 = arith.mulf %406, %407 : vector<16x32xf32>
    %409 = vector.broadcast %222 : vector<1x32xf32> to vector<16x32xf32>
    %410 = arith.addf %408, %409 : vector<16x32xf32>
    %c0_407 = arith.constant 0 : index
    %c0_408 = arith.constant 0 : index
    %411 = vector.load %arg10[%c0_407, %c0_408] : memref<16x32xf32, #tpu.memory_space<vmem>>, vector<16x32xf32>
    tpu.vector_store %arg10[%c0_407, %c0_408], %410 {strides = array<i32>} : memref<16x32xf32, #tpu.memory_space<vmem>>, vector<16x32xf32>,
    return
  }
}

</mosaic_0001>

<bundles_post_ra>
// kernel: tile.18
= control target key start
LH: loop header
LB: loop body
LE: loop exit
PB: predicated region body
PF: predicated region fallthrough
CT: control target
= control target key end

     0   :  { %s29_s0 = inlined_call_operand.vmem [shape: pred[16], index: 0, kind: input, shape index: {}]   ;;  %s30_s1 = inlined_call_operand.vmem [shape: pred[4,16], index: 1, kind: output, shape index: {}]  }
   0x1   :  { %v4_v0 = vld [vmem:[%s29_s0] ss:$0 sm:$0xff] }
   0x2   :  { %v7_v1 = vand.u32 255, %v4_v0 }
   0x4   :  { %v8_v2 = vpack.c.b16 0, %v7_v1 }
   0x6   :  { %v9_v3 = vpack.c.b8 0, %v8_v2 }
   0x8   :  { %12 = vst [vmem:[%s30_s1] sm:$0x1] %v9_v3 }

// kernel: encoder_forward.1
= control target key start
LH: loop header
LB: loop body
LE: loop exit
PB: predicated region body
PF: predicated region fallthrough
CT: control target
= control target key end

     0   :  { %vm68_vm0 = vcmask 1041408   ;;  %v2526_v2 = vmov 0   ;;  %s3466_s0 = inlined_call_operand.vmem [shape: s32[16,1], index: 0, kind: input, shape index: {}]   ;;  %s3467_s1 = inlined_call_operand.vmem [shape: f32[64,64], index: 1, kind: input, shape index: {}]   ;;  %s3468_s2 = inlined_call_operand.vmem [shape: f32[50,32], index: 2, kind: input, shape index: {}]   ;;  %s3469_s3 = inlined_call_operand.vmem [shape: f32[16,32], index: 3, kind: input, shape index: {}]   ;;  %s3470_s4 = inlined_call_operand.vmem [shape: f32[2,3,4,32,8], index: 4, kind: input, shape index: {}]   ;;  %s3471_s5 = inlined_call_operand.vmem [shape: f32[2,3,4,1,8], index: 5, kind: input, shape index: {}]   ;;  %s3472_s6 = inlined_call_operand.vmem [shape: f32[2,4,8,32], index: 6, kind: input, shape index: {}]   ;;  %s3473_s7 = inlined_call_operand.vmem [shape: f32[2,32,64], index: 7, kind: input, shape index: {}]   ;;  %s3474_s8 = inlined_call_operand.vmem [shape: f32[2,64,32], index: 8, kind: input, shape index: {}]   ;;  %s3475_s9 = inlined_call_operand.vmem [shape: f32[2,7,1,128], index: 9, kind: input, shape index: {}]   ;;  %s3476_s10 = inlined_call_operand.hbm [shape: f32[16,32], index: 10, kind: output, shape index: {}]  }
   0x1   :  { %v36_v0 = vld [vmem:[%s3466_s0] sm:$0xff]  ;;  %v58_v1 = vld [vmem:[%s3468_s2 + $0x30] sm:$0x3]  ;;  %2371 = vset.pattern.permute.xlu0 %v2526_v2  ;;  %v57_v3 = vld [vmem:[%s3468_s2 + $0x28] sm:$0xff] }
   0x2   :  { %2091 = vmatpush.msk.msra.mxu0 %vm68_vm0, %v58_v1  ;;  %41 = vperm.xlu0 %2371, %v36_v0   ;;  %v56_v4 = vld [vmem:[%s3468_s2 + $0x20] sm:$0xff]  ;;  %v55_v5 = vld [vmem:[%s3468_s2 + $0x18] sm:$0xff]  ;;  %v54_v6 = vld [vmem:[%s3468_s2 + $0x10] sm:$0xff] }
   0x3   :  { %v37_v7 = vld [vmem:[%s3466_s0 + $0x8] sm:$0xff] }
   0x4   :  { %82 = vmatpush.msra.mxu0 %v57_v3  ;;  %v53_v8 = vld [vmem:[%s3468_s2 + $0x8] sm:$0xff] }
   0x6   :  { %83 = vmatpush.msra.mxu0 %v56_v4 }
   0x8   :  { %84 = vmatpush.msra.mxu0 %v55_v5 }
   0xa   :  { %85 = vmatpush.msra.mxu0 %v54_v6  ;;  %44 = vperm.xlu0 %2371, %v37_v7  }
   0xc   :  { %86 = vmatpush.msra.mxu0 %v53_v8 }
   0xd   :  { %15 = vsyncpa [#allocation3], 0  ;;  %v52_v9 = vld [vmem:[%s3468_s2] sm:$0xff]  ;;  %v119_v10 = vld [vmem:[%s3470_s4 + $0x18] sm:$0xff]  ;;  %v38_v16 = vlaneseq  ;;  %vm61_vm1 = vcmask 408576   ;;  %v2527_v19 = vmov 0.0  }
   0xe   :  { %87 = vmatpush.msra.mxu0 %v52_v9  ;;  %v2105_v11 = vld [vmem:[%s3470_s4 + $0x38] sm:$0xff]  ;;  %143 = vmatpush.msra.mxu3 %v119_v10  ;;  %v118_v13 = vld [vmem:[%s3470_s4 + $0x10] sm:$0xff]  ;;  %v117_v23 = vld [vmem:[%s3470_s4 + $0x8] sm:$0xff]  ;;  %vm124_vm4 = vcmask 261120   ;;  %vm517_vm5 = vcmask 64512   ;;  %vm607_vm6 = vcmask 523264  }
   0xf   :  { %v2119_v12 = vld [vmem:[%s3470_s4 + $0x78] sm:$0xff]  ;;  %176 = vmatpush.msra.mxu2 %v2105_v11  ;;  %v2104_v14 = vld [vmem:[%s3470_s4 + $0x30] sm:$0xff]  ;;  %v39_v17 = vand.u32 127, %v38_v16  ;;  %v2103_v24 = vld [vmem:[%s3470_s4 + $0x28] sm:$0xff]  ;;  %s2529_s22 = smov [#allocation2]   ;;  %s2077_s25 = sshll.u32 %s3476_s10, 4  ;;  %s2078_s25 = int_to_ptr.hbm [resolvable:$true] %s2077_s25 }
  0x10   :  { %v2118_v15 = vld [vmem:[%s3470_s4 + $0x70] sm:$0xff]  ;;  %242 = vmatpush.msrb.mxu0 %v2119_v12  ;;  %2361 = vmatpush.msra.mxu1 %v2119_v12  ;;  %v2117_v25 = vld [vmem:[%s3470_s4 + $0x68] sm:$0xff]  ;;  %v116_v26 = vld [vmem:[%s3470_s4] sm:$0xff]  ;;  %s2531_s26 = smov 8  }
  0x11   :  { %144 = vmatpush.msra.mxu3 %v118_v13  ;;  %177 = vmatpush.msra.mxu2 %v2104_v14  ;;  %v2102_v27 = vld [vmem:[%s3470_s4 + $0x20] sm:$0xff]  ;;  %v2112_v29 = vld [vmem:[%s3470_s4 + $0x58] sm:$0xff]  ;;  %v2139_v31 = vld [vmem:[%s3470_s4 + $0xd0] sm:$0xff] }
  0x12   :  { %243 = vmatpush.msrb.mxu0 %v2118_v15  ;;  %2362 = vmatpush.msra.mxu1 %v2118_v15  ;;  %v2116_v28 = vld [vmem:[%s3470_s4 + $0x60] sm:$0xff]  ;;  %v2140_v30 = vld [vmem:[%s3470_s4 + $0xd8] sm:$0xff]  ;;  %v2111_v32 = vld [vmem:[%s3470_s4 + $0x50] sm:$0xff] }
  0x13   :  { %145 = vmatpush.msra.mxu3 %v117_v23  ;;  %178 = vmatpush.msra.mxu2 %v2103_v24  ;;  %v2138_v33 = vld [vmem:[%s3470_s4 + $0xc8] sm:$0xff]  ;;  %v2137_v34 = vld [vmem:[%s3470_s4 + $0xc0] sm:$0xff]  ;;  %v2126_v36 = vld [vmem:[%s3470_s4 + $0x98] sm:$0xff] }
  0x14   :  { %244 = vmatpush.msrb.mxu0 %v2117_v25  ;;  %2363 = vmatpush.msra.mxu1 %v2117_v25  ;;  %v2110_v35 = vld [vmem:[%s3470_s4 + $0x48] sm:$0xff]  ;;  %v2147_v37 = vld [vmem:[%s3470_s4 + $0xf8] sm:$0xff]  ;;  %v2125_v38 = vld [vmem:[%s3470_s4 + $0x90] sm:$0xff] }
  0x15   :  { %146 = vmatpush.msra.mxu3 %v116_v26  ;;  %179 = vmatpush.msra.mxu2 %v2102_v27  ;;  %v2146_v39 = vld [vmem:[%s3470_s4 + $0xf0] sm:$0xff]  ;;  %v2109_v40 = vld [vmem:[%s3470_s4 + $0x40] sm:$0xff]  ;;  %v2124_v41 = vld [vmem:[%s3470_s4 + $0x88] sm:$0xff] }
  0x16   :  { %245 = vmatpush.msrb.mxu0 %v2116_v28  ;;  %2364 = vmatpush.msra.mxu1 %v2116_v28  ;;  %v2145_v42 = vld [vmem:[%s3470_s4 + $0xe8] sm:$0xff]  ;;  %v2123_v43 = vld [vmem:[%s3470_s4 + $0x80] sm:$0xff]  ;;  %v2133_v48 = vld [vmem:[%s3470_s4 + $0xb8] sm:$0xff] }
  0x17   :  { %209 = vmatpush.msrb.mxu3 %v2112_v29  ;;  %275 = vmatpush.msrb.mxu2 %v2126_v36  ;;  %v2144_v44 = vld [vmem:[%s3470_s4 + $0xe0] sm:$0xff]  ;;  %v2168_v49 = vld [vmem:[%s3470_s4 + $0x158] sm:$0xff]  ;;  %v2132_v51 = vld [vmem:[%s3470_s4 + $0xb0] sm:$0xff] }
  0x18   :  { %374 = vmatpush.msrb.mxu1 %v2147_v37  ;;  %v59_v45 = vld [vmem:[%s3469_s3] sm:$0xff]  ;;  %v2154_v50 = vld [vmem:[%s3470_s4 + $0x118] sm:$0xff]  ;;  %v2167_v52 = vld [vmem:[%s3470_s4 + $0x150] sm:$0xff] }
  0x19   :  { %210 = vmatpush.msrb.mxu3 %v2111_v32  ;;  %276 = vmatpush.msrb.mxu2 %v2125_v38  ;;  %v2153_v53 = vld [vmem:[%s3470_s4 + $0x110] sm:$0xff]  ;;  %v2131_v54 = vld [vmem:[%s3470_s4 + $0xa8] sm:$0xff]  ;;  %v2130_v58 = vld [vmem:[%s3470_s4 + $0xa0] sm:$0xff] }
  0x1a   :  { %375 = vmatpush.msrb.mxu1 %v2146_v39  ;;  %v60_v55 = vld [vmem:[%s3469_s3 + $0x8] sm:$0xff]  ;;  %v2165_v61 = vld [vmem:[%s3470_s4 + $0x140] sm:$0xff]  ;;  %v2175_v62 = vld [vmem:[%s3470_s4 + $0x178] sm:$0xff]  ;;  %s2075_s3 = sshll.u32 %s2529_s22, 4  ;;  %s2076_s3 = int_to_ptr.vmem [resolvable:$true] %s2075_s3 }
  0x1b   :  { %211 = vmatpush.msrb.mxu3 %v2110_v35  ;;  %277 = vmatpush.msrb.mxu2 %v2124_v41  ;;  %v2166_v56 = vld [vmem:[%s3470_s4 + $0x148] sm:$0xff]  ;;  %v2151_v63 = vld [vmem:[%s3470_s4 + $0x100] sm:$0xff]  ;;  %v2174_v0 = vld [vmem:[%s3470_s4 + $0x170] sm:$0xff] }
  0x1c   :  { %376 = vmatpush.msrb.mxu1 %v2145_v42  ;;  %v2152_v57 = vld [vmem:[%s3470_s4 + $0x108] sm:$0xff]  ;;  %v2172_v2 = vld [vmem:[%s3470_s4 + $0x160] sm:$0xff]  ;;  %v2161_v3 = vld [vmem:[%s3470_s4 + $0x138] sm:$0xff] }
  0x1d   :  { %212 = vmatpush.msrb.mxu3 %v2109_v40  ;;  %278 = vmatpush.msrb.mxu2 %v2123_v43  ;;  %v2173_v1 = vld [vmem:[%s3470_s4 + $0x168] sm:$0xff]  ;;  %v2160_v4 = vld [vmem:[%s3470_s4 + $0x130] sm:$0xff]  ;;  %v2158_v6 = vld [vmem:[%s3470_s4 + $0x120] sm:$0xff] }
  0x1e   :  { %377 = vmatpush.msrb.mxu1 %v2144_v44  ;;  %v2159_v5 = vld [vmem:[%s3470_s4 + $0x128] sm:$0xff]  ;;  %v2381_v36 = vld [vmem:[%s3471_s5 + $0x5] ss:$0 sm:$0xff]  ;;  %v2378_v42 = vld [vmem:[%s3471_s5 + $0x4] ss:$0 sm:$0xff] }
  0x1f   :  { %v2380_v29 = vld [vmem:[%s3471_s5 + $0xb] ss:$0 sm:$0xff] }
  0x74   :  { %v42_v18 = vpop.permute.xlu0 %41 }
  0x75   :  { %vm46_vm2 = vcmp.eq.s32.totalorder %v39_v17, %v42_v18 }
  0x76   :  { %v2089_v20 = vsel %vm46_vm2, 1.0, %v2527_v19 }
  0x77   :  { %2092 = vmatmul.msk.f32.vlgmr.msra.gmra.mxu0 %vm61_vm1, %v2089_v20 }
  0x78   :  { %341 = vmatpush.msra.mxu0 %v2140_v30 }
  0x7a   :  { %342 = vmatpush.msra.mxu0 %v2139_v31 }
  0x7c   :  { %v45_v21 = vpop.permute.xlu0 %44  ;;  %343 = vmatpush.msra.mxu0 %v2138_v33  ;;  %v2379_v33 = vld [vmem:[%s3471_s5 + $0xa] ss:$0 sm:$0xff] }
  0x7d   :  { %vm47_vm3 = vcmp.eq.s32.totalorder %v39_v17, %v45_v21  ;;  %v2376_v17 = vld [vmem:[%s3471_s5 + $0x7] ss:$0 sm:$0xff] }
  0x7e   :  { %v2090_v22 = vsel %vm47_vm3, 1.0, %v2527_v19  ;;  %344 = vmatpush.msra.mxu0 %v2137_v34 }
  0x7f   :  { %2093 = vmatmul.msk.f32.gmra.mxu0 %vm61_vm1, %v2090_v22  ;;  %v2375_v22 = vld [vmem:[%s3471_s5 + $0x6] ss:$0 sm:$0xff] }
  0xf4   :  { %v89_v46 = vpop.f32.mrf.mxu0 }
  0xf5   :  { %v2701_v47 = vadd.f32 %v89_v46, %v59_v45  ;;  %v2373_v46 = vld [vmem:[%s3471_s5] ss:$0 sm:$0xff] }
  0xf7   :  { %2100 = vmatmul.msk.f32.vlgmr.msra.gmra.mxu3 %vm124_vm4, %v2701_v47  ;;  %2107 = vmatmul.msk.f32.vlgmr.msra.gmra.mxu2 %vm124_vm4, %v2701_v47 }
  0xf8   :  { %2121 = vmatmul.msk.f32.vlgmr.msrb.gmra.mxu0 %vm124_vm4, %v2701_v47  ;;  %308 = vmatpush.msra.mxu3 %v2133_v48 }
  0xf9   :  { %473 = vmatpush.msrb.mxu0 %v2168_v49  ;;  %407 = vmatpush.msra.mxu2 %v2154_v50  ;;  %v2383_v49 = vld [vmem:[%s3471_s5 + $0x9] ss:$0 sm:$0xff] }
  0xfa   :  { %309 = vmatpush.msra.mxu3 %v2132_v51 }
  0xfb   :  { %474 = vmatpush.msrb.mxu0 %v2167_v52  ;;  %408 = vmatpush.msra.mxu2 %v2153_v53 }
  0xfc   :  { %v92_v59 = vpop.f32.mrf.mxu0  ;;  %310 = vmatpush.msra.mxu3 %v2131_v54  ;;  %v2382_v54 = vld [vmem:[%s3471_s5 + $0x8] ss:$0 sm:$0xff] }
  0xfd   :  { %v2742_v60 = vadd.f32 %v92_v59, %v60_v55  ;;  %475 = vmatpush.msrb.mxu0 %v2166_v56  ;;  %409 = vmatpush.msra.mxu2 %v2152_v57  ;;  %v2374_v59 = vld [vmem:[%s3471_s5 + $0x1] ss:$0 sm:$0xff] }
  0xfe   :  { %311 = vmatpush.msra.mxu3 %v2130_v58 }
  0xff   :  { %2101 = vmatmul.msk.f32.gmra.mxu3 %vm124_vm4, %v2742_v60  ;;  %2108 = vmatmul.msk.f32.gmra.mxu2 %vm124_vm4, %v2742_v60 }
 0x100   :  { %2122 = vmatmul.msk.f32.vlgmr.msra.gmra.mxu1 %vm124_vm4, %v2742_v60  ;;  %2142 = vmatmul.msk.f32.vlgmr.msra.gmra.mxu0 %vm124_vm4, %v2701_v47 }
 0x101   :  { %476 = vmatpush.msrb.mxu0 %v2165_v61  ;;  %506 = vmatpush.msra.mxu1 %v2175_v62 }
 0x102   :  { %410 = vmatpush.msra.mxu2 %v2151_v63  ;;  %v2377_v63 = vld [vmem:[%s3471_s5 + $0x2] ss:$0 sm:$0xff] }
 0x103   :  { %507 = vmatpush.msra.mxu1 %v2174_v0 }
 0x105   :  { %508 = vmatpush.msra.mxu1 %v2173_v1 }
 0x107   :  { %2114 = vmatmul.msk.f32.vlgmr.msrb.gmra.mxu3 %vm124_vm4, %v2701_v47  ;;  %2128 = vmatmul.msk.f32.vlgmr.msrb.gmra.mxu2 %vm124_vm4, %v2701_v47 }
 0x108   :  { %2143 = vmatmul.msk.f32.gmra.mxu0 %vm124_vm4, %v2742_v60  ;;  %2149 = vmatmul.msk.f32.vlgmr.msrb.gmra.mxu1 %vm124_vm4, %v2701_v47 }
 0x109   :  { %509 = vmatpush.msra.mxu1 %v2172_v2  ;;  %440 = vmatpush.msrb.mxu3 %v2161_v3  ;;  %v2372_v2 = vld [vmem:[%s3471_s5 + $0x3] ss:$0 sm:$0xff] }
 0x10b   :  { %441 = vmatpush.msrb.mxu3 %v2160_v4 }
 0x10d   :  { %442 = vmatpush.msrb.mxu3 %v2159_v5  ;;  %v95_v5 = vld [vmem:[%s3467_s1] sm:$0xff] }
 0x10f   :  { %2115 = vmatmul.msk.f32.gmra.mxu3 %vm124_vm4, %v2742_v60  ;;  %2129 = vmatmul.msk.f32.gmra.mxu2 %vm124_vm4, %v2742_v60 }
 0x110   :  { %2150 = vmatmul.msk.f32.gmra.mxu1 %vm124_vm4, %v2742_v60  ;;  %2170 = vmatmul.msk.f32.vlgmr.msrb.gmra.mxu0 %vm124_vm4, %v2701_v47 }
 0x111   :  { %443 = vmatpush.msrb.mxu3 %v2158_v6 }
 0x117   :  { %2135 = vmatmul.msk.f32.vlgmr.msra.gmra.mxu3 %vm124_vm4, %v2701_v47  ;;  %2156 = vmatmul.msk.f32.vlgmr.msra.gmra.mxu2 %vm124_vm4, %v2701_v47 }
 0x118   :  { %2171 = vmatmul.msk.f32.gmra.mxu0 %vm124_vm4, %v2742_v60  ;;  %2177 = vmatmul.msk.f32.vlgmr.msra.gmra.mxu1 %vm124_vm4, %v2701_v47 }
 0x11f   :  { %2136 = vmatmul.msk.f32.gmra.mxu3 %vm124_vm4, %v2742_v60  ;;  %2157 = vmatmul.msk.f32.gmra.mxu2 %vm124_vm4, %v2742_v60 }
 0x120   :  { %2178 = vmatmul.msk.f32.gmra.mxu1 %vm124_vm4, %v2742_v60 }
 0x127   :  { %2163 = vmatmul.msk.f32.vlgmr.msrb.gmra.mxu3 %vm124_vm4, %v2701_v47 }
 0x12f   :  { %2164 = vmatmul.msk.f32.gmra.mxu3 %vm124_vm4, %v2742_v60 }
 0x175   :  { %v2816_v7 = vpop.f32.mrf.mxu0 }
 0x176   :  { %v248_v3 = vadd.f32 %v2372_v2, %v2816_v7  ;;  %v96_v7 = vld [vmem:[%s3467_s1 + $0x8] sm:$0xff] }
 0x17a   :  { %v148_v8 = vpop.f32.mrf.mxu3  ;;  %v2820_v11 = vpop.f32.mrf.mxu2 }
 0x17b   :  { %v149_v50 = vadd.f32 %v2373_v46, %v148_v8  ;;  %v182_v61 = vadd.f32 %v2374_v59, %v2820_v11 }
 0x17d   :  { %v2818_v9 = vpop.f32.mrf.mxu1  ;;  %v346_v10 = vpop.f32.mrf.mxu0 }
 0x17e   :  { %v347_v27 = vadd.f32 %v2375_v22, %v346_v10  ;;  %v251_v4 = vadd.f32 %v2372_v2, %v2818_v9 }
 0x182   :  { %v151_v12 = vpop.f32.mrf.mxu3  ;;  %v2824_v16 = vpop.f32.mrf.mxu2 }
 0x183   :  { %v152_v58 = vadd.f32 %v2373_v46, %v151_v12  ;;  %v185_v62 = vadd.f32 %v2374_v59, %v2824_v16 }
 0x185   :  { %v379_v13 = vpop.f32.mrf.mxu1  ;;  %v349_v15 = vpop.f32.mrf.mxu0 }
 0x186   :  { %v380_v20 = vadd.f32 %v2376_v17, %v379_v13  ;;  %v350_v25 = vadd.f32 %v2375_v22, %v349_v15  ;;  %v97_v13 = vld [vmem:[%s3467_s1 + $0x10] sm:$0xff] }
 0x18a   :  { %v2822_v14 = vpop.f32.mrf.mxu3  ;;  %v280_v26 = vpop.f32.mrf.mxu2 }
 0x18b   :  { %v281_v48 = vadd.f32 %v2378_v42, %v280_v26  ;;  %v215_v0 = vadd.f32 %v2377_v63, %v2822_v14 }
 0x18d   :  { %v382_v18 = vpop.f32.mrf.mxu1  ;;  %v478_v23 = vpop.f32.mrf.mxu0 }
 0x18e   :  { %v383_v19 = vadd.f32 %v2376_v17, %v382_v18  ;;  %v479_v40 = vadd.f32 %v2379_v33, %v478_v23  ;;  %v98_v17 = vld [vmem:[%s3467_s1 + $0x18] sm:$0xff] }
 0x190   :  { %2179 = vmatpush.xpose.msk.msrb.mxu2 %vm517_vm5, %v383_v19 }
 0x192   :  { %v217_v21 = vpop.f32.mrf.mxu3  ;;  %v283_v34 = vpop.f32.mrf.mxu2 }
 0x193   :  { %v284_v45 = vadd.f32 %v2378_v42, %v283_v34  ;;  %v218_v1 = vadd.f32 %v2377_v63, %v217_v21  ;;  %v99_v21 = vld [vmem:[%s3467_s1 + $0x20] sm:$0xff] }
 0x194   :  { %2180 = vmatpush.xpose.msk.msrb.mxu2 %vm517_vm5, %v380_v20 }
 0x195   :  { %v511_v24 = vpop.f32.mrf.mxu1  ;;  %v481_v32 = vpop.f32.mrf.mxu0 }
 0x196   :  { %v512_v35 = vadd.f32 %v2380_v29, %v511_v24  ;;  %v482_v37 = vadd.f32 %v2379_v33, %v481_v32  ;;  %v102_v33 = vld [vmem:[%s3467_s1 + $0x38] sm:$0xff] }
 0x198   :  { %2181 = vmatpush.xpose.msk.msrb.mxu2 %vm517_vm5, %v350_v25  ;;  %v100_v25 = vld [vmem:[%s3467_s1 + $0x28] sm:$0xff] }
 0x19a   :  { %v313_v28 = vpop.f32.mrf.mxu3  ;;  %v412_v43 = vpop.f32.mrf.mxu2 }
 0x19b   :  { %v314_v41 = vadd.f32 %v2381_v36, %v313_v28  ;;  %v413_v57 = vadd.f32 %v2382_v54, %v412_v43 }
 0x19c   :  { %2182 = vmatpush.xpose.msk.msrb.mxu2 %vm517_vm5, %v347_v27 }
 0x19d   :  { %v514_v30 = vpop.f32.mrf.mxu1 }
 0x19e   :  { %v515_v31 = vadd.f32 %v2380_v29, %v514_v30  ;;  %v101_v29 = vld [vmem:[%s3467_s1 + $0x30] sm:$0xff] }
 0x1a0   :  { %728 = vmatpush.msra.mxu3 %v515_v31 }
 0x1a2   :  { %729 = vmatpush.msra.mxu3 %v512_v35  ;;  %v316_v38 = vpop.f32.mrf.mxu3  ;;  %v415_v53 = vpop.f32.mrf.mxu2 }
 0x1a3   :  { %v317_v39 = vadd.f32 %v2381_v36, %v316_v38  ;;  %v416_v56 = vadd.f32 %v2382_v54, %v415_v53 }
 0x1a4   :  { %730 = vmatpush.msra.mxu3 %v482_v37 }
 0x1a5   :  { %2183 = vmatpush.xpose.msk.msrb.mxu2 %vm517_vm5, %v317_v39 }
 0x1a6   :  { %731 = vmatpush.msra.mxu3 %v479_v40 }
 0x1a9   :  { %2184 = vmatpush.xpose.msk.msrb.mxu2 %vm517_vm5, %v314_v41 }
 0x1aa   :  { %v445_v44 = vpop.f32.mrf.mxu3 }
 0x1ab   :  { %v446_v55 = vadd.f32 %v2383_v49, %v445_v44 }
 0x1ad   :  { %2185 = vmatpush.xpose.msk.msrb.mxu2 %vm517_vm5, %v284_v45 }
 0x1b1   :  { %2186 = vmatpush.xpose.msk.msrb.mxu2 %vm517_vm5, %v281_v48 }
 0x1b2   :  { %v448_v51 = vpop.f32.mrf.mxu3 }
 0x1b3   :  { %v449_v52 = vadd.f32 %v2383_v49, %v448_v51 }
 0x1b4   :  { %2187 = vmatmul.msk.f32.vlgmr.msrb.gmra.mxu2 %vm517_vm5, %v149_v50 }
 0x1b5   :  { %732 = vmatpush.msra.mxu3 %v449_v52 }
 0x1b7   :  { %733 = vmatpush.msra.mxu3 %v446_v55 }
 0x1b9   :  { %734 = vmatpush.msra.mxu3 %v416_v56 }
 0x1bb   :  { %735 = vmatpush.msra.mxu3 %v413_v57 }
 0x1bc   :  { %2188 = vmatmul.msk.f32.gmra.mxu2 %vm517_vm5, %v152_v58 }
 0x1c4   :  { %2189 = vmatmul.msk.f32.gmra.mxu2 %vm517_vm5, %v182_v61 }
 0x1cc   :  { %2190 = vmatmul.msk.f32.gmra.mxu2 %vm517_vm5, %v185_v62 }
 0x1d4   :  { %2191 = vmatmul.msk.f32.gmra.mxu2 %vm517_vm5, %v215_v0 }
 0x1dc   :  { %2192 = vmatmul.msk.f32.gmra.mxu2 %vm517_vm5, %v218_v1 }
 0x1e4   :  { %2193 = vmatmul.msk.f32.gmra.mxu2 %vm517_vm5, %v248_v3 }
 0x1ec   :  { %2194 = vmatmul.msk.f32.gmra.mxu2 %vm517_vm5, %v251_v4 }
 0x237   :  { %v583_v6 = vpop.f32.mrf.mxu2 }
 0x238   :  { %v584_v8 = vadd.f32 %v583_v6, %v95_v5 }
 0x23a   :  { %v608_v10 = vsel %vm607_vm6, %v584_v8, -inf }
 0x23b   :  { %609 = vmax.xlane.f32.xlu1 %v608_v10 }
 0x23f   :  { %v586_v11 = vpop.f32.mrf.mxu2 }
 0x240   :  { %v587_v12 = vadd.f32 %v586_v11, %v96_v7 }
 0x242   :  { %v611_v9 = vsel %vm607_vm6, %v587_v12, -inf }
 0x243   :  { %612 = vmax.xlane.f32.xlu1 %v611_v9 }
 0x247   :  { %v589_v14 = vpop.f32.mrf.mxu2 }
 0x248   :  { %v590_v15 = vadd.f32 %v589_v14, %v97_v13 }
 0x24a   :  { %v614_v16 = vsel %vm607_vm6, %v590_v15, -inf }
 0x24b   :  { %615 = vmax.xlane.f32.xlu2 %v614_v16 }
 0x24f   :  { %v592_v18 = vpop.f32.mrf.mxu2 }
 0x250   :  { %v593_v19 = vadd.f32 %v592_v18, %v98_v17 }
 0x252   :  { %v617_v20 = vsel %vm607_vm6, %v593_v19, -inf }
 0x253   :  { %618 = vmax.xlane.f32.xlu2 %v617_v20 }
 0x257   :  { %v595_v22 = vpop.f32.mrf.mxu2 }
 0x258   :  { %v596_v23 = vadd.f32 %v595_v22, %v99_v21 }
 0x25a   :  { %v620_v24 = vsel %vm607_vm6, %v596_v23, -inf }
 0x25b   :  { %621 = vmax.xlane.f32.xlu0 %v620_v24 }
 0x25f   :  { %v598_v26 = vpop.f32.mrf.mxu2 }
 0x260   :  { %v599_v27 = vadd.f32 %v598_v26, %v100_v25 }
 0x262   :  { %v623_v28 = vsel %vm607_vm6, %v599_v27, -inf }
 0x263   :  { %624 = vmax.xlane.f32.xlu1 %v623_v28 }
 0x267   :  { %v601_v30 = vpop.f32.mrf.mxu2 }
 0x268   :  { %v602_v31 = vadd.f32 %v601_v30, %v101_v29 }
 0x26a   :  { %v626_v32 = vsel %vm607_vm6, %v602_v31, -inf }
 0x26b   :  { %627 = vmax.xlane.f32.xlu2 %v626_v32 }
 0x26f   :  { %v604_v34 = vpop.f32.mrf.mxu2 }
 0x270   :  { %v605_v35 = vadd.f32 %v604_v34, %v102_v33 }
 0x272   :  { %v629_v36 = vsel %vm607_vm6, %v605_v35, -inf }
 0x273   :  { %630 = vmax.xlane.f32.xlu2 %v629_v36 }
 0x2ae   :  { %v610_v37 = vpop.xlane.xlu1 %609 }
 0x2af   :  { %v632_v38 = vsub.f32 %v584_v8, %v610_v37 }
 0x2b1   :  { %v640_v39 = vmul.f32 1.442695, %v632_v38 }
 0x2b3   :  { %2410 = vpow2.f32 %v640_v39  ;;  %v2203_v39 = vld [vmem:[%s3472_s6 + $0x8] sm:$0xff] }
 0x2b4   :  { %785 = vmatpush.msra.mxu0 %v2203_v39 }
 0x2b6   :  { %v613_v40 = vpop.xlane.xlu1 %612 }
 0x2b7   :  { %v633_v41 = vsub.f32 %v587_v12, %v613_v40 }
 0x2b9   :  { %v2411_v42 = vpop.eup %2410  ;;  %v642_v43 = vmul.f32 1.442695, %v633_v41  ;;  %v761_v41 = vld [vmem:[%s3472_s6] sm:$0xff] }
 0x2ba   :  { %v656_v44 = vsel %vm607_vm6, %v2411_v42, 0.0  ;;  %847 = vmatpush.msrb.mxu0 %v761_v41 }
 0x2bb   :  { %2412 = vpow2.f32 %v642_v43  ;;  %657 = vadd.xlane.f32.xlu1 %v656_v44 }
 0x2be   :  { %v616_v45 = vpop.xlane.xlu2 %615 }
 0x2bf   :  { %v634_v46 = vsub.f32 %v590_v15, %v616_v45  ;;  %v2206_v45 = vld [vmem:[%s3472_s6 + $0x10] sm:$0xff] }
 0x2c1   :  { %v2413_v48 = vpop.eup %2412  ;;  %v644_v49 = vmul.f32 1.442695, %v634_v46 }
 0x2c2   :  { %v659_v50 = vsel %vm607_vm6, %v2413_v48, 0.0 }
 0x2c3   :  { %2414 = vpow2.f32 %v644_v49  ;;  %660 = vadd.xlane.f32.xlu1 %v659_v50 }
 0x2c6   :  { %v619_v51 = vpop.xlane.xlu2 %618 }
 0x2c7   :  { %v635_v52 = vsub.f32 %v593_v19, %v619_v51 }
 0x2c9   :  { %v2415_v53 = vpop.eup %2414  ;;  %v646_v54 = vmul.f32 1.442695, %v635_v52 }
 0x2ca   :  { %v662_v55 = vsel %vm607_vm6, %v2415_v53, 0.0 }
 0x2cb   :  { %2416 = vpow2.f32 %v646_v54  ;;  %663 = vadd.xlane.f32.xlu2 %v662_v55 }
 0x2ce   :  { %v622_v56 = vpop.xlane.xlu0 %621 }
 0x2cf   :  { %v636_v57 = vsub.f32 %v596_v23, %v622_v56 }
 0x2d1   :  { %v2417_v58 = vpop.eup %2416  ;;  %v648_v59 = vmul.f32 1.442695, %v636_v57 }
 0x2d2   :  { %v665_v61 = vsel %vm607_vm6, %v2417_v58, 0.0 }
 0x2d3   :  { %2418 = vpow2.f32 %v648_v59  ;;  %666 = vadd.xlane.f32.xlu1 %v665_v61  ;;  %v2384_v61 = vld [vmem:[%s3475_s9 + $0x4] ss:$0 sm:$0xff] }
 0x2d6   :  { %v625_v62 = vpop.xlane.xlu1 %624 }
 0x2d7   :  { %v637_v63 = vsub.f32 %v599_v27, %v625_v62 }
 0x2d9   :  { %v2419_v0 = vpop.eup %2418  ;;  %v650_v1 = vmul.f32 1.442695, %v637_v63 }
 0x2da   :  { %v668_v2 = vsel %vm607_vm6, %v2419_v0, 0.0 }
 0x2db   :  { %2420 = vpow2.f32 %v650_v1  ;;  %669 = vadd.xlane.f32.xlu2 %v668_v2 }
 0x2de   :  { %v628_v3 = vpop.xlane.xlu2 %627 }
 0x2df   :  { %v638_v4 = vsub.f32 %v602_v31, %v628_v3 }
 0x2e1   :  { %v2421_v5 = vpop.eup %2420  ;;  %v652_v6 = vmul.f32 1.442695, %v638_v4 }
 0x2e2   :  { %v671_v8 = vsel %vm607_vm6, %v2421_v5, 0.0 }
 0x2e3   :  { %2422 = vpow2.f32 %v652_v6  ;;  %672 = vadd.xlane.f32.xlu1 %v671_v8 }
 0x2e6   :  { %v631_v10 = vpop.xlane.xlu2 %630 }
 0x2e7   :  { %v639_v7 = vsub.f32 %v605_v35, %v631_v10 }
 0x2e9   :  { %v2423_v11 = vpop.eup %2422  ;;  %v654_v12 = vmul.f32 1.442695, %v639_v7 }
 0x2ea   :  { %v674_v9 = vsel %vm607_vm6, %v2423_v11, 0.0 }
 0x2eb   :  { %2424 = vpow2.f32 %v654_v12  ;;  %675 = vadd.xlane.f32.xlu2 %v674_v9 }
 0x2f1   :  { %v2425_v13 = vpop.eup %2424 }
 0x2f2   :  { %v677_v14 = vsel %vm607_vm6, %v2425_v13, 0.0 }
 0x2f3   :  { %678 = vadd.xlane.f32.xlu1 %v677_v14 }
 0x32e   :  { %v658_v15 = vpop.xlane.xlu1 %657 }
 0x32f   :  { %2426 = vrcp.f32 %v658_v15 }
 0x335   :  { %v2427_v16 = vpop.eup %2426 }
 0x336   :  { %v688_v17 = vmul.f32 %v2427_v16, %v2411_v42  ;;  %v661_v18 = vpop.xlane.xlu1 %660  ;;  %v2207_v42 = vld [vmem:[%s3472_s6 + $0x18] sm:$0xff] }
 0x337   :  { %2428 = vrcp.f32 %v661_v18  ;;  %818 = vmatpush.msrb.mxu1 %v2207_v42  ;;  %v994_v42 = vld [vmem:[%s3474_s8 + $0x10] sm:$0xff] }
 0x338   :  { %2195 = vmatmul.msk.f32.vlgmr.msra.gmra.mxu3 %vm607_vm6, %v688_v17 }
 0x339   :  { %876 = vmatpush.msra.mxu1 %v2206_v45 }
 0x33d   :  { %v2429_v19 = vpop.eup %2428 }
 0x33e   :  { %v664_v20 = vpop.xlane.xlu2 %663  ;;  %v689_v21 = vmul.f32 %v2429_v19, %v2413_v48 }
 0x33f   :  { %2430 = vrcp.f32 %v664_v20 }
 0x340   :  { %2196 = vmatmul.msk.f32.gmra.mxu3 %vm607_vm6, %v689_v21 }
 0x345   :  { %v2431_v22 = vpop.eup %2430 }
 0x346   :  { %v667_v23 = vpop.xlane.xlu1 %666  ;;  %v690_v24 = vmul.f32 %v2431_v22, %v2415_v53 }
 0x347   :  { %2432 = vrcp.f32 %v667_v23 }
 0x348   :  { %2197 = vmatmul.msk.f32.gmra.mxu3 %vm607_vm6, %v690_v24 }
 0x34d   :  { %v2433_v25 = vpop.eup %2432 }
 0x34e   :  { %v670_v26 = vpop.xlane.xlu2 %669  ;;  %v691_v27 = vmul.f32 %v2433_v25, %v2417_v58  ;;  %v957_v25 = vld [vmem:[%s3473_s7 + $0x18] sm:$0xff] }
 0x34f   :  { %2434 = vrcp.f32 %v670_v26  ;;  %v956_v26 = vld [vmem:[%s3473_s7 + $0x10] sm:$0xff] }
 0x350   :  { %2198 = vmatmul.msk.f32.gmra.mxu3 %vm607_vm6, %v691_v27  ;;  %v955_v27 = vld [vmem:[%s3473_s7 + $0x8] sm:$0xff] }
 0x355   :  { %v2435_v28 = vpop.eup %2434 }
 0x356   :  { %v673_v29 = vpop.xlane.xlu1 %672  ;;  %v692_v30 = vmul.f32 %v2435_v28, %v2419_v0  ;;  %v954_v28 = vld [vmem:[%s3473_s7] sm:$0xff] }
 0x357   :  { %2436 = vrcp.f32 %v673_v29 }
 0x358   :  { %2199 = vmatmul.msk.f32.gmra.mxu3 %vm607_vm6, %v692_v30 }
 0x35d   :  { %v2437_v31 = vpop.eup %2436 }
 0x35e   :  { %v676_v32 = vpop.xlane.xlu2 %675  ;;  %v693_v33 = vmul.f32 %v2437_v31, %v2421_v5 }
 0x35f   :  { %2438 = vrcp.f32 %v676_v32  ;;  %v999_v32 = vld [vmem:[%s3474_s8 + $0x38] sm:$0xff] }
 0x360   :  { %2200 = vmatmul.msk.f32.gmra.mxu3 %vm607_vm6, %v693_v33  ;;  %v998_v33 = vld [vmem:[%s3474_s8 + $0x30] sm:$0xff] }
 0x365   :  { %v2439_v34 = vpop.eup %2438 }
 0x366   :  { %v679_v35 = vpop.xlane.xlu1 %678  ;;  %v694_v36 = vmul.f32 %v2439_v34, %v2423_v11  ;;  %v2528_v11 = vmov 32.0   ;;  %v997_v34 = vld [vmem:[%s3474_s8 + $0x28] sm:$0xff] }
 0x367   :  { %2440 = vrcp.f32 %v679_v35 }
 0x368   :  { %2201 = vmatmul.msk.f32.gmra.mxu3 %vm607_vm6, %v694_v36  ;;  %2442 = vrcp.f32 %v2528_v11  ;;  %v2388_v11 = vld [vmem:[%s3475_s9 + $0x5] ss:$0 sm:$0xff] }
 0x36d   :  { %v2441_v37 = vpop.eup %2440 }
 0x36e   :  { %v695_v38 = vmul.f32 %v2441_v37, %v2425_v13  ;;  %v2443_v12 = vpop.eup %2442  ;;  %v996_v37 = vld [vmem:[%s3474_s8 + $0x20] sm:$0xff] }
 0x36f   :  { %v900_v9 = vmul.f32 32.0, %v2443_v12  ;;  %vm904_vm7 = vweird.f32 %v2443_v12 }
 0x370   :  { %2202 = vmatmul.msk.f32.gmra.mxu3 %vm607_vm6, %v695_v38 }
 0x371   :  { %v901_v13 = vsub.f32 1.0, %v900_v9 }
 0x373   :  { %v902_v14 = vmul.f32 %v2443_v12, %v901_v13 }
 0x3bb   :  { %v737_v40 = vpop.f32.mrf.mxu3 }
 0x3c3   :  { %v740_v43 = vpop.f32.mrf.mxu3 }
 0x3cb   :  { %v743_v44 = vpop.f32.mrf.mxu3 }
 0x3cc   :  { %2204 = vmatmul.msk.f32.vlgmr.msra.gmra.mxu0 %vm517_vm5, %v743_v44 }
 0x3cd   :  { %979 = vmatpush.msra.mxu0 %v957_v25 }
 0x3cf   :  { %980 = vmatpush.msra.mxu0 %v956_v26 }
 0x3d1   :  { %981 = vmatpush.msra.mxu0 %v955_v27 }
 0x3d3   :  { %v746_v46 = vpop.f32.mrf.mxu3  ;;  %982 = vmatpush.msra.mxu0 %v954_v28 }
 0x3d4   :  { %2205 = vmatmul.msk.f32.gmra.mxu0 %vm517_vm5, %v746_v46 }
 0x3db   :  { %v749_v48 = vpop.f32.mrf.mxu3 }
 0x3dc   :  { %2210 = vmatmul.msk.f32.vlgmr.msrb.gmra.mxu0 %vm517_vm5, %v737_v40  ;;  %v995_v40 = vld [vmem:[%s3474_s8 + $0x18] sm:$0xff] }
 0x3e3   :  { %v752_v49 = vpop.f32.mrf.mxu3 }
 0x3e4   :  { %2211 = vmatmul.msk.f32.gmra.mxu0 %vm517_vm5, %v740_v43 }
 0x3eb   :  { %v755_v50 = vpop.f32.mrf.mxu3 }
 0x3ec   :  { %2208 = vmatmul.msk.f32.vlgmr.msrb.gmra.mxu1 %vm517_vm5, %v755_v50  ;;  %v2385_v50 = vld [vmem:[%s3475_s9] ss:$0 sm:$0xff] }
 0x3ed   :  { %1017 = vmatpush.msrb.mxu1 %v999_v32  ;;  %v2235_v32 = vld [vmem:[%s3470_s4 + $0x1b8] sm:$0xff] }
 0x3ef   :  { %1018 = vmatpush.msrb.mxu1 %v998_v33  ;;  %v2227_v33 = vld [vmem:[%s3470_s4 + $0x190] sm:$0xff] }
 0x3f1   :  { %1019 = vmatpush.msrb.mxu1 %v997_v34  ;;  %v2262_v34 = vld [vmem:[%s3470_s4 + $0x230] sm:$0xff] }
 0x3f3   :  { %v758_v51 = vpop.f32.mrf.mxu3  ;;  %1020 = vmatpush.msrb.mxu1 %v996_v37  ;;  %v2226_v37 = vld [vmem:[%s3470_s4 + $0x188] sm:$0xff] }
 0x3f4   :  { %2209 = vmatmul.msk.f32.gmra.mxu1 %vm517_vm5, %v758_v51 }
 0x3f5   :  { %1021 = vmatpush.msrb.mxu1 %v995_v40  ;;  %v2225_v40 = vld [vmem:[%s3470_s4 + $0x180] sm:$0xff] }
 0x3f7   :  { %1022 = vmatpush.msrb.mxu1 %v994_v42  ;;  %v2239_v42 = vld [vmem:[%s3470_s4 + $0x1c0] sm:$0xff] }
 0x3fc   :  { %2212 = vmatmul.msk.f32.vlgmr.msra.gmra.mxu1 %vm517_vm5, %v749_v48 }
 0x404   :  { %2213 = vmatmul.msk.f32.gmra.mxu1 %vm517_vm5, %v752_v49 }
 0x449   :  { %v787_v52 = vpop.f32.mrf.mxu0 }
 0x451   :  { %v790_v54 = vpop.f32.mrf.mxu0 }
 0x459   :  { %v849_v56 = vpop.f32.mrf.mxu0 }
 0x45a   :  { %v850_v58 = vadd.f32 %v849_v56, %v787_v52 }
 0x461   :  { %v852_v0 = vpop.f32.mrf.mxu0 }
 0x462   :  { %v853_v3 = vadd.f32 %v852_v0, %v790_v54  ;;  %v2386_v54 = vld [vmem:[%s3475_s9 + $0x1] ss:$0 sm:$0xff] }
 0x469   :  { %v820_v53 = vpop.f32.mrf.mxu1 }
 0x471   :  { %v823_v55 = vpop.f32.mrf.mxu1 }
 0x479   :  { %v878_v57 = vpop.f32.mrf.mxu1 }
 0x47a   :  { %v879_v59 = vadd.f32 %v878_v57, %v820_v53 }
 0x47c   :  { %v884_v62 = vadd.f32 %v879_v59, %v850_v58 }
 0x47e   :  { %v889_v63 = vadd.f32 %v2384_v61, %v884_v62 }
 0x480   :  { %v891_v1 = vadd.f32 %v889_v63, %v2701_v47  ;;  %v903_v47 = vadd.f32 %v2443_v12, %v902_v14 }
 0x481   :  { %v881_v2 = vpop.f32.mrf.mxu1 }
 0x482   :  { %v882_v4 = vadd.f32 %v881_v2, %v823_v55  ;;  %v893_v5 = vsel %vm124_vm4, %v891_v1, 0.0  ;;  %v2958_v15 = vsel %vm904_vm7, %v2443_v12, %v903_v47  ;;  %v992_v2 = vld [vmem:[%s3474_s8] sm:$0xff] }
 0x483   :  { %894 = vadd.xlane.f32.xlu2 %v893_v5 }
 0x484   :  { %v885_v6 = vadd.f32 %v882_v4, %v853_v3  ;;  %v2387_v3 = vld [vmem:[%s3475_s9 + $0x6] ss:$0 sm:$0xff] }
 0x486   :  { %v890_v8 = vadd.f32 %v2384_v61, %v885_v6 }
 0x488   :  { %v892_v10 = vadd.f32 %v890_v8, %v2742_v60 }
 0x48a   :  { %v896_v7 = vsel %vm124_vm4, %v892_v10, 0.0 }
 0x48b   :  { %897 = vadd.xlane.f32.xlu0 %v896_v7 }
 0x4f6   :  { %v895_v16 = vpop.xlane.xlu2 %894 }
 0x4f7   :  { %v906_v17 = vmul.f32 %v2958_v15, %v895_v16 }
 0x4f9   :  { %v908_v18 = vsub.f32 %v891_v1, %v906_v17  ;;  %v993_v1 = vld [vmem:[%s3474_s8 + $0x8] sm:$0xff] }
 0x4fa   :  { %1023 = vmatpush.msrb.mxu1 %v993_v1  ;;  %v2267_v1 = vld [vmem:[%s3470_s4 + $0x240] sm:$0xff] }
 0x4fb   :  { %v910_v19 = vmul.f32 %v908_v18, %v908_v18 }
 0x4fc   :  { %1024 = vmatpush.msrb.mxu1 %v992_v2 }
 0x4fd   :  { %v912_v60 = vsel %vm124_vm4, %v910_v19, 0.0  ;;  %v2242_v19 = vld [vmem:[%s3470_s4 + $0x1d8] sm:$0xff] }
 0x4fe   :  { %v898_v20 = vpop.xlane.xlu0 %897  ;;  %913 = vadd.xlane.f32.xlu1 %v912_v60  ;;  %v2241_v60 = vld [vmem:[%s3470_s4 + $0x1d0] sm:$0xff]  ;;  %1196 = vmatpush.msrb.mxu3 %v2242_v19 }
 0x4ff   :  { %v907_v21 = vmul.f32 %v2958_v15, %v898_v20  ;;  %1163 = vmatpush.msra.mxu1 %v2235_v32 }
 0x500   :  { %1197 = vmatpush.msrb.mxu3 %v2241_v60 }
 0x501   :  { %v909_v22 = vsub.f32 %v892_v10, %v907_v21 }
 0x503   :  { %v911_v23 = vmul.f32 %v909_v22, %v909_v22 }
 0x505   :  { %v915_v24 = vsel %vm124_vm4, %v911_v23, 0.0 }
 0x506   :  { %916 = vadd.xlane.f32.xlu2 %v915_v24 }
 0x571   :  { %v914_v29 = vpop.xlane.xlu1 %913 }
 0x572   :  { %v918_v30 = vmul.f32 %v914_v29, %v2958_v15 }
 0x574   :  { %v920_v31 = vadd.f32 1e-05, %v918_v30  ;;  %v2263_v30 = vld [vmem:[%s3470_s4 + $0x238] sm:$0xff] }
 0x575   :  { %1295 = vmatpush.msra.mxu2 %v2263_v30  ;;  %v2275_v30 = vld [vmem:[%s3470_s4 + $0x268] sm:$0xff] }
 0x576   :  { %2444 = vrsqrt.f32 %v920_v31  ;;  %vm928_vm9 = vweird.f32 %v920_v31 }
 0x577   :  { %1296 = vmatpush.msra.mxu2 %v2262_v34  ;;  %v2274_v34 = vld [vmem:[%s3470_s4 + $0x260] sm:$0xff] }
 0x579   :  { %v917_v35 = vpop.xlane.xlu2 %916 }
 0x57a   :  { %v919_v36 = vmul.f32 %v917_v35, %v2958_v15  ;;  %v2234_v35 = vld [vmem:[%s3470_s4 + $0x1b0] sm:$0xff] }
 0x57b   :  { %1164 = vmatpush.msra.mxu1 %v2234_v35  ;;  %v2281_v35 = vld [vmem:[%s3470_s4 + $0x280] sm:$0xff] }
 0x57c   :  { %v2445_v38 = vpop.eup %2444  ;;  %v921_v39 = vadd.f32 1e-05, %v919_v36  ;;  %v2240_v36 = vld [vmem:[%s3470_s4 + $0x1c8] sm:$0xff] }
 0x57d   :  { %v923_v41 = vmul.f32 %v2445_v38, %v920_v31  ;;  %vm929_vm8 = vweird.f32 %v2445_v38  ;;  %v2228_v31 = vld [vmem:[%s3470_s4 + $0x198] sm:$0xff]  ;;  %1198 = vmatpush.msrb.mxu3 %v2240_v36  ;;  %v2295_v36 = vld [vmem:[%s3470_s4 + $0x2c0] sm:$0xff] }
 0x57e   :  { %2446 = vrsqrt.f32 %v921_v39  ;;  %vm930_vm10 = vmor %vm928_vm9, %vm929_vm8  ;;  %vm938_vm12 = vweird.f32 %v921_v39  ;;  %1130 = vmatpush.msrb.mxu0 %v2228_v31  ;;  %v2282_v31 = vld [vmem:[%s3470_s4 + $0x288] sm:$0xff] }
 0x57f   :  { %v924_v43 = vmul.f32 %v2445_v38, %v923_v41  ;;  %v2232_v41 = vld [vmem:[%s3470_s4 + $0x1a0] sm:$0xff]  ;;  %1199 = vmatpush.msrb.mxu3 %v2239_v42 }
 0x580   :  { %1131 = vmatpush.msrb.mxu0 %v2227_v33 }
 0x581   :  { %v925_v44 = vmul.f32 0.5, %v924_v43  ;;  %v2260_v43 = vld [vmem:[%s3470_s4 + $0x220] sm:$0xff] }
 0x582   :  { %1132 = vmatpush.msrb.mxu0 %v2226_v37  ;;  %v2305_v37 = vld [vmem:[%s3470_s4 + $0x2f8] sm:$0xff] }
 0x583   :  { %v926_v45 = vsub.f32 1.5, %v925_v44 }
 0x584   :  { %v2447_v46 = vpop.eup %2446  ;;  %1133 = vmatpush.msrb.mxu0 %v2225_v40  ;;  %v2302_v40 = vld [vmem:[%s3470_s4 + $0x2e0] sm:$0xff] }
 0x585   :  { %v927_v48 = vmul.f32 %v2445_v38, %v926_v45  ;;  %v933_v49 = vmul.f32 %v2447_v46, %v921_v39  ;;  %vm939_vm11 = vweird.f32 %v2447_v46  ;;  %v2261_v39 = vld [vmem:[%s3470_s4 + $0x228] sm:$0xff] }
 0x586   :  { %vm940_vm13 = vmor %vm938_vm12, %vm939_vm11  ;;  %1297 = vmatpush.msra.mxu2 %v2261_v39  ;;  %v2303_v39 = vld [vmem:[%s3470_s4 + $0x2e8] sm:$0xff] }
 0x587   :  { %v931_v51 = vsel %vm930_vm10, %v2445_v38, %v927_v48  ;;  %v934_v52 = vmul.f32 %v2447_v46, %v933_v49  ;;  %v2233_v38 = vld [vmem:[%s3470_s4 + $0x1a8] sm:$0xff]  ;;  %v2249_v48 = vld [vmem:[%s3470_s4 + $0x1f8] sm:$0xff]  ;;  %v2248_v49 = vld [vmem:[%s3470_s4 + $0x1f0] sm:$0xff] }
 0x588   :  { %v942_v53 = vmul.f32 %v931_v51, %v908_v18  ;;  %1165 = vmatpush.msra.mxu1 %v2233_v38  ;;  %1298 = vmatpush.msra.mxu2 %v2260_v43  ;;  %v2256_v51 = vld [vmem:[%s3470_s4 + $0x218] sm:$0xff]  ;;  %v2304_v38 = vld [vmem:[%s3470_s4 + $0x2f0] sm:$0xff] }
 0x589   :  { %v935_v55 = vmul.f32 0.5, %v934_v52  ;;  %v2270_v52 = vld [vmem:[%s3470_s4 + $0x258] sm:$0xff] }
 0x58a   :  { %v947_v56 = vmul.f32 %v2385_v50, %v942_v53  ;;  %1166 = vmatpush.msra.mxu1 %v2232_v41  ;;  %1328 = vmatpush.msra.mxu3 %v2270_v52  ;;  %v2291_v53 = vld [vmem:[%s3470_s4 + $0x2b8] sm:$0xff] }
 0x58b   :  { %v936_v57 = vsub.f32 1.5, %v935_v55  ;;  %v2269_v55 = vld [vmem:[%s3470_s4 + $0x250] sm:$0xff]  ;;  %1427 = vmatpush.msrb.mxu2 %v2291_v53 }
 0x58c   :  { %v952_v58 = vadd.f32 %v2386_v54, %v947_v56  ;;  %1329 = vmatpush.msra.mxu3 %v2269_v55  ;;  %v2399_v55 = vld [vmem:[%s3471_s5 + $0x13] ss:$0 sm:$0xff] }
 0x58d   :  { %v937_v59 = vmul.f32 %v2447_v46, %v936_v57  ;;  %v2290_v57 = vld [vmem:[%s3470_s4 + $0x2b0] sm:$0xff] }
 0x58e   :  { %2214 = vmatmul.msk.f32.vlgmr.msra.gmra.mxu0 %vm124_vm4, %v952_v58  ;;  %1428 = vmatpush.msrb.mxu2 %v2290_v57 }
 0x58f   :  { %v941_v61 = vsel %vm940_vm13, %v2447_v46, %v937_v59  ;;  %1229 = vmatpush.msra.mxu0 %v2249_v48  ;;  %v2254_v59 = vld [vmem:[%s3470_s4 + $0x208] sm:$0xff] }
 0x590   :  { %v943_v62 = vmul.f32 %v941_v61, %v909_v22 }
 0x591   :  { %1230 = vmatpush.msra.mxu0 %v2248_v49 }
 0x592   :  { %v948_v63 = vmul.f32 %v2385_v50, %v943_v62  ;;  %v2247_v50 = vld [vmem:[%s3470_s4 + $0x1e8] sm:$0xff] }
 0x593   :  { %1231 = vmatpush.msra.mxu0 %v2247_v50  ;;  %v2268_v62 = vld [vmem:[%s3470_s4 + $0x248] sm:$0xff] }
 0x594   :  { %v953_v0 = vadd.f32 %v2386_v54, %v948_v63  ;;  %v2255_v54 = vld [vmem:[%s3470_s4 + $0x210] sm:$0xff]  ;;  %v2289_v63 = vld [vmem:[%s3470_s4 + $0x2a8] sm:$0xff]  ;;  %1330 = vmatpush.msra.mxu3 %v2268_v62 }
 0x595   :  { %1429 = vmatpush.msrb.mxu2 %v2289_v63  ;;  %v2397_v62 = vld [vmem:[%s3471_s5 + $0x12] ss:$0 sm:$0xff] }
 0x596   :  { %2215 = vmatmul.msk.f32.gmra.mxu0 %vm124_vm4, %v953_v0  ;;  %1331 = vmatpush.msra.mxu3 %v2267_v1 }
 0x60b   :  { %v984_v4 = vpop.f32.mrf.mxu0 }
 0x60c   :  { %v985_v5 = vadd.f32 %v2387_v3, %v984_v4  ;;  %v2288_v4 = vld [vmem:[%s3470_s4 + $0x2a0] sm:$0xff] }
 0x60d   :  { %1430 = vmatpush.msrb.mxu2 %v2288_v4  ;;  %v2394_v4 = vld [vmem:[%s3471_s5 + $0x11] ss:$0 sm:$0xff] }
 0x60e   :  { %v990_v6 = vmax.f32 %v985_v5, 0.0 }
 0x610   :  { %2216 = vmatmul.msk.f32.vlgmr.msrb.gmra.mxu1 %vm607_vm6, %v990_v6 }
 0x611   :  { %1262 = vmatpush.msrb.mxu1 %v2256_v51 }
 0x613   :  { %v987_v8 = vpop.f32.mrf.mxu0  ;;  %1263 = vmatpush.msrb.mxu1 %v2255_v54 }
 0x614   :  { %v988_v10 = vadd.f32 %v2387_v3, %v987_v8 }
 0x615   :  { %1264 = vmatpush.msrb.mxu1 %v2254_v59 }
 0x616   :  { %v991_v7 = vmax.f32 %v988_v10, 0.0 }
 0x618   :  { %2217 = vmatmul.msk.f32.gmra.mxu1 %vm607_vm6, %v991_v7 }
 0x68d   :  { %v1026_v12 = vpop.f32.mrf.mxu1 }
 0x68e   :  { %v1027_v9 = vadd.f32 %v2388_v11, %v1026_v12 }
 0x690   :  { %v1032_v13 = vadd.f32 %v1027_v9, %v952_v58  ;;  %v2246_v58 = vld [vmem:[%s3470_s4 + $0x1e0] sm:$0xff] }
 0x691   :  { %1232 = vmatpush.msra.mxu0 %v2246_v58  ;;  %v2389_v9 = vld [vmem:[%s3475_s9 + $0x2] ss:$0 sm:$0xff] }
 0x692   :  { %v1034_v14 = vsel %vm124_vm4, %v1032_v13, 0.0 }
 0x693   :  { %1035 = vadd.xlane.f32.xlu0 %v1034_v14 }
 0x695   :  { %v1029_v47 = vpop.f32.mrf.mxu1 }
 0x696   :  { %v1030_v16 = vadd.f32 %v2388_v11, %v1029_v47  ;;  %v2390_v47 = vld [vmem:[%s3475_s9 + $0x3] ss:$0 sm:$0xff] }
 0x698   :  { %v1033_v17 = vadd.f32 %v1030_v16, %v953_v0  ;;  %v2253_v0 = vld [vmem:[%s3470_s4 + $0x200] sm:$0xff] }
 0x699   :  { %1265 = vmatpush.msrb.mxu1 %v2253_v0 }
 0x69a   :  { %v1037_v18 = vsel %vm124_vm4, %v1033_v17, 0.0 }
 0x69b   :  { %1038 = vadd.xlane.f32.xlu1 %v1037_v18 }
 0x706   :  { %v1036_v20 = vpop.xlane.xlu0 %1035 }
 0x707   :  { %v1040_v21 = vmul.f32 %v1036_v20, %v2958_v15 }
 0x709   :  { %v3027_v22 = vsub.f32 %v1032_v13, %v1040_v21  ;;  %v2277_v21 = vld [vmem:[%s3470_s4 + $0x278] sm:$0xff] }
 0x70b   :  { %v1044_v23 = vmul.f32 %v3027_v22, %v3027_v22 }
 0x70d   :  { %v1046_v24 = vsel %vm124_vm4, %v1044_v23, 0.0  ;;  %v2284_v23 = vld [vmem:[%s3470_s4 + $0x298] sm:$0xff] }
 0x70e   :  { %1047 = vadd.xlane.f32.xlu2 %v1046_v24  ;;  %v1039_v25 = vpop.xlane.xlu1 %1038 }
 0x70f   :  { %v1041_v26 = vmul.f32 %v1039_v25, %v2958_v15  ;;  %v2276_v25 = vld [vmem:[%s3470_s4 + $0x270] sm:$0xff] }
 0x711   :  { %v3033_v27 = vsub.f32 %v1033_v17, %v1041_v26  ;;  %v2283_v26 = vld [vmem:[%s3470_s4 + $0x290] sm:$0xff] }
 0x713   :  { %v1045_v28 = vmul.f32 %v3033_v27, %v3033_v27 }
 0x715   :  { %v1049_v29 = vsel %vm124_vm4, %v1045_v28, 0.0 }
 0x716   :  { %1050 = vadd.xlane.f32.xlu0 %v1049_v29  ;;  %v2297_v29 = vld [vmem:[%s3470_s4 + $0x2d0] sm:$0xff] }
 0x781   :  { %v1048_v44 = vpop.xlane.xlu2 %1047 }
 0x782   :  { %v1052_v45 = vmul.f32 %v1048_v44, %v2958_v15 }
 0x784   :  { %v1054_v46 = vadd.f32 1e-05, %v1052_v45 }
 0x786   :  { %2448 = vrsqrt.f32 %v1054_v46  ;;  %vm1062_vm15 = vweird.f32 %v1054_v46 }
 0x789   :  { %v1051_v56 = vpop.xlane.xlu0 %1050 }
 0x78a   :  { %v1053_v61 = vmul.f32 %v1051_v56, %v2958_v15 }
 0x78c   :  { %v2449_v2 = vpop.eup %2448  ;;  %v1055_v3 = vadd.f32 1e-05, %v1053_v61 }
 0x78d   :  { %v1057_v5 = vmul.f32 %v2449_v2, %v1054_v46  ;;  %vm1063_vm14 = vweird.f32 %v2449_v2 }
 0x78e   :  { %2450 = vrsqrt.f32 %v1055_v3  ;;  %vm1064_vm0 = vmor %vm1062_vm15, %vm1063_vm14  ;;  %vm1072_vm2 = vweird.f32 %v1055_v3 }
 0x78f   :  { %v1058_v6 = vmul.f32 %v2449_v2, %v1057_v5  ;;  %v2402_v5 = vld [vmem:[%s3471_s5 + $0x17] ss:$0 sm:$0xff] }
 0x791   :  { %v1059_v8 = vmul.f32 0.5, %v1058_v6 }
 0x793   :  { %v1060_v10 = vsub.f32 1.5, %v1059_v8 }
 0x794   :  { %v2451_v7 = vpop.eup %2450 }
 0x795   :  { %v1061_v11 = vmul.f32 %v2449_v2, %v1060_v10  ;;  %v1067_v12 = vmul.f32 %v2451_v7, %v1055_v3  ;;  %vm1073_vm1 = vweird.f32 %v2451_v7 }
 0x796   :  { %vm1074_vm3 = vmor %vm1072_vm2, %vm1073_vm1 }
 0x797   :  { %v1065_v13 = vsel %vm1064_vm0, %v2449_v2, %v1061_v11  ;;  %v1068_v14 = vmul.f32 %v2451_v7, %v1067_v12  ;;  %v2401_v12 = vld [vmem:[%s3471_s5 + $0x16] ss:$0 sm:$0xff] }
 0x798   :  { %v1076_v16 = vmul.f32 %v1065_v13, %v3027_v22  ;;  %v2298_v22 = vld [vmem:[%s3470_s4 + $0x2d8] sm:$0xff] }
 0x799   :  { %v1069_v17 = vmul.f32 0.5, %v1068_v14 }
 0x79a   :  { %v1081_v18 = vmul.f32 %v2389_v9, %v1076_v16  ;;  %v2396_v16 = vld [vmem:[%s3471_s5 + $0x10] ss:$0 sm:$0xff] }
 0x79b   :  { %v1070_v19 = vsub.f32 1.5, %v1069_v17  ;;  %v2398_v17 = vld [vmem:[%s3471_s5 + $0x15] ss:$0 sm:$0xff] }
 0x79c   :  { %v3137_v60 = vadd.f32 %v2390_v47, %v1081_v18 }
 0x79d   :  { %v1071_v20 = vmul.f32 %v2451_v7, %v1070_v19 }
 0x79e   :  { %2230 = vmatmul.msk.f32.vlgmr.msrb.gmra.mxu0 %vm124_vm4, %v3137_v60  ;;  %2237 = vmatmul.msk.f32.vlgmr.msra.gmra.mxu1 %vm124_vm4, %v3137_v60 }
 0x79f   :  { %v1075_v24 = vsel %vm1074_vm3, %v2451_v7, %v1071_v20  ;;  %2244 = vmatmul.msk.f32.vlgmr.msrb.gmra.mxu3 %vm124_vm4, %v3137_v60  ;;  %2265 = vmatmul.msk.f32.vlgmr.msra.gmra.mxu2 %vm124_vm4, %v3137_v60 }
 0x7a0   :  { %v1077_v28 = vmul.f32 %v1075_v24, %v3033_v27  ;;  %1361 = vmatpush.msrb.mxu0 %v2277_v21  ;;  %1394 = vmatpush.msra.mxu1 %v2284_v23  ;;  %v2296_v27 = vld [vmem:[%s3470_s4 + $0x2c8] sm:$0xff] }
 0x7a1   :  { %1460 = vmatpush.msrb.mxu3 %v2298_v22  ;;  %v2400_v22 = vld [vmem:[%s3471_s5 + $0x14] ss:$0 sm:$0xff]  ;;  %v2391_v24 = vld [vmem:[%s3471_s5 + $0xc] ss:$0 sm:$0xff] }
 0x7a2   :  { %v1082_v32 = vmul.f32 %v2389_v9, %v1077_v28  ;;  %1362 = vmatpush.msrb.mxu0 %v2276_v25  ;;  %1395 = vmatpush.msra.mxu1 %v2283_v26 }
 0x7a3   :  { %1461 = vmatpush.msrb.mxu3 %v2297_v29 }
 0x7a4   :  { %v3175_v33 = vadd.f32 %v2390_v47, %v1082_v32  ;;  %1363 = vmatpush.msrb.mxu0 %v2275_v30  ;;  %1396 = vmatpush.msra.mxu1 %v2282_v31  ;;  %v2392_v31 = vld [vmem:[%s3471_s5 + $0xd] ss:$0 sm:$0xff] }
 0x7a5   :  { %1462 = vmatpush.msrb.mxu3 %v2296_v27 }
 0x7a6   :  { %2231 = vmatmul.msk.f32.gmra.mxu0 %vm124_vm4, %v3175_v33  ;;  %2238 = vmatmul.msk.f32.gmra.mxu1 %vm124_vm4, %v3175_v33 }
 0x7a7   :  { %2245 = vmatmul.msk.f32.gmra.mxu3 %vm124_vm4, %v3175_v33  ;;  %2266 = vmatmul.msk.f32.gmra.mxu2 %vm124_vm4, %v3175_v33 }
 0x7a8   :  { %1364 = vmatpush.msrb.mxu0 %v2274_v34  ;;  %1397 = vmatpush.msra.mxu1 %v2281_v35  ;;  %v2393_v34 = vld [vmem:[%s3471_s5 + $0xe] ss:$0 sm:$0xff] }
 0x7a9   :  { %1463 = vmatpush.msrb.mxu3 %v2295_v36 }
 0x7ae   :  { %2251 = vmatmul.msk.f32.vlgmr.msra.gmra.mxu0 %vm124_vm4, %v3137_v60  ;;  %2258 = vmatmul.msk.f32.vlgmr.msrb.gmra.mxu1 %vm124_vm4, %v3137_v60 }
 0x7af   :  { %2272 = vmatmul.msk.f32.vlgmr.msra.gmra.mxu3 %vm124_vm4, %v3137_v60  ;;  %2293 = vmatmul.msk.f32.vlgmr.msrb.gmra.mxu2 %vm124_vm4, %v3137_v60 }
 0x7b0   :  { %1493 = vmatpush.msra.mxu0 %v2305_v37  ;;  %v2395_v37 = vld [vmem:[%s3471_s5 + $0xf] ss:$0 sm:$0xff] }
 0x7b2   :  { %1494 = vmatpush.msra.mxu0 %v2304_v38 }
 0x7b4   :  { %1495 = vmatpush.msra.mxu0 %v2303_v39 }
 0x7b6   :  { %2252 = vmatmul.msk.f32.gmra.mxu0 %vm124_vm4, %v3175_v33  ;;  %2259 = vmatmul.msk.f32.gmra.mxu1 %vm124_vm4, %v3175_v33 }
 0x7b7   :  { %2273 = vmatmul.msk.f32.gmra.mxu3 %vm124_vm4, %v3175_v33  ;;  %2294 = vmatmul.msk.f32.gmra.mxu2 %vm124_vm4, %v3175_v33 }
 0x7b8   :  { %1496 = vmatpush.msra.mxu0 %v2302_v40 }
 0x7be   :  { %2279 = vmatmul.msk.f32.vlgmr.msrb.gmra.mxu0 %vm124_vm4, %v3137_v60  ;;  %2286 = vmatmul.msk.f32.vlgmr.msra.gmra.mxu1 %vm124_vm4, %v3137_v60 }
 0x7bf   :  { %2300 = vmatmul.msk.f32.vlgmr.msrb.gmra.mxu3 %vm124_vm4, %v3137_v60 }
 0x7c6   :  { %2280 = vmatmul.msk.f32.gmra.mxu0 %vm124_vm4, %v3175_v33  ;;  %2287 = vmatmul.msk.f32.gmra.mxu1 %vm124_vm4, %v3175_v33 }
 0x7c7   :  { %2301 = vmatmul.msk.f32.gmra.mxu3 %vm124_vm4, %v3175_v33 }
 0x7ce   :  { %2307 = vmatmul.msk.f32.vlgmr.msra.gmra.mxu0 %vm124_vm4, %v3137_v60 }
 0x7d6   :  { %2308 = vmatmul.msk.f32.gmra.mxu0 %vm124_vm4, %v3175_v33 }
 0x81b   :  { %v3238_v41 = vpop.f32.mrf.mxu0  ;;  %v3244_v44 = vpop.f32.mrf.mxu1 }
 0x81c   :  { %v1136_v29 = vadd.f32 %v2391_v24, %v3238_v41  ;;  %v1169_v32 = vadd.f32 %v2392_v31, %v3244_v44  ;;  %v2492_v41 = vld [vmem:[%s3467_s1] sm:$0xff] }
 0x822   :  { %v3240_v42 = vpop.f32.mrf.mxu3  ;;  %v1300_v51 = vpop.f32.mrf.mxu2 }
 0x823   :  { %v3242_v43 = vpop.f32.mrf.mxu0  ;;  %v3252_v49 = vpop.f32.mrf.mxu1  ;;  %v1301_v13 = vadd.f32 %v2394_v4, %v1300_v51  ;;  %v1202_v35 = vadd.f32 %v2393_v34, %v3240_v42 }
 0x824   :  { %v1139_v30 = vadd.f32 %v2391_v24, %v3242_v43  ;;  %v1172_v27 = vadd.f32 %v2392_v31, %v3252_v49 }
 0x82a   :  { %v3248_v46 = vpop.f32.mrf.mxu3  ;;  %v1303_v58 = vpop.f32.mrf.mxu2 }
 0x82b   :  { %v3246_v45 = vpop.f32.mrf.mxu0  ;;  %v1267_v53 = vpop.f32.mrf.mxu1  ;;  %v1304_v10 = vadd.f32 %v2394_v4, %v1303_v58  ;;  %v1205_v36 = vadd.f32 %v2393_v34, %v3248_v46  ;;  %v2496_v58 = vld [vmem:[%s3467_s1 + $0x20] sm:$0xff] }
 0x82c   :  { %v1268_v25 = vadd.f32 %v2396_v16, %v1267_v53  ;;  %v1235_v38 = vadd.f32 %v2395_v37, %v3246_v45  ;;  %v2493_v45 = vld [vmem:[%s3467_s1 + $0x8] sm:$0xff] }
 0x832   :  { %v1333_v50 = vpop.f32.mrf.mxu3  ;;  %v1432_v2 = vpop.f32.mrf.mxu2 }
 0x833   :  { %v3250_v48 = vpop.f32.mrf.mxu0  ;;  %v1270_v61 = vpop.f32.mrf.mxu1  ;;  %v1334_v3 = vadd.f32 %v2397_v62, %v1333_v50  ;;  %v1433_v23 = vadd.f32 %v2398_v17, %v1432_v2  ;;  %v2494_v50 = vld [vmem:[%s3467_s1 + $0x10] sm:$0xff] }
 0x834   :  { %v1271_v19 = vadd.f32 %v2396_v16, %v1270_v61  ;;  %v1238_v39 = vadd.f32 %v2395_v37, %v3250_v48 }
 0x83a   :  { %v1336_v54 = vpop.f32.mrf.mxu3  ;;  %v1435_v47 = vpop.f32.mrf.mxu2 }
 0x83b   :  { %v1366_v52 = vpop.f32.mrf.mxu0  ;;  %v1337_v1 = vadd.f32 %v2397_v62, %v1336_v54  ;;  %v1399_v6 = vpop.f32.mrf.mxu1  ;;  %v1436_v20 = vadd.f32 %v2398_v17, %v1435_v47  ;;  %v2495_v54 = vld [vmem:[%s3467_s1 + $0x18] sm:$0xff] }
 0x83c   :  { %v1367_v59 = vadd.f32 %v2399_v55, %v1366_v52  ;;  %v1400_v28 = vadd.f32 %v2400_v22, %v1399_v6 }
 0x842   :  { %v1465_v63 = vpop.f32.mrf.mxu3 }
 0x843   :  { %v1369_v56 = vpop.f32.mrf.mxu0  ;;  %v1466_v18 = vadd.f32 %v2401_v12, %v1465_v63  ;;  %v1402_v21 = vpop.f32.mrf.mxu1  ;;  %v2497_v63 = vld [vmem:[%s3467_s1 + $0x28] sm:$0xff] }
 0x844   :  { %v1370_v57 = vadd.f32 %v2399_v55, %v1369_v56  ;;  %v1403_v26 = vadd.f32 %v2400_v22, %v1402_v21 }
 0x846   :  { %2309 = vmatpush.xpose.msk.msrb.mxu1 %vm517_vm5, %v1370_v57 }
 0x84a   :  { %2310 = vmatpush.xpose.msk.msrb.mxu1 %vm517_vm5, %v1367_v59  ;;  %v1468_v11 = vpop.f32.mrf.mxu3 }
 0x84b   :  { %v1498_v0 = vpop.f32.mrf.mxu0  ;;  %v1469_v14 = vadd.f32 %v2401_v12, %v1468_v11 }
 0x84c   :  { %v1499_v9 = vadd.f32 %v2402_v5, %v1498_v0 }
 0x84e   :  { %2311 = vmatpush.xpose.msk.msrb.mxu1 %vm517_vm5, %v1337_v1 }
 0x852   :  { %2312 = vmatpush.xpose.msk.msrb.mxu1 %vm517_vm5, %v1334_v3  ;;  %v2498_v3 = vld [vmem:[%s3467_s1 + $0x30] sm:$0xff] }
 0x853   :  { %v1501_v8 = vpop.f32.mrf.mxu0 }
 0x854   :  { %v1502_v7 = vadd.f32 %v2402_v5, %v1501_v8  ;;  %v2499_v8 = vld [vmem:[%s3467_s1 + $0x38] sm:$0xff] }
 0x856   :  { %2313 = vmatpush.xpose.msk.msrb.mxu1 %vm517_vm5, %v1304_v10  ;;  %1713 = vmatpush.msra.mxu2 %v1502_v7 }
 0x858   :  { %1714 = vmatpush.msra.mxu2 %v1499_v9 }
 0x85a   :  { %2314 = vmatpush.xpose.msk.msrb.mxu1 %vm517_vm5, %v1301_v13  ;;  %1715 = vmatpush.msra.mxu2 %v1469_v14 }
 0x85c   :  { %1716 = vmatpush.msra.mxu2 %v1466_v18 }
 0x85e   :  { %2315 = vmatpush.xpose.msk.msrb.mxu1 %vm517_vm5, %v1271_v19  ;;  %1717 = vmatpush.msra.mxu2 %v1436_v20 }
 0x860   :  { %1718 = vmatpush.msra.mxu2 %v1433_v23 }
 0x862   :  { %2316 = vmatpush.xpose.msk.msrb.mxu1 %vm517_vm5, %v1268_v25  ;;  %1719 = vmatpush.msra.mxu2 %v1403_v26 }
 0x864   :  { %1720 = vmatpush.msra.mxu2 %v1400_v28 }
 0x865   :  { %2317 = vmatmul.msk.f32.vlgmr.msrb.gmra.mxu1 %vm517_vm5, %v1136_v29 }
 0x86d   :  { %2318 = vmatmul.msk.f32.gmra.mxu1 %vm517_vm5, %v1139_v30 }
 0x875   :  { %2319 = vmatmul.msk.f32.gmra.mxu1 %vm517_vm5, %v1169_v32 }
 0x87d   :  { %2320 = vmatmul.msk.f32.gmra.mxu1 %vm517_vm5, %v1172_v27 }
 0x885   :  { %2321 = vmatmul.msk.f32.gmra.mxu1 %vm517_vm5, %v1202_v35 }
 0x88d   :  { %2322 = vmatmul.msk.f32.gmra.mxu1 %vm517_vm5, %v1205_v36 }
 0x895   :  { %2323 = vmatmul.msk.f32.gmra.mxu1 %vm517_vm5, %v1235_v38 }
 0x89d   :  { %2324 = vmatmul.msk.f32.gmra.mxu1 %vm517_vm5, %v1238_v39 }
 0x8e2   :  { %v1569_v40 = vpop.f32.mrf.mxu1 }
 0x8e3   :  { %v1570_v42 = vadd.f32 %v2492_v41, %v1569_v40 }
 0x8e5   :  { %v1593_v43 = vsel %vm607_vm6, %v1570_v42, -inf }
 0x8e6   :  { %1594 = vmax.xlane.f32.xlu1 %v1593_v43 }
 0x8ea   :  { %v1572_v44 = vpop.f32.mrf.mxu1 }
 0x8eb   :  { %v1573_v46 = vadd.f32 %v2493_v45, %v1572_v44 }
 0x8ed   :  { %v1596_v49 = vsel %vm607_vm6, %v1573_v46, -inf }
 0x8ee   :  { %1597 = vmax.xlane.f32.xlu2 %v1596_v49 }
 0x8f2   :  { %v1575_v48 = vpop.f32.mrf.mxu1 }
 0x8f3   :  { %v1576_v51 = vadd.f32 %v2494_v50, %v1575_v48 }
 0x8f5   :  { %v1599_v52 = vsel %vm607_vm6, %v1576_v51, -inf }
 0x8f6   :  { %1600 = vmax.xlane.f32.xlu0 %v1599_v52 }
 0x8fa   :  { %v1578_v53 = vpop.f32.mrf.mxu1 }
 0x8fb   :  { %v1579_v55 = vadd.f32 %v2495_v54, %v1578_v53 }
 0x8fd   :  { %v1602_v56 = vsel %vm607_vm6, %v1579_v55, -inf }
 0x8fe   :  { %1603 = vmax.xlane.f32.xlu1 %v1602_v56 }
 0x902   :  { %v1581_v57 = vpop.f32.mrf.mxu1 }
 0x903   :  { %v1582_v59 = vadd.f32 %v2496_v58, %v1581_v57 }
 0x905   :  { %v1605_v61 = vsel %vm607_vm6, %v1582_v59, -inf }
 0x906   :  { %1606 = vmax.xlane.f32.xlu2 %v1605_v61 }
 0x90a   :  { %v1584_v62 = vpop.f32.mrf.mxu1 }
 0x90b   :  { %v1585_v0 = vadd.f32 %v2497_v63, %v1584_v62 }
 0x90d   :  { %v1608_v1 = vsel %vm607_vm6, %v1585_v0, -inf }
 0x90e   :  { %1609 = vmax.xlane.f32.xlu0 %v1608_v1 }
 0x912   :  { %v1587_v2 = vpop.f32.mrf.mxu1 }
 0x913   :  { %v1588_v4 = vadd.f32 %v2498_v3, %v1587_v2 }
 0x915   :  { %v1611_v5 = vsel %vm607_vm6, %v1588_v4, -inf }
 0x916   :  { %1612 = vmax.xlane.f32.xlu1 %v1611_v5 }
 0x91a   :  { %v1590_v6 = vpop.f32.mrf.mxu1 }
 0x91b   :  { %v1591_v10 = vadd.f32 %v2499_v8, %v1590_v6 }
 0x91d   :  { %v1614_v7 = vsel %vm607_vm6, %v1591_v10, -inf }
 0x91e   :  { %1615 = vmax.xlane.f32.xlu0 %v1614_v7 }
 0x959   :  { %v1595_v11 = vpop.xlane.xlu1 %1594 }
 0x95a   :  { %v1617_v12 = vsub.f32 %v1570_v42, %v1595_v11 }
 0x95c   :  { %v1625_v9 = vmul.f32 1.442695, %v1617_v12 }
 0x95e   :  { %2452 = vpow2.f32 %v1625_v9 }
 0x961   :  { %v1598_v13 = vpop.xlane.xlu2 %1597 }
 0x962   :  { %v1618_v14 = vsub.f32 %v1573_v46, %v1598_v13  ;;  %v2334_v13 = vld [vmem:[%s3472_s6 + $0x28] sm:$0xff] }
 0x963   :  { %1771 = vmatpush.msra.mxu3 %v2334_v13 }
 0x964   :  { %v2453_v47 = vpop.eup %2452  ;;  %v1627_v16 = vmul.f32 1.442695, %v1618_v14 }
 0x965   :  { %v1641_v17 = vsel %vm607_vm6, %v2453_v47, 0.0 }
 0x966   :  { %2454 = vpow2.f32 %v1627_v16  ;;  %1642 = vadd.xlane.f32.xlu2 %v1641_v17  ;;  %v2338_v16 = vld [vmem:[%s3472_s6 + $0x38] sm:$0xff] }
 0x967   :  { %1804 = vmatpush.msrb.mxu0 %v2338_v16 }
 0x969   :  { %v1601_v18 = vpop.xlane.xlu0 %1600 }
 0x96a   :  { %v1619_v19 = vsub.f32 %v1576_v51, %v1601_v18 }
 0x96c   :  { %v2455_v20 = vpop.eup %2454  ;;  %v1629_v21 = vmul.f32 1.442695, %v1619_v19  ;;  %v2337_v19 = vld [vmem:[%s3472_s6 + $0x30] sm:$0xff] }
 0x96d   :  { %v1644_v23 = vsel %vm607_vm6, %v2455_v20, 0.0  ;;  %1862 = vmatpush.msra.mxu0 %v2337_v19 }
 0x96e   :  { %2456 = vpow2.f32 %v1629_v21  ;;  %1645 = vadd.xlane.f32.xlu1 %v1644_v23 }
 0x971   :  { %v1604_v22 = vpop.xlane.xlu1 %1603 }
 0x972   :  { %v1620_v24 = vsub.f32 %v1579_v55, %v1604_v22 }
 0x974   :  { %v2457_v25 = vpop.eup %2456  ;;  %v1631_v26 = vmul.f32 1.442695, %v1620_v24 }
 0x975   :  { %v1647_v28 = vsel %vm607_vm6, %v2457_v25, 0.0 }
 0x976   :  { %2458 = vpow2.f32 %v1631_v26  ;;  %1648 = vadd.xlane.f32.xlu2 %v1647_v28 }
 0x979   :  { %v1607_v29 = vpop.xlane.xlu2 %1606 }
 0x97a   :  { %v1621_v30 = vsub.f32 %v1582_v59, %v1607_v29 }
 0x97c   :  { %v2459_v31 = vpop.eup %2458  ;;  %v1633_v32 = vmul.f32 1.442695, %v1621_v30 }
 0x97d   :  { %v1650_v27 = vsel %vm607_vm6, %v2459_v31, 0.0 }
 0x97e   :  { %2460 = vpow2.f32 %v1633_v32  ;;  %1651 = vadd.xlane.f32.xlu0 %v1650_v27 }
 0x981   :  { %v1610_v34 = vpop.xlane.xlu0 %1609 }
 0x982   :  { %v1622_v35 = vsub.f32 %v1585_v0, %v1610_v34  ;;  %v2403_v34 = vld [vmem:[%s3475_s9 + $0xb] ss:$0 sm:$0xff] }
 0x984   :  { %v2461_v36 = vpop.eup %2460  ;;  %v1635_v37 = vmul.f32 1.442695, %v1622_v35 }
 0x985   :  { %v1653_v38 = vsel %vm607_vm6, %v2461_v36, 0.0 }
 0x986   :  { %2462 = vpow2.f32 %v1635_v37  ;;  %1654 = vadd.xlane.f32.xlu1 %v1653_v38 }
 0x989   :  { %v1613_v39 = vpop.xlane.xlu1 %1612 }
 0x98a   :  { %v1623_v40 = vsub.f32 %v1588_v4, %v1613_v39 }
 0x98c   :  { %v2463_v41 = vpop.eup %2462  ;;  %v1637_v42 = vmul.f32 1.442695, %v1623_v40 }
 0x98d   :  { %v1656_v43 = vsel %vm607_vm6, %v2463_v41, 0.0 }
 0x98e   :  { %2464 = vpow2.f32 %v1637_v42  ;;  %1657 = vadd.xlane.f32.xlu2 %v1656_v43 }
 0x991   :  { %v1616_v44 = vpop.xlane.xlu0 %1615 }
 0x992   :  { %v1624_v45 = vsub.f32 %v1591_v10, %v1616_v44 }
 0x994   :  { %v2465_v46 = vpop.eup %2464  ;;  %v1639_v49 = vmul.f32 1.442695, %v1624_v45 }
 0x995   :  { %v1659_v48 = vsel %vm607_vm6, %v2465_v46, 0.0 }
 0x996   :  { %2466 = vpow2.f32 %v1639_v49  ;;  %1660 = vadd.xlane.f32.xlu0 %v1659_v48 }
 0x99c   :  { %v2467_v50 = vpop.eup %2466 }
 0x99d   :  { %v1662_v51 = vsel %vm607_vm6, %v2467_v50, 0.0 }
 0x99e   :  { %1663 = vadd.xlane.f32.xlu1 %v1662_v51 }
 0x9d9   :  { %v1643_v52 = vpop.xlane.xlu2 %1642 }
 0x9da   :  { %2468 = vrcp.f32 %v1643_v52 }
 0x9e0   :  { %v2469_v53 = vpop.eup %2468 }
 0x9e1   :  { %v1673_v54 = vmul.f32 %v2469_v53, %v2453_v47  ;;  %v1646_v55 = vpop.xlane.xlu1 %1645  ;;  %v2333_v47 = vld [vmem:[%s3472_s6 + $0x20] sm:$0xff] }
 0x9e2   :  { %2470 = vrcp.f32 %v1646_v55  ;;  %1833 = vmatpush.msrb.mxu3 %v2333_v47 }
 0x9e3   :  { %2325 = vmatmul.msk.f32.vlgmr.msra.gmra.mxu2 %vm607_vm6, %v1673_v54 }
 0x9e8   :  { %v2471_v56 = vpop.eup %2470 }
 0x9e9   :  { %v1649_v57 = vpop.xlane.xlu2 %1648  ;;  %v1674_v58 = vmul.f32 %v2471_v56, %v2455_v20 }
 0x9ea   :  { %2472 = vrcp.f32 %v1649_v57  ;;  %v2347_v57 = vld [vmem:[%s3473_s7 + $0x30] sm:$0xff] }
 0x9eb   :  { %2326 = vmatmul.msk.f32.gmra.mxu2 %vm607_vm6, %v1674_v58  ;;  %v2346_v58 = vld [vmem:[%s3473_s7 + $0x28] sm:$0xff] }
 0x9f0   :  { %v2473_v59 = vpop.eup %2472 }
 0x9f1   :  { %v1652_v61 = vpop.xlane.xlu0 %1651  ;;  %v1675_v62 = vmul.f32 %v2473_v59, %v2457_v25  ;;  %v2345_v59 = vld [vmem:[%s3473_s7 + $0x20] sm:$0xff] }
 0x9f2   :  { %2474 = vrcp.f32 %v1652_v61 }
 0x9f3   :  { %2327 = vmatmul.msk.f32.gmra.mxu2 %vm607_vm6, %v1675_v62 }
 0x9f8   :  { %v2475_v63 = vpop.eup %2474 }
 0x9f9   :  { %v1655_v0 = vpop.xlane.xlu1 %1654  ;;  %v1676_v1 = vmul.f32 %v2475_v63, %v2459_v31 }
 0x9fa   :  { %2476 = vrcp.f32 %v1655_v0  ;;  %v2358_v0 = vld [vmem:[%s3474_s8 + $0x78] sm:$0xff] }
 0x9fb   :  { %2328 = vmatmul.msk.f32.gmra.mxu2 %vm607_vm6, %v1676_v1  ;;  %v2357_v1 = vld [vmem:[%s3474_s8 + $0x70] sm:$0xff] }
 0xa00   :  { %v2477_v2 = vpop.eup %2476 }
 0xa01   :  { %v1658_v3 = vpop.xlane.xlu2 %1657  ;;  %v1677_v4 = vmul.f32 %v2477_v2, %v2461_v36  ;;  %v2356_v2 = vld [vmem:[%s3474_s8 + $0x68] sm:$0xff] }
 0xa02   :  { %2478 = vrcp.f32 %v1658_v3 }
 0xa03   :  { %2329 = vmatmul.msk.f32.gmra.mxu2 %vm607_vm6, %v1677_v4 }
 0xa08   :  { %v2479_v5 = vpop.eup %2478 }
 0xa09   :  { %v1661_v6 = vpop.xlane.xlu0 %1660  ;;  %v1678_v8 = vmul.f32 %v2479_v5, %v2463_v41  ;;  %v2355_v5 = vld [vmem:[%s3474_s8 + $0x60] sm:$0xff] }
 0xa0a   :  { %2480 = vrcp.f32 %v1661_v6 }
 0xa0b   :  { %2330 = vmatmul.msk.f32.gmra.mxu2 %vm607_vm6, %v1678_v8 }
 0xa10   :  { %v2481_v10 = vpop.eup %2480 }
 0xa11   :  { %v1664_v7 = vpop.xlane.xlu1 %1663  ;;  %v1679_v11 = vmul.f32 %v2481_v10, %v2465_v46  ;;  %v2354_v10 = vld [vmem:[%s3474_s8 + $0x58] sm:$0xff] }
 0xa12   :  { %2482 = vrcp.f32 %v1664_v7 }
 0xa13   :  { %2331 = vmatmul.msk.f32.gmra.mxu2 %vm607_vm6, %v1679_v11  ;;  %v2353_v11 = vld [vmem:[%s3474_s8 + $0x50] sm:$0xff] }
 0xa18   :  { %v2483_v12 = vpop.eup %2482 }
 0xa19   :  { %v1680_v9 = vmul.f32 %v2483_v12, %v2467_v50 }
 0xa1b   :  { %2332 = vmatmul.msk.f32.gmra.mxu2 %vm607_vm6, %v1680_v9 }
 0xa66   :  { %v1722_v14 = vpop.f32.mrf.mxu2 }
 0xa6e   :  { %v1725_v17 = vpop.f32.mrf.mxu2 }
 0xa76   :  { %v1728_v18 = vpop.f32.mrf.mxu2 }
 0xa77   :  { %2335 = vmatmul.msk.f32.vlgmr.msra.gmra.mxu3 %vm517_vm5, %v1728_v18 }
 0xa7e   :  { %v1731_v20 = vpop.f32.mrf.mxu2 }
 0xa7f   :  { %2336 = vmatmul.msk.f32.gmra.mxu3 %vm517_vm5, %v1731_v20  ;;  %v2405_v20 = vld [vmem:[%s3475_s9 + $0x8] ss:$0 sm:$0xff] }
 0xa86   :  { %v1734_v21 = vpop.f32.mrf.mxu2 }
 0xa87   :  { %2341 = vmatmul.msk.f32.vlgmr.msrb.gmra.mxu3 %vm517_vm5, %v1722_v14 }
 0xa8e   :  { %v1737_v23 = vpop.f32.mrf.mxu2 }
 0xa8f   :  { %2342 = vmatmul.msk.f32.gmra.mxu3 %vm517_vm5, %v1725_v17  ;;  %v2404_v17 = vld [vmem:[%s3475_s9 + $0x7] ss:$0 sm:$0xff] }
 0xa96   :  { %v1740_v22 = vpop.f32.mrf.mxu2 }
 0xa97   :  { %2339 = vmatmul.msk.f32.vlgmr.msrb.gmra.mxu0 %vm517_vm5, %v1740_v22 }
 0xa98   :  { %1998 = vmatpush.msrb.mxu0 %v2358_v0 }
 0xa9a   :  { %1999 = vmatpush.msrb.mxu0 %v2357_v1 }
 0xa9c   :  { %2000 = vmatpush.msrb.mxu0 %v2356_v2 }
 0xa9e   :  { %v1743_v24 = vpop.f32.mrf.mxu2  ;;  %2001 = vmatpush.msrb.mxu0 %v2355_v5 }
 0xa9f   :  { %2340 = vmatmul.msk.f32.gmra.mxu0 %vm517_vm5, %v1743_v24 }
 0xaa0   :  { %2002 = vmatpush.msrb.mxu0 %v2354_v10 }
 0xaa2   :  { %2003 = vmatpush.msrb.mxu0 %v2353_v11  ;;  %v2408_v11 = vld [vmem:[%s3475_s9 + $0x9] ss:$0 sm:$0xff] }
 0xaa7   :  { %2343 = vmatmul.msk.f32.vlgmr.msra.gmra.mxu0 %vm517_vm5, %v1734_v21 }
 0xaaf   :  { %2344 = vmatmul.msk.f32.gmra.mxu0 %vm517_vm5, %v1737_v23 }
 0xafa   :  { %v1773_v25 = vpop.f32.mrf.mxu3 }
 0xb02   :  { %v1776_v28 = vpop.f32.mrf.mxu3 }
 0xb0a   :  { %v1835_v30 = vpop.f32.mrf.mxu3 }
 0xb0b   :  { %v1836_v32 = vadd.f32 %v1835_v30, %v1773_v25 }
 0xb12   :  { %v1838_v37 = vpop.f32.mrf.mxu3 }
 0xb13   :  { %v1839_v40 = vadd.f32 %v1838_v37, %v1776_v28 }
 0xb14   :  { %v1806_v26 = vpop.f32.mrf.mxu0 }
 0xb1c   :  { %v1809_v29 = vpop.f32.mrf.mxu0 }
 0xb24   :  { %v1864_v31 = vpop.f32.mrf.mxu0 }
 0xb25   :  { %v1865_v27 = vadd.f32 %v1864_v31, %v1806_v26 }
 0xb27   :  { %v1870_v35 = vadd.f32 %v1865_v27, %v1836_v32  ;;  %v2352_v32 = vld [vmem:[%s3474_s8 + $0x48] sm:$0xff]  ;;  %v2351_v27 = vld [vmem:[%s3474_s8 + $0x40] sm:$0xff] }
 0xb28   :  { %2004 = vmatpush.msrb.mxu0 %v2352_v32 }
 0xb29   :  { %v1875_v36 = vadd.f32 %v2403_v34, %v1870_v35 }
 0xb2a   :  { %2005 = vmatpush.msrb.mxu0 %v2351_v27 }
 0xb2b   :  { %v1877_v38 = vadd.f32 %v1875_v36, %v3137_v60 }
 0xb2c   :  { %v1867_v39 = vpop.f32.mrf.mxu0 }
 0xb2d   :  { %v1868_v41 = vadd.f32 %v1867_v39, %v1809_v29  ;;  %v1879_v42 = vsel %vm124_vm4, %v1877_v38, 0.0 }
 0xb2e   :  { %1880 = vadd.xlane.f32.xlu2 %v1879_v42 }
 0xb2f   :  { %v1871_v43 = vadd.f32 %v1868_v41, %v1839_v40  ;;  %v2407_v41 = vld [vmem:[%s3475_s9 + $0xc] ss:$0 sm:$0xff] }
 0xb31   :  { %v1876_v44 = vadd.f32 %v2403_v34, %v1871_v43  ;;  %v2406_v34 = vld [vmem:[%s3475_s9 + $0xd] ss:$0 sm:$0xff] }
 0xb33   :  { %v1878_v45 = vadd.f32 %v1876_v44, %v3175_v33  ;;  %v2348_v33 = vld [vmem:[%s3473_s7 + $0x38] sm:$0xff] }
 0xb34   :  { %1959 = vmatpush.msra.mxu3 %v2348_v33 }
 0xb35   :  { %v1882_v46 = vsel %vm124_vm4, %v1878_v45, 0.0 }
 0xb36   :  { %1883 = vadd.xlane.f32.xlu0 %v1882_v46  ;;  %1960 = vmatpush.msra.mxu3 %v2347_v57 }
 0xb38   :  { %1961 = vmatpush.msra.mxu3 %v2346_v58 }
 0xb3a   :  { %1962 = vmatpush.msra.mxu3 %v2345_v59 }
 0xba1   :  { %v1881_v49 = vpop.xlane.xlu2 %1880 }
 0xba2   :  { %v1885_v48 = vmul.f32 %v1881_v49, %v2958_v15 }
 0xba4   :  { %v1887_v50 = vsub.f32 %v1877_v38, %v1885_v48 }
 0xba6   :  { %v1889_v51 = vmul.f32 %v1887_v50, %v1887_v50 }
 0xba8   :  { %v1891_v60 = vsel %vm124_vm4, %v1889_v51, 0.0 }
 0xba9   :  { %v1884_v52 = vpop.xlane.xlu0 %1883  ;;  %1892 = vadd.xlane.f32.xlu1 %v1891_v60 }
 0xbaa   :  { %v1886_v53 = vmul.f32 %v1884_v52, %v2958_v15 }
 0xbac   :  { %v1888_v54 = vsub.f32 %v1878_v45, %v1886_v53 }
 0xbae   :  { %v1890_v55 = vmul.f32 %v1888_v54, %v1888_v54 }
 0xbb0   :  { %v1894_v56 = vsel %vm124_vm4, %v1890_v55, 0.0 }
 0xbb1   :  { %1895 = vadd.xlane.f32.xlu2 %v1894_v56 }
 0xc1c   :  { %v1893_v61 = vpop.xlane.xlu1 %1892 }
 0xc1d   :  { %v1897_v62 = vmul.f32 %v1893_v61, %v2958_v15 }
 0xc1f   :  { %v1899_v63 = vadd.f32 1e-05, %v1897_v62 }
 0xc21   :  { %2484 = vrsqrt.f32 %v1899_v63  ;;  %vm1907_vm7 = vweird.f32 %v1899_v63 }
 0xc24   :  { %v1896_v3 = vpop.xlane.xlu2 %1895 }
 0xc25   :  { %v1898_v4 = vmul.f32 %v1896_v3, %v2958_v15 }
 0xc27   :  { %v2485_v6 = vpop.eup %2484  ;;  %v1900_v8 = vadd.f32 1e-05, %v1898_v4 }
 0xc28   :  { %v1902_v7 = vmul.f32 %v2485_v6, %v1899_v63  ;;  %vm1908_vm5 = vweird.f32 %v2485_v6 }
 0xc29   :  { %2486 = vrsqrt.f32 %v1900_v8  ;;  %vm1909_vm8 = vmor %vm1907_vm7, %vm1908_vm5  ;;  %vm1917_vm10 = vweird.f32 %v1900_v8 }
 0xc2a   :  { %v1903_v12 = vmul.f32 %v2485_v6, %v1902_v7 }
 0xc2c   :  { %v1904_v9 = vmul.f32 0.5, %v1903_v12 }
 0xc2e   :  { %v1905_v13 = vsub.f32 1.5, %v1904_v9 }
 0xc2f   :  { %v2487_v14 = vpop.eup %2486 }
 0xc30   :  { %v1906_v47 = vmul.f32 %v2485_v6, %v1905_v13  ;;  %v1912_v16 = vmul.f32 %v2487_v14, %v1900_v8  ;;  %vm1918_vm9 = vweird.f32 %v2487_v14  ;;  %v2409_v13 = vld [vmem:[%s3475_s9 + $0xa] ss:$0 sm:$0xff]  ;;  %s2530_s9 = smov 128  }
 0xc31   :  { %vm1919_vm11 = vmor %vm1917_vm10, %vm1918_vm9 }
 0xc32   :  { %v1910_v18 = vsel %vm1909_vm8, %v2485_v6, %v1906_v47  ;;  %v1913_v19 = vmul.f32 %v2487_v14, %v1912_v16 }
 0xc33   :  { %v1921_v21 = vmul.f32 %v1910_v18, %v1887_v50 }
 0xc34   :  { %v1914_v23 = vmul.f32 0.5, %v1913_v19 }
 0xc35   :  { %v1926_v22 = vmul.f32 %v2404_v17, %v1921_v21 }
 0xc36   :  { %v1915_v24 = vsub.f32 1.5, %v1914_v23 }
 0xc37   :  { %v1931_v25 = vadd.f32 %v2405_v20, %v1926_v22 }
 0xc38   :  { %v1916_v26 = vmul.f32 %v2487_v14, %v1915_v24 }
 0xc39   :  { %2349 = vmatmul.msk.f32.vlgmr.msra.gmra.mxu3 %vm124_vm4, %v1931_v25 }
 0xc3a   :  { %v1920_v28 = vsel %vm1919_vm11, %v2487_v14, %v1916_v26 }
 0xc3b   :  { %v1922_v29 = vmul.f32 %v1920_v28, %v1888_v54 }
 0xc3d   :  { %v1927_v30 = vmul.f32 %v2404_v17, %v1922_v29 }
 0xc3f   :  { %v1932_v31 = vadd.f32 %v2405_v20, %v1927_v30 }
 0xc41   :  { %2350 = vmatmul.msk.f32.gmra.mxu3 %vm124_vm4, %v1932_v31 }
 0xcbc   :  { %v1964_v35 = vpop.f32.mrf.mxu3 }
 0xcbd   :  { %v1965_v36 = vadd.f32 %v2406_v34, %v1964_v35 }
 0xcbf   :  { %v1970_v37 = vmax.f32 %v1965_v36, 0.0 }
 0xcc1   :  { %2359 = vmatmul.msk.f32.vlgmr.msrb.gmra.mxu0 %vm607_vm6, %v1970_v37 }
 0xcc4   :  { %v1967_v38 = vpop.f32.mrf.mxu3 }
 0xcc5   :  { %v1968_v39 = vadd.f32 %v2406_v34, %v1967_v38 }
 0xcc7   :  { %v1971_v40 = vmax.f32 %v1968_v39, 0.0 }
 0xcc9   :  { %2360 = vmatmul.msk.f32.gmra.mxu0 %vm607_vm6, %v1971_v40 }
 0xd3e   :  { %v2007_v42 = vpop.f32.mrf.mxu0 }
 0xd3f   :  { %v2008_v43 = vadd.f32 %v2407_v41, %v2007_v42 }
 0xd41   :  { %v2013_v44 = vadd.f32 %v2008_v43, %v1931_v25 }
 0xd43   :  { %v2015_v45 = vsel %vm124_vm4, %v2013_v44, 0.0 }
 0xd44   :  { %2016 = vadd.xlane.f32.xlu0 %v2015_v45 }
 0xd46   :  { %v2010_v46 = vpop.f32.mrf.mxu0 }
 0xd47   :  { %v2011_v49 = vadd.f32 %v2407_v41, %v2010_v46 }
 0xd49   :  { %v2014_v48 = vadd.f32 %v2011_v49, %v1932_v31 }
 0xd4b   :  { %v2018_v50 = vsel %vm124_vm4, %v2014_v48, 0.0 }
 0xd4c   :  { %2019 = vadd.xlane.f32.xlu1 %v2018_v50 }
 0xdb7   :  { %v2017_v51 = vpop.xlane.xlu0 %2016 }
 0xdb8   :  { %v2021_v60 = vmul.f32 %v2017_v51, %v2958_v15 }
 0xdba   :  { %v2023_v52 = vsub.f32 %v2013_v44, %v2021_v60 }
 0xdbc   :  { %v2025_v53 = vmul.f32 %v2023_v52, %v2023_v52 }
 0xdbe   :  { %v2027_v54 = vsel %vm124_vm4, %v2025_v53, 0.0 }
 0xdbf   :  { %2028 = vadd.xlane.f32.xlu2 %v2027_v54  ;;  %v2020_v55 = vpop.xlane.xlu1 %2019 }
 0xdc0   :  { %v2022_v56 = vmul.f32 %v2020_v55, %v2958_v15 }
 0xdc2   :  { %v2024_v33 = vsub.f32 %v2014_v48, %v2022_v56 }
 0xdc4   :  { %v2026_v57 = vmul.f32 %v2024_v33, %v2024_v33 }
 0xdc6   :  { %v2030_v58 = vsel %vm124_vm4, %v2026_v57, 0.0 }
 0xdc7   :  { %2031 = vadd.xlane.f32.xlu0 %v2030_v58 }
 0xe32   :  { %v2029_v59 = vpop.xlane.xlu2 %2028 }
 0xe33   :  { %v2033_v61 = vmul.f32 %v2029_v59, %v2958_v15 }
 0xe35   :  { %v2035_v62 = vadd.f32 1e-05, %v2033_v61 }
 0xe37   :  { %2488 = vrsqrt.f32 %v2035_v62  ;;  %vm2043_vm12 = vweird.f32 %v2035_v62 }
 0xe3a   :  { %v2032_v63 = vpop.xlane.xlu0 %2031 }
 0xe3b   :  { %v2034_v0 = vmul.f32 %v2032_v63, %v2958_v15 }
 0xe3d   :  { %v2489_v1 = vpop.eup %2488  ;;  %v2036_v2 = vadd.f32 1e-05, %v2034_v0 }
 0xe3e   :  { %v2038_v3 = vmul.f32 %v2489_v1, %v2035_v62  ;;  %vm2044_vm6 = vweird.f32 %v2489_v1 }
 0xe3f   :  { %2490 = vrsqrt.f32 %v2036_v2  ;;  %vm2045_vm13 = vmor %vm2043_vm12, %vm2044_vm6  ;;  %vm2053_vm15 = vweird.f32 %v2036_v2 }
 0xe40   :  { %v2039_v4 = vmul.f32 %v2489_v1, %v2038_v3 }
 0xe42   :  { %v2040_v5 = vmul.f32 0.5, %v2039_v4 }
 0xe44   :  { %v2041_v6 = vsub.f32 1.5, %v2040_v5 }
 0xe45   :  { %v2491_v8 = vpop.eup %2490 }
 0xe46   :  { %v2042_v10 = vmul.f32 %v2489_v1, %v2041_v6  ;;  %v2048_v7 = vmul.f32 %v2491_v8, %v2036_v2  ;;  %vm2054_vm14 = vweird.f32 %v2491_v8 }
 0xe47   :  { %vm2055_vm0 = vmor %vm2053_vm15, %vm2054_vm14 }
 0xe48   :  { %v2046_v12 = vsel %vm2045_vm13, %v2489_v1, %v2042_v10  ;;  %v2049_v9 = vmul.f32 %v2491_v8, %v2048_v7 }
 0xe49   :  { %v2057_v15 = vmul.f32 %v2046_v12, %v2023_v52 }
 0xe4a   :  { %v2050_v14 = vmul.f32 0.5, %v2049_v9 }
 0xe4b   :  { %v2062_v47 = vmul.f32 %v2408_v11, %v2057_v15 }
 0xe4c   :  { %v2051_v16 = vsub.f32 1.5, %v2050_v14 }
 0xe4d   :  { %v2067_v17 = vadd.f32 %v2409_v13, %v2062_v47 }
 0xe4e   :  { %v2052_v18 = vmul.f32 %v2491_v8, %v2051_v16 }
 0xe4f   :  { %2069 = vst.msk [vmem:[#allocation2] sm:$0xff] %vm124_vm4, %v2067_v17 }
 0xe50   :  { %v2056_v19 = vsel %vm2055_vm0, %v2491_v8, %v2052_v18 }
 0xe51   :  { %v2058_v20 = vmul.f32 %v2056_v19, %v2024_v33 }
 0xe53   :  { %v2063_v21 = vmul.f32 %v2408_v11, %v2058_v20 }
 0xe55   :  { %v2068_v23 = vadd.f32 %v2409_v13, %v2063_v21 }
 0xe57   :  { %2070 = vst.msk [vmem:[#allocation2 + $0x8] sm:$0xff] %vm124_vm4, %v2068_v23 }
 0xe58   :  { %2083 = dma.vmem_to_hbm [thread:$0]  %s2076_s3, 256, %s2078_s25, [#allocation3], %s2530_s9, %s2530_s9, %s2531_s26  }
 0xe59   :  { %2524 = dma.done.wait [#allocation3], 256  }
 0xe5a   :  { %2525 = vsyncadd [#allocation3], 4294967040 }
 0xe5b   :  { %2088 = vsyncpa [#allocation3], 1 }

</bundles_post_ra>
